<compile_context>
chip_gen: v7x
topology: tpu7x:2x2x1
jax: 0.10.0
libtpu: 0.0.40
codegen_flags: <defaults>
</compile_context>

<pallas_src>
import numpy as np
import jax
import jax.numpy as jnp
from jax.experimental import pallas as pl
from jax.experimental.pallas import tpu as pltpu


def _matting_head_kernel(x_ref, w3_ref, bias_ref, w1_ref, b1_ref, o_ref):
    """Fused conv3x3 (+folded BN scale) + bias + ReLU + conv1x1; one sample/step.

    x_ref   : (1, H+2, W+2, C_in)  padded NHWC input tile (bf16, VMEM)
    w3_ref  : (9*C_in, MID)        conv3x3 weight with BN scale folded (bf16)
    bias_ref: (1, MID)             folded BN bias (includes conv3x3 bias), f32
    w1_ref  : (1, MID)             conv1x1 weight as a row, f32
    b1_ref  : (1, 1)               conv1x1 bias, f32
    o_ref   : (1, H*W, 1)          output tile, f32
    """
    _, HP, WP, C = x_ref.shape
    H, W = HP - 2, WP - 2
    M = H * W

    # In-kernel im2col: 9 shifted VMEM slices, lane-concatenated into one
    # (M, 9*C) slab in vregs -> a single K=9*C MXU matmul.  No im2col ever
    # touches HBM and no VMEM scratch accumulator is needed.
    taps = []
    for kh in range(3):
        for kw in range(3):
            taps.append(x_ref[0, kh:kh + H, kw:kw + W, :].reshape(M, C))
    xcol = jnp.concatenate(taps, axis=-1)                      # (M, 9C) bf16

    # conv3x3 with BN scale pre-folded into the weight; f32 accumulation.
    acc = jnp.dot(xcol, w3_ref[...], preferred_element_type=jnp.float32)

    # Folded BN bias + ReLU (f32 VPU work on the f32 accumulator).
    h = jnp.maximum(acc + bias_ref[...], 0.0)                  # (M, MID) f32

    # conv1x1 (MID -> 1): VPU multiply + lane reduction + bias.
    out = jnp.sum(h * w1_ref[...], axis=-1, keepdims=True) + b1_ref[...]
    o_ref[0] = out.astype(o_ref.dtype)


def matting_head_forward(x_nchw, params, *, bn_eps=1e-5):
    """Forward of Matting_Head (eval-mode BN). NCHW in / NCHW out."""
    N, C_in, H, W = x_nchw.shape
    w3 = params["conv3_w"]          # (MID, C_in, 3, 3)  PyTorch OIHW
    b3 = params["conv3_b"]          # (MID,)
    gamma = params["bn_gamma"]      # (MID,)
    beta = params["bn_beta"]        # (MID,)
    mean = params["bn_mean"]        # (MID,)
    var = params["bn_var"]          # (MID,)
    w1 = params["conv1_w"]          # (1, MID, 1, 1)
    b1 = params["conv1_b"]          # (1,)
    MID = w3.shape[0]

    # --- wrapper glue: layout + one-time weight folding (all f32 math) ---
    inv_std = jax.lax.rsqrt(var.astype(jnp.float32) + bn_eps)
    scale = gamma.astype(jnp.float32) * inv_std                          # (MID,)
    bias = ((b3.astype(jnp.float32) - mean.astype(jnp.float32)) * scale
            + beta.astype(jnp.float32)).reshape(1, MID)                  # (1, MID)

    # conv3x3 OIHW -> (kh*3+kw)*C_in + c row ordering, BN scale folded in,
    # then cast to bf16 (native MXU input dtype).
    w3_mat = jnp.transpose(w3.astype(jnp.float32), (2, 3, 1, 0))
    w3_mat = w3_mat.reshape(9 * C_in, MID) * scale[None, :]
    w3_mat = w3_mat.astype(jnp.bfloat16)                                 # (9C, MID)

    w1_row = w1.reshape(1, MID).astype(jnp.float32)                      # (1, MID)
    b1_mat = b1.reshape(1, 1).astype(jnp.float32)                        # (1, 1)

    # Module interface is NCHW -> one transpose; input fed to the kernel in bf16.
    x_nhwc = jnp.transpose(x_nchw, (0, 2, 3, 1)).astype(jnp.bfloat16)
    x_pad = jnp.pad(x_nhwc, ((0, 0), (1, 1), (1, 1), (0, 0)))            # (N,H+2,W+2,C)

    out_flat = pl.pallas_call(
        _matting_head_kernel,
        out_shape=jax.ShapeDtypeStruct((N, H * W, 1), jnp.float32),
        grid=(N,),
        in_specs=[
            pl.BlockSpec((1, H + 2, W + 2, C_in), lambda n: (n, 0, 0, 0)),  # x
            pl.BlockSpec((9 * C_in, MID), lambda n: (0, 0)),                # w3
            pl.BlockSpec((1, MID), lambda n: (0, 0)),                       # bias
            pl.BlockSpec((1, MID), lambda n: (0, 0)),                       # w1
            pl.BlockSpec((1, 1), lambda n: (0, 0)),                         # b1
        ],
        out_specs=pl.BlockSpec((1, H * W, 1), lambda n: (n, 0, 0)),
        compiler_params=pltpu.CompilerParams(
            dimension_semantics=("parallel",)),
    )(x_pad, w3_mat, bias, w1_row, b1_mat)

    out = out_flat.reshape(N, H, W, 1)
    return jnp.transpose(out, (0, 3, 1, 2))                               # (N,1,H,W)


def _reference(x, params, bn_eps=1e-5):
    """Pure-JAX f32 reference with PyTorch Matting_Head (eval) semantics."""
    w3, b3 = params["conv3_w"], params["conv3_b"]
    gamma, beta = params["bn_gamma"], params["bn_beta"]
    mean, var = params["bn_mean"], params["bn_var"]
    w1, b1 = params["conv1_w"], params["conv1_b"]

    c = jax.lax.conv_general_dilated(
        x, w3, window_strides=(1, 1), padding=((1, 1), (1, 1)),
        dimension_numbers=("NCHW", "OIHW", "NCHW"))
    c = c + b3[None, :, None, None]
    inv = jax.lax.rsqrt(var + bn_eps)
    c = (c - mean[None, :, None, None]) * (gamma * inv)[None, :, None, None] \
        + beta[None, :, None, None]
    c = jnp.maximum(c, 0.0)
    o = jax.lax.conv_general_dilated(
        c, w1, window_strides=(1, 1), padding=((0, 0), (0, 0)),
        dimension_numbers=("NCHW", "OIHW", "NCHW"))
    return o + b1[None, :, None, None]


if __name__ == "__main__":
    key = jax.random.PRNGKey(0)
    ks = jax.random.split(key, 9)

    # Module defaults: in_chans=32, mid_chans=16; small spatial/batch demo.
    N, C_in, H, W = 2, 32, 16, 16
    MID = 16

    x = jax.random.normal(ks[0], (N, C_in, H, W), dtype=jnp.float32)
    params = {
        "conv3_w": jax.random.normal(ks[1], (MID, C_in, 3, 3), jnp.float32)
                   / np.sqrt(C_in * 9),
        "conv3_b": 0.1 * jax.random.normal(ks[2], (MID,), jnp.float32),
        "bn_gamma": 1.0 + 0.1 * jax.random.normal(ks[3], (MID,), jnp.float32),
        "bn_beta": 0.1 * jax.random.normal(ks[4], (MID,), jnp.float32),
        "bn_mean": 0.1 * jax.random.normal(ks[5], (MID,), jnp.float32),
        "bn_var": jax.random.uniform(ks[6], (MID,), jnp.float32, 0.5, 1.5),
        "conv1_w": jax.random.normal(ks[7], (1, MID, 1, 1), jnp.float32)
                   / np.sqrt(MID),
        "conv1_b": 0.05 * jax.random.normal(ks[8], (1,), jnp.float32),
    }

    out = matting_head_forward(x, params)
    out = jax.block_until_ready(out)

    ref = jax.block_until_ready(_reference(x, params))

    assert out.shape == (N, 1, H, W), out.shape
    # Kernel feeds bf16 activations/conv3x3 weights (per perf review) with f32
    # accumulation; tolerance is loosened accordingly vs. the f32 reference.
    assert np.allclose(np.asarray(out), np.asarray(ref), atol=5e-2, rtol=5e-2), \
        float(np.max(np.abs(np.asarray(out) - np.asarray(ref))))
    print("KERNEL_OK")
</pallas_src>

<mosaic_0001>
module attributes {stable_mosaic.version = 11 : i64} {
  func.func @_matting_head_kernel(%arg0: i32, %arg1: memref<1x18x18x32xbf16, #tpu.memory_space<vmem>>, %arg2: memref<288x16xbf16, #tpu.memory_space<vmem>>, %arg3: memref<1x16xf32, #tpu.memory_space<vmem>>, %arg4: memref<1x16xf32, #tpu.memory_space<vmem>>, %arg5: memref<1x1xf32, #tpu.memory_space<vmem>>, %arg6: memref<1x256x1xf32, #tpu.memory_space<vmem>>) attributes {dimension_semantics = [#tpu.dimension_semantics<parallel>], iteration_bounds = array<i64: 2>, scalar_prefetch = 0 : i64, scratch_operands = 0 : i64, tpu.core_type = #tpu.core_type<tc>, window_params = [{transform_indices = @transform_0, window_bounds = array<i64: 1, 18, 18, 32>}, {pipeline_mode = #tpu.pipeline_mode<synchronous>, transform_indices = @transform_1, window_bounds = array<i64: 288, 16>}, {pipeline_mode = #tpu.pipeline_mode<synchronous>, transform_indices = @transform_2, window_bounds = array<i64: 1, 16>}, {pipeline_mode = #tpu.pipeline_mode<synchronous>, transform_indices = @transform_3, window_bounds = array<i64: 1, 16>}, {pipeline_mode = #tpu.pipeline_mode<synchronous>, transform_indices = @transform_4, window_bounds = array<i64: 1, 1>}, {transform_indices = @transform_5, window_bounds = array<i64: 1, 256, 1>}]} {
    %c0 = arith.constant 0 : index
    %c0_0 = arith.constant 0 : index
    %c0_1 = arith.constant 0 : index
    %c0_2 = arith.constant 0 : index
    %0 = vector.load %arg1[%c0, %c0_0, %c0_1, %c0_2] : memref<1x18x18x32xbf16, #tpu.memory_space<vmem>>, vector<1x16x16x32xbf16>
    %1 = vector.shape_cast %0 : vector<1x16x16x32xbf16> to vector<16x16x32xbf16>
    %2 = vector.shape_cast %1 : vector<16x16x32xbf16> to vector<256x32xbf16>
    %c0_3 = arith.constant 0 : index
    %c0_4 = arith.constant 0 : index
    %c1 = arith.constant 1 : index
    %c0_5 = arith.constant 0 : index
    %3 = vector.load %arg1[%c0_3, %c0_4, %c1, %c0_5] : memref<1x18x18x32xbf16, #tpu.memory_space<vmem>>, vector<1x16x16x32xbf16>
    %4 = vector.shape_cast %3 : vector<1x16x16x32xbf16> to vector<16x16x32xbf16>
    %5 = vector.shape_cast %4 : vector<16x16x32xbf16> to vector<256x32xbf16>
    %c0_6 = arith.constant 0 : index
    %c0_7 = arith.constant 0 : index
    %c2 = arith.constant 2 : index
    %c0_8 = arith.constant 0 : index
    %6 = vector.load %arg1[%c0_6, %c0_7, %c2, %c0_8] : memref<1x18x18x32xbf16, #tpu.memory_space<vmem>>, vector<1x16x16x32xbf16>
    %7 = vector.shape_cast %6 : vector<1x16x16x32xbf16> to vector<16x16x32xbf16>
    %8 = vector.shape_cast %7 : vector<16x16x32xbf16> to vector<256x32xbf16>
    %c0_9 = arith.constant 0 : index
    %c1_10 = arith.constant 1 : index
    %c0_11 = arith.constant 0 : index
    %c0_12 = arith.constant 0 : index
    %9 = vector.load %arg1[%c0_9, %c1_10, %c0_11, %c0_12] : memref<1x18x18x32xbf16, #tpu.memory_space<vmem>>, vector<1x16x16x32xbf16>
    %10 = vector.shape_cast %9 : vector<1x16x16x32xbf16> to vector<16x16x32xbf16>
    %11 = vector.shape_cast %10 : vector<16x16x32xbf16> to vector<256x32xbf16>
    %c0_13 = arith.constant 0 : index
    %c1_14 = arith.constant 1 : index
    %c1_15 = arith.constant 1 : index
    %c0_16 = arith.constant 0 : index
    %12 = vector.load %arg1[%c0_13, %c1_14, %c1_15, %c0_16] : memref<1x18x18x32xbf16, #tpu.memory_space<vmem>>, vector<1x16x16x32xbf16>
    %13 = vector.shape_cast %12 : vector<1x16x16x32xbf16> to vector<16x16x32xbf16>
    %14 = vector.shape_cast %13 : vector<16x16x32xbf16> to vector<256x32xbf16>
    %c0_17 = arith.constant 0 : index
    %c1_18 = arith.constant 1 : index
    %c2_19 = arith.constant 2 : index
    %c0_20 = arith.constant 0 : index
    %15 = vector.load %arg1[%c0_17, %c1_18, %c2_19, %c0_20] : memref<1x18x18x32xbf16, #tpu.memory_space<vmem>>, vector<1x16x16x32xbf16>
    %16 = vector.shape_cast %15 : vector<1x16x16x32xbf16> to vector<16x16x32xbf16>
    %17 = vector.shape_cast %16 : vector<16x16x32xbf16> to vector<256x32xbf16>
    %c0_21 = arith.constant 0 : index
    %c2_22 = arith.constant 2 : index
    %c0_23 = arith.constant 0 : index
    %c0_24 = arith.constant 0 : index
    %18 = vector.load %arg1[%c0_21, %c2_22, %c0_23, %c0_24] : memref<1x18x18x32xbf16, #tpu.memory_space<vmem>>, vector<1x16x16x32xbf16>
    %19 = vector.shape_cast %18 : vector<1x16x16x32xbf16> to vector<16x16x32xbf16>
    %20 = vector.shape_cast %19 : vector<16x16x32xbf16> to vector<256x32xbf16>
    %c0_25 = arith.constant 0 : index
    %c2_26 = arith.constant 2 : index
    %c1_27 = arith.constant 1 : index
    %c0_28 = arith.constant 0 : index
    %21 = vector.load %arg1[%c0_25, %c2_26, %c1_27, %c0_28] : memref<1x18x18x32xbf16, #tpu.memory_space<vmem>>, vector<1x16x16x32xbf16>
    %22 = vector.shape_cast %21 : vector<1x16x16x32xbf16> to vector<16x16x32xbf16>
    %23 = vector.shape_cast %22 : vector<16x16x32xbf16> to vector<256x32xbf16>
    %c0_29 = arith.constant 0 : index
    %c2_30 = arith.constant 2 : index
    %c2_31 = arith.constant 2 : index
    %c0_32 = arith.constant 0 : index
    %24 = vector.load %arg1[%c0_29, %c2_30, %c2_31, %c0_32] : memref<1x18x18x32xbf16, #tpu.memory_space<vmem>>, vector<1x16x16x32xbf16>
    %25 = vector.shape_cast %24 : vector<1x16x16x32xbf16> to vector<16x16x32xbf16>
    %26 = vector.shape_cast %25 : vector<16x16x32xbf16> to vector<256x32xbf16>
    %27 = tpu.concatenate %2, %5, %8, %11, %14, %17, %20, %23, %26 in 1 : vector<256x32xbf16>, vector<256x32xbf16>, vector<256x32xbf16>, vector<256x32xbf16>, vector<256x32xbf16>, vector<256x32xbf16>, vector<256x32xbf16>, vector<256x32xbf16>, vector<256x32xbf16> -> vector<256x288xbf16>
    %c0_33 = arith.constant 0 : index
    %c0_34 = arith.constant 0 : index
    %28 = vector.load %arg2[%c0_33, %c0_34] : memref<288x16xbf16, #tpu.memory_space<vmem>>, vector<288x16xbf16>
    %cst = arith.constant dense<0.000000e+00> : vector<256x16xf32>
    %29 = tpu.matmul %27, %28, %cst {dimension_numbers = #tpu.dot_dimension_numbers<[1], [0], [0], [1], [0, 0, 1, 1], [], []>} : vector<256x288xbf16>, vector<288x16xbf16>, vector<256x16xf32> -> vector<256x16xf32>
    %c0_35 = arith.constant 0 : index
    %c0_36 = arith.constant 0 : index
    %30 = vector.load %arg3[%c0_35, %c0_36] : memref<1x16xf32, #tpu.memory_space<vmem>>, vector<1x16xf32>
    %31 = vector.broadcast %30 : vector<1x16xf32> to vector<256x16xf32>
    %32 = arith.addf %29, %31 : vector<256x16xf32>
    %cst_37 = arith.constant 0.000000e+00 : f32
    %33 = vector.broadcast %cst_37 : f32 to vector<256x16xf32>
    %34 = arith.maximumf %32, %33 : vector<256x16xf32>
    %c0_38 = arith.constant 0 : index
    %c0_39 = arith.constant 0 : index
    %35 = vector.load %arg4[%c0_38, %c0_39] : memref<1x16xf32, #tpu.memory_space<vmem>>, vector<1x16xf32>
    %36 = vector.broadcast %35 : vector<1x16xf32> to vector<256x16xf32>
    %37 = arith.mulf %34, %36 : vector<256x16xf32>
    %cst_40 = arith.constant dense<0.000000e+00> : vector<256xf32>
    %38 = vector.multi_reduction <add>, %37, %cst_40 [1] : vector<256x16xf32> to vector<256xf32>
    %39 = vector.shape_cast %38 : vector<256xf32> to vector<256x1xf32>
    %c0_41 = arith.constant 0 : index
    %c0_42 = arith.constant 0 : index
    %40 = vector.load %arg5[%c0_41, %c0_42] : memref<1x1xf32, #tpu.memory_space<vmem>>, vector<1x1xf32>
    %41 = vector.broadcast %40 : vector<1x1xf32> to vector<256x1xf32>
    %42 = arith.addf %39, %41 : vector<256x1xf32>
    %c0_43 = arith.constant 0 : index
    %c0_44 = arith.constant 0 : index
    %c0_45 = arith.constant 0 : index
    %43 = vector.load %arg6[%c0_43, %c0_44, %c0_45] : memref<1x256x1xf32, #tpu.memory_space<vmem>>, vector<1x256x1xf32>
    %44 = vector.shape_cast %43 : vector<1x256x1xf32> to vector<256x1xf32>
    %45 = vector.shape_cast %42 : vector<256x1xf32> to vector<1x256x1xf32>
    tpu.vector_store %arg6[%c0_43, %c0_44, %c0_45], %45 {strides = array<i32>} : memref<1x256x1xf32, #tpu.memory_space<vmem>>, vector<1x256x1xf32>,
    return
  }
  func.func @transform_0(%arg0: i32) -> (i32, i32, i32, i32) {
    %c0_i32 = arith.constant 0 : i32
    %c0_i32_0 = arith.constant 0 : i32
    %c0_i32_1 = arith.constant 0 : i32
    %c0_i32_2 = arith.constant 0 : i32
    return %arg0, %c0_i32, %c0_i32_0, %c0_i32_1 : i32, i32, i32, i32
  }
  func.func @transform_1(%arg0: i32) -> (i32, i32) {
    %c0_i32 = arith.constant 0 : i32
    %c0_i32_0 = arith.constant 0 : i32
    %c0_i32_1 = arith.constant 0 : i32
    return %c0_i32, %c0_i32_0 : i32, i32
  }
  func.func @transform_2(%arg0: i32) -> (i32, i32) {
    %c0_i32 = arith.constant 0 : i32
    %c0_i32_0 = arith.constant 0 : i32
    %c0_i32_1 = arith.constant 0 : i32
    return %c0_i32, %c0_i32_0 : i32, i32
  }
  func.func @transform_3(%arg0: i32) -> (i32, i32) {
    %c0_i32 = arith.constant 0 : i32
    %c0_i32_0 = arith.constant 0 : i32
    %c0_i32_1 = arith.constant 0 : i32
    return %c0_i32, %c0_i32_0 : i32, i32
  }
  func.func @transform_4(%arg0: i32) -> (i32, i32) {
    %c0_i32 = arith.constant 0 : i32
    %c0_i32_0 = arith.constant 0 : i32
    %c0_i32_1 = arith.constant 0 : i32
    return %c0_i32, %c0_i32_0 : i32, i32
  }
  func.func @transform_5(%arg0: i32) -> (i32, i32, i32) {
    %c0_i32 = arith.constant 0 : i32
    %c0_i32_0 = arith.constant 0 : i32
    %c0_i32_1 = arith.constant 0 : i32
    return %arg0, %c0_i32, %c0_i32_0 : i32, i32, i32
  }
}

</mosaic_0001>

<bundles_post_ra>
// kernel: tpu_custom_call.1
= control target key start
LH: loop header
LB: loop body
LE: loop exit
PB: predicated region body
PF: predicated region fallthrough
CT: control target
= control target key end

     0   :  { %s4522_s20 = smov 0   ;;  %s6814_s0 = inlined_call_operand.vmem [shape: bf16[2,18,18,32], index: 0, kind: input, shape index: {}]   ;;  %s6815_s1 = inlined_call_operand.vmem [shape: bf16[288,16], index: 1, kind: input, shape index: {}]   ;;  %s6816_s2 = inlined_call_operand.vmem [shape: f32[1,16], index: 2, kind: input, shape index: {}]   ;;  %s6817_s3 = inlined_call_operand.vmem [shape: f32[1,16], index: 3, kind: input, shape index: {}]   ;;  %s6818_s4 = inlined_call_operand.<no memory space> [shape: f32[1,1], index: 4, kind: input, shape index: {}]   ;;  %s6819_s5 = inlined_call_operand.vmem [shape: f32[2,256,1], index: 5, kind: output, shape index: {}]  }
   0x1   :  { %v10_v0 = vstv %s6818_s4 }
   0x2   :  { %11 = vst [vmem:[#allocation2] sm:$0x1] %v10_v0 }
   0x3 LB: > { %s3807_s21 = sadd.s32 4294967295, %s4484_s20   ;;  %p3811_p0 = scmp.ge.s32.totalorder %s4484_s20, 1  ;;  %s4484_s20 = sphi %s4522_s20, %s17_s20  }
   0x4   : > { %p189_p1 = scmp.lt.s32.totalorder %s4484_s20, 3 }
   0x6   : > { %p190_p2 = pnand %p3811_p0, %p189_p1 }
   0x8   : > { %193 = sbr.rel (%p190_p2) target bundleno = 776 (0x308), region = 40 }
   0xf   : > { %p217_p3 = scmp.lt.s32.totalorder %s3807_s21, 1  ;;  %s4486_s25 = smov 64   ;;  %vm727_vm0 = vcmask 1042432   ;;  %vm728_vm1 = vcmask 1046532   ;;  %vm276_vm3 = vsmask.f32 3328 }
  0x10   : > { %vm4572_vm2 = vmor %vm727_vm0, %vm728_vm1  ;;  %s4487_s26 = smov 96   ;;  %vm277_vm4 = vsmask.f32 7440  ;;  %v4386_v40 = vld [vmem:[%s6815_s1 + $0x40] sm:$0xff]   ;;  %v4389_v63 = vld [vmem:[%s6815_s1 + $0x48] sm:$0xff]   ;;  %s4488_s8 = smov 32  }
  0x11   : > { %s7022_s21 = smov (!%p217_p3, %s3807_s21), 1  ;;  %v4387_v46 = vld [vmem:[%s6815_s1] sm:$0xff]   ;;  %4175 = vmatprep.subr.bf16.mxu0 %v4386_v40  ;;  %4341 = vmatprep.subr.bf16.mxu1 %v4386_v40  ;;  %vm4668_vm5 = vmor %vm276_vm3, %vm277_vm4  ;;  %vm2732_vm6 = vcmask 261120   ;;  %vm2781_vm7 = vcmask 523264   ;;  %vm2814_vm8 = vcmask 785408   ;;  %vm3583_vm9 = vcmask 130048  }
  0x12   : > { %s4357_s4 = smul.u32 216, %s7022_s21  ;;  %4176 = vmatpush3.bf16.msra.mxu0 %v4387_v46  ;;  %4349 = vmatpush3.bf16.msra.mxu1 %v4387_v46  ;;  %s4174_s19 = sshll.u32 %s7022_s21, 8  ;;  %vm3719_vm10 = vcmask 7168  }
  0x13   : > { %4177 = vmatprep.subr.bf16.mxu0 %v4389_v63  ;;  %4342 = vmatprep.subr.bf16.mxu1 %v4389_v63  ;;  %s6713_s23 = scalar_lea.vmem %s6819_s5, %s4174_s19 }
  0x14   : > { %s4536_s24 = scalar_lea.vmem %s6814_s0, %s4357_s4 }
  0x15   : > { %v3911_v1 = vld [vmem:[%s4536_s24 + $0x18] sm:$0xf]  ;;  %v4540_v2 = vld [vmem:[%s4536_s24 + $0x1c] sm:$0xf]  ;;  %v3935_v3 = vld [vmem:[%s4536_s24 + $0xa8] sm:$0xf] }
  0x16   : > { %6866 = vst [vmem:[#allocation3_spill] sm:$0xff] %v4540_v2  ;;  %v4087_v4 = vcombine.low %v3911_v1, %v4540_v2  ;;  %v4545_v5 = vld [vmem:[%s4536_s24 + $0xac] sm:$0xf]  ;;  %v1514_v6 = vshrl.u32 %v4540_v2, 16  ;;  %v6821_v7 = vrot.slane %v4540_v2, 5  ;;  %v1501_v8 = vshrl.u32 %v3911_v1, 16 }
  0x17   : > { %6867 = vst [vmem:[#allocation4_spill] sm:$0xff] %v4545_v5  ;;  %v1504_v9 = vshll.u32 %v3911_v1, 16  ;;  %v1510_v10 = vshll.u32 %v4540_v2, 16  ;;  %v4099_v11 = vcombine.low %v3935_v3, %v4545_v5  ;;  %v4553_v12 = vld [vmem:[%s4536_s24 + $0xc] sm:$0xf]  ;;  %v1802_v15 = vshrl.u32 %v4545_v5, 16 }
  0x18   : > { %2572 = vrot.lane.b32.xlu1 %v4087_v4, %s4486_s25  ;;  %v1503_v13 = vrot.slane %v1501_v8, 4  ;;  %v1789_v16 = vshrl.u32 %v3935_v3, 16  ;;  %v1798_v17 = vshll.u32 %v4545_v5, 16  ;;  %v1792_v18 = vshll.u32 %v3935_v3, 16  ;;  %v4559_v19 = vld [vmem:[%s4536_s24 + $0x10] sm:$0xf] }
  0x19   : > { %v1506_v14 = vrot.slane %v1504_v9, 5  ;;  %2596 = vrot.lane.b32.xlu0 %v4099_v11, %s4486_s25  ;;  %v3879_v20 = vld [vmem:[%s4536_s24 + $0xc] sm:$0xe]  ;;  %v4562_v21 = vrot.slane %v1514_v6, 4  ;;  %v4566_v22 = vrot.slane %v6821_v7, 4  ;;  %v6820_v23 = vrot.slane %v4545_v5, 5 }
  0x1a   : > { %v4039_v24 = vcombine.low %v4553_v12, %v4559_v19  ;;  %v4577_v26 = vld [vmem:[%s4536_s24 + $0x14] sm:$0x1]  ;;  %v4580_v28 = vld [vmem:[%s4536_s24 + $0x4] sm:$0xf]  ;;  %v4583_v29 = vld [vmem:[%s4536_s24 + $0x8] sm:$0x1] }
  0x1b   : > { %6868 = vst [vmem:[#allocation5_spill] sm:$0xff] %v4566_v22  ;;  %v1507_v27 = vor.u32 %v1506_v14, %v1503_v13  ;;  %v663_v30 = vld [vmem:[%s4536_s24] sm:$0xe]  ;;  %v4586_v31 = vrot.slane %v1802_v15, 4  ;;  %v4588_v32 = vrot.slane %v1789_v16, 4  ;;  %v3895_v33 = vrot.slane %v3879_v20, 9 }
  0x1c   : > { %2348 = vrot.lane.b32.xlu1 %v4039_v24, %s4487_s26  ;;  %v1341_v34 = vrot.slane %v4559_v19, 5  ;;  %v4593_v35 = vld [vmem:[%s4536_s24 + $0xa0] sm:$0xf]  ;;  %v4595_v36 = vrot.slane %v1792_v18, 5  ;;  %v1344_v37 = vrot.slane %v4577_v26, 5  ;;  %v3815_v38 = vrot.slane %v663_v30, 9 }
  0x1d   : > { %v4599_v39 = vld [vmem:[%s4536_s24 + $0xa4] sm:$0x1]  ;;  %v732_v43 = vrot.slane %v4580_v28, 5  ;;  %v735_v44 = vrot.slane %v4583_v29, 5  ;;  %v3891_v45 = vld [vmem:[%s4536_s24 + $0x9c] sm:$0xe] }
  0x1e   : > { %v1342_v41 = vsel %vm4572_vm2, %v3895_v33, %v1341_v34  ;;  %v1343_v42 = vrot.slane %v1341_v34, 4  ;;  %v4612_v47 = vrot.slane %v1507_v27, 4  ;;  %v4616_v48 = vrot.slane %v6820_v23, 4  ;;  %v4620_v51 = vld [vmem:[%s4536_s24 + $0x94] sm:$0xf]  ;;  %v4390_v14 = vld [vmem:[%s6815_s1 + $0x8] sm:$0xff]  }
  0x1f   : > { %v905_v49 = vshrl.u32 %v4559_v19, 16  ;;  %v3907_v50 = vrot.slane %v3891_v45, 9  ;;  %v733_v53 = vsel %vm4572_vm2, %v3815_v38, %v732_v43  ;;  %v734_v54 = vrot.slane %v732_v43, 4  ;;  %v4628_v56 = vld [vmem:[%s4536_s24 + $0x98] sm:$0x1]  ;;  %4178 = vmatpush3.bf16.msra.mxu0 %v4390_v14  ;;  %4350 = vmatpush3.bf16.msra.mxu1 %v4390_v14 }
  0x20   : > { %6871 = vst [vmem:[#allocation6_spill] sm:$0xff] %v4616_v48  ;;  %v1345_v52 = vsel %vm4572_vm2, %v1343_v42, %v1344_v37  ;;  %v1425_v55 = vrot.slane %v4593_v35, 5  ;;  %v675_v57 = vld [vmem:[%s4536_s24 + $0x90] sm:$0xe]  ;;  %v1795_v58 = vor.u32 %v4595_v36, %v4588_v32  ;;  %v1428_v60 = vrot.slane %v4599_v39, 5 }
  0x21   : > { %v4071_v59 = vcombine.low %v1342_v41, %v1345_v52  ;;  %v3827_v61 = vrot.slane %v675_v57, 9  ;;  %v228_v62 = vld [vmem:[%s4536_s24] sm:$0xf]  ;;  %v736_v0 = vsel %vm4572_vm2, %v734_v54, %v735_v44  ;;  %v816_v4 = vrot.slane %v4620_v51, 5  ;;  %v252_v13 = vld [vmem:[%s4536_s24 + $0x90] sm:$0xf] }
  0x22   : > { %v1426_v1 = vsel %vm4572_vm2, %v3907_v50, %v1425_v55  ;;  %v1427_v3 = vrot.slane %v1425_v55, 4  ;;  %v4023_v6 = vcombine.low %v733_v53, %v736_v0  ;;  %v819_v8 = vrot.slane %v4628_v56, 5  ;;  %v4391_v41 = vld [vmem:[%s6815_s1 + $0x50] sm:$0xff]   ;;  %v5219_v5 = vld [vmem:[%s4536_s24 + $0x48] sm:$0xf] }
  0x23   : > { %2476 = vrot.lane.b32.xlu0 %v4071_v59, %s4488_s8  ;;  %v280_v9 = vshrl.u32 %v228_v62, 16  ;;  %v283_v11 = vshll.u32 %v228_v62, 16  ;;  %v817_v16 = vsel %vm4572_vm2, %v3827_v61, %v816_v4  ;;  %v818_v18 = vrot.slane %v816_v4, 4  ;;  %4179 = vmatprep.subr.bf16.mxu0 %v4391_v41 }
  0x24   : > { %v1429_v15 = vsel %vm4572_vm2, %v1427_v3, %v1428_v60  ;;  %v289_v20 = vshll.u32 %v4580_v28, 16  ;;  %2252 = vrot.lane.b32.xlu1 %v4023_v6, %s4486_s25  ;;  %v293_v33 = vshrl.u32 %v4580_v28, 16  ;;  %v299_v38 = vshll.u32 %v4583_v29, 16  ;;  %v4664_v28 = vld [vmem:[%s4536_s24 + $0x20] sm:$0x1]  ;;  %4343 = vmatprep.subr.bf16.mxu1 %v4391_v41  ;;  %v4392_v60 = vld [vmem:[%s6815_s1 + $0x10] sm:$0xff]  }
  0x25   : > { %v4083_v24 = vcombine.low %v1426_v1, %v1429_v15  ;;  %v282_v27 = vrot.slane %v280_v9, 4  ;;  %v285_v30 = vrot.slane %v283_v11, 5  ;;  %v820_v34 = vsel %vm4572_vm2, %v818_v18, %v819_v8  ;;  %6872 = vst [vmem:[#allocation7_spill] sm:$0xff] %v4664_v28  ;;  %4180 = vmatpush3.bf16.msra.mxu0 %v4392_v60  ;;  %4351 = vmatpush3.bf16.msra.mxu1 %v4392_v60  ;;  %v3880_v60 = vld [vmem:[%s4536_s24 + $0x18] sm:$0xe] }
  0x26   : > { %v291_v37 = vrot.slane %v289_v20, 5  ;;  %v568_v40 = vshrl.u32 %v252_v13, 16  ;;  %v4035_v42 = vcombine.low %v817_v16, %v820_v34  ;;  %v295_v44 = vrot.slane %v293_v33, 4  ;;  %v4696_v16 = vld [vmem:[%s4536_s24 + $0xb0] sm:$0x1] }
  0x27   : > { %2500 = vrot.lane.b32.xlu0 %v4083_v24, %s4488_s8  ;;  %v286_v43 = vor.u32 %v285_v30, %v282_v27  ;;  %v571_v45 = vshll.u32 %v252_v13, 16  ;;  %v301_v29 = vrot.slane %v299_v38, 5  ;;  %v577_v52 = vshll.u32 %v4620_v51, 16  ;;  %6875 = vst [vmem:[#allocation8_spill] sm:$0xff] %v4696_v16  ;;  %v4709_v24 = vld [vmem:[%s4536_s24 + $0x9c] sm:$0xf] }
  0x28   : > { %v570_v50 = vrot.slane %v568_v40, 4  ;;  %v581_v53 = vshrl.u32 %v4620_v51, 16  ;;  %2276 = vrot.lane.b32.xlu1 %v4035_v42, %s4486_s25  ;;  %v296_v55 = vor.u32 %v295_v44, %v291_v37  ;;  %v587_v59 = vshll.u32 %v4628_v56, 16  ;;  %v230_v30 = vld [vmem:[%s4536_s24 + $0xc] sm:$0xf] }
  0x29   : > { %v287_v54 = vrot.slane %v286_v43, 4  ;;  %v573_v57 = vrot.slane %v571_v45, 5  ;;  %v579_v61 = vrot.slane %v577_v52, 5  ;;  %v1512_v63 = vrot.slane %v1510_v10, 5  ;;  %v4394_v10 = vld [vmem:[%s6815_s1 + $0x58] sm:$0xff]  }
  0x2a   : > { %v583_v62 = vrot.slane %v581_v53, 4  ;;  %v1520_v51 = vshll.u32 %v4664_v28, 16  ;;  %v892_v0 = vshrl.u32 %v4553_v12, 16  ;;  %v297_v3 = vrot.slane %v296_v55, 4  ;;  %4181 = vmatprep.subr.bf16.mxu0 %v4394_v10  ;;  %4344 = vmatprep.subr.bf16.mxu1 %v4394_v10  ;;  %v231_v38 = vld [vmem:[%s4536_s24 + $0x10] sm:$0xf] }
  0x2b   : > { %v292_v1 = vsel %vm4668_vm5, %v287_v54, %v291_v37  ;;  %v574_v4 = vor.u32 %v573_v57, %v570_v50  ;;  %v589_v6 = vrot.slane %v587_v59, 5  ;;  %v1517_v8 = vor.u32 %v4562_v21, %v1512_v63  ;;  %v4395_v21 = vld [vmem:[%s6815_s1 + $0x18] sm:$0xff]   ;;  %v4726_v43 = vld [vmem:[%s4536_s24 + $0x14] sm:$0x1]  ;;  %v4736_v53 = vld [vmem:[%s4536_s24 + $0x20] sm:$0x1] }
  0x2c   : > { %v584_v56 = vor.u32 %v583_v62, %v579_v61  ;;  %v1522_v9 = vrot.slane %v1520_v51, 5  ;;  %v1796_v11 = vrot.slane %v1795_v58, 4  ;;  %v895_v13 = vshll.u32 %v4553_v12, 16  ;;  %4182 = vmatpush3.bf16.msra.mxu0 %v4395_v21  ;;  %4352 = vmatpush3.bf16.msra.mxu1 %v4395_v21  ;;  %v4729_v44 = vld [vmem:[%s4536_s24 + $0x1c] sm:$0xf]  ;;  %v4397_v54 = vld [vmem:[%s6815_s1 + $0x60] sm:$0xff]  }
  0x2d   : > { %v302_v14 = vsel %vm4668_vm5, %v297_v3, %v301_v29  ;;  %v575_v15 = vrot.slane %v574_v4, 4  ;;  %v1513_v32 = vsel %vm4668_vm5, %v4612_v47, %v1512_v63  ;;  %v1518_v36 = vrot.slane %v1517_v8, 4  ;;  %v664_v51 = vld [vmem:[%s4536_s24 + $0xc] sm:$0xe]  ;;  %4183 = vmatprep.subr.bf16.mxu0 %v4397_v54  ;;  %4345 = vmatprep.subr.bf16.mxu1 %v4397_v54 }
  0x2e   : > { %v4007_v18 = vcombine.low %v292_v1, %v302_v14  ;;  %v585_v20 = vrot.slane %v584_v56, 4  ;;  %v4704_v12 = vrot.slane %v892_v0, 4  ;;  %v1800_v27 = vrot.slane %v1798_v17, 5  ;;  %v4398_v56 = vld [vmem:[%s6815_s1 + $0x20] sm:$0xff]  }
  0x2f   : > { %v580_v58 = vsel %vm4668_vm5, %v575_v15, %v579_v61  ;;  %v1523_v33 = vsel %vm4668_vm5, %v1518_v36, %v1522_v9  ;;  %v1180_v34 = vshrl.u32 %v4709_v24, 16  ;;  %v1808_v37 = vshll.u32 %v4696_v16, 16  ;;  %v668_v16 = vld [vmem:[%s4536_s24 + $0x3c] sm:$0xe] }
  0x30   : > { %2172 = vrot.lane.b32.xlu0 %v4007_v18, %s4488_s8  ;;  %v590_v47 = vsel %vm4668_vm5, %v585_v20, %v589_v6  ;;  %v4722_v40 = vrot.slane %v895_v13, 5  ;;  %v4103_v41 = vcombine.low %v1513_v32, %v1523_v33  ;;  %v1805_v42 = vor.u32 %v4586_v31, %v1800_v27  ;;  %v4759_v18 = vld [vmem:[%s4536_s24 + $0x28] sm:$0xf]  ;;  %4184 = vmatpush3.bf16.msra.mxu0 %v4398_v56 }
  0x31   : > { %v4019_v17 = vcombine.low %v580_v58, %v590_v47  ;;  %v4051_v45 = vcombine.low %v4709_v24, %v4593_v35  ;;  %v1801_v29 = vsel %vm4668_vm5, %v1796_v11, %v1800_v27  ;;  %v1810_v50 = vrot.slane %v1808_v37, 5  ;;  %v3913_v11 = vld [vmem:[%s4536_s24 + $0x24] sm:$0xf]  ;;  %4353 = vmatpush3.bf16.msra.mxu1 %v4398_v56 }
  0x32   : > { %v304_v52 = vshrl.u32 %v230_v30, 16  ;;  %v1806_v31 = vrot.slane %v1805_v42, 4  ;;  %v307_v55 = vshll.u32 %v230_v30, 16  ;;  %v313_v57 = vshll.u32 %v231_v38, 16 }
  0x33   : > { %2196 = vrot.lane.b32.xlu1 %v4019_v17, %s4488_s8  ;;  %v317_v59 = vshrl.u32 %v231_v38, 16  ;;  %v4744_v35 = vrot.slane %v1180_v34, 4  ;;  %v1183_v61 = vshll.u32 %v4709_v24, 16  ;;  %v323_v63 = vshll.u32 %v4726_v43, 16  ;;  %v4399_v24 = vld [vmem:[%s6815_s1 + $0x68] sm:$0xff]  }
  0x34   : > { %2652 = vrot.lane.b32.xlu0 %v4103_v41, %s4487_s26  ;;  %v306_v62 = vrot.slane %v304_v52, 4  ;;  %v1811_v0 = vsel %vm4668_vm5, %v1806_v31, %v1810_v50  ;;  %v309_v1 = vrot.slane %v307_v55, 5  ;;  %v315_v3 = vrot.slane %v313_v57, 5  ;;  %4185 = vmatprep.subr.bf16.mxu0 %v4399_v24  ;;  %v5089_v55 = vld [vmem:[%s4536_s24 + $0x40] sm:$0xf] }
  0x35   : > { %v319_v4 = vrot.slane %v317_v59, 4  ;;  %v4115_v6 = vcombine.low %v1801_v29, %v1811_v0  ;;  %v325_v8 = vrot.slane %v323_v63, 5  ;;  %v3896_v9 = vrot.slane %v3880_v60, 9  ;;  %4346 = vmatprep.subr.bf16.mxu1 %v4399_v24  ;;  %v4400_v29 = vld [vmem:[%s6815_s1 + $0x28] sm:$0xff]   ;;  %6885 = vst [vmem:[#allocation18_spill] sm:$0xff] %v5089_v55 }
  0x36   : > { %v1348_v10 = vrot.slane %v4729_v44, 5  ;;  %v310_v13 = vor.u32 %v309_v1, %v306_v62  ;;  %v1351_v15 = vrot.slane %v4736_v53, 5  ;;  %v3816_v21 = vrot.slane %v664_v51, 9  ;;  %4186 = vmatpush3.bf16.msra.mxu0 %v4400_v29  ;;  %v4798_v1 = vld [vmem:[%s4536_s24 + $0xa0] sm:$0xf]  ;;  %4354 = vmatpush3.bf16.msra.mxu1 %v4400_v29 }
  0x37   : > { %2372 = vrot.lane.b32.xlu1 %v4051_v45, %s4487_s26  ;;  %v320_v14 = vor.u32 %v319_v4, %v315_v3  ;;  %v739_v36 = vrot.slane %v231_v38, 5  ;;  %v742_v58 = vrot.slane %v4726_v43, 5  ;;  %v1525_v47 = vshrl.u32 %v3913_v11, 16 }
  0x38   : > { %2676 = vrot.lane.b32.xlu0 %v4115_v6, %s4487_s26  ;;  %v1349_v20 = vsel %vm4572_vm2, %v3896_v9, %v1348_v10  ;;  %v1350_v32 = vrot.slane %v1348_v10, 4  ;;  %v311_v27 = vrot.slane %v310_v13, 4  ;;  %v1528_v33 = vshll.u32 %v3913_v11, 16  ;;  %v4806_v6 = vld [vmem:[%s4536_s24 + $0x18] sm:$0xf]  ;;  %v4402_v9 = vld [vmem:[%s6815_s1 + $0x70] sm:$0xff]  }
  0x39   : > { %v321_v30 = vrot.slane %v320_v14, 4  ;;  %v740_v37 = vsel %vm4572_vm2, %v3816_v21, %v739_v36  ;;  %v741_v17 = vrot.slane %v739_v36, 4  ;;  %v1538_v38 = vshrl.u32 %v4759_v18, 16  ;;  %4187 = vmatprep.subr.bf16.mxu0 %v4402_v9  ;;  %4347 = vmatprep.subr.bf16.mxu1 %v4402_v9 }
  0x3a   : > { %v1352_v34 = vsel %vm4572_vm2, %v1350_v32, %v1351_v15  ;;  %v316_v41 = vsel %vm4668_vm5, %v311_v27, %v315_v3  ;;  %v1527_v45 = vrot.slane %v1525_v47, 4  ;;  %v4780_v50 = vrot.slane %v1183_v61, 5  ;;  %v3944_v61 = vld [vmem:[%s4536_s24 + $0x2c] sm:$0x1]  ;;  %v4814_v15 = vld [vmem:[%s4536_s24 + $0xa4] sm:$0x1] }
  0x3b   : > { %v326_v42 = vsel %vm4668_vm5, %v321_v30, %v325_v8  ;;  %v4072_v43 = vcombine.low %v1349_v20, %v1352_v34  ;;  %v743_v54 = vsel %vm4572_vm2, %v741_v17, %v742_v58  ;;  %v1530_v31 = vrot.slane %v1528_v33, 5  ;;  %v4819_v58 = vld [vmem:[%s4536_s24 + $0xac] sm:$0xf]  ;;  %v3892_v33 = vld [vmem:[%s4536_s24 + $0xa8] sm:$0xe]  ;;  %v4403_v34 = vld [vmem:[%s6815_s1 + $0x30] sm:$0xff]  }
  0x3c   : > { %v4008_v52 = vcombine.low %v316_v41, %v326_v42  ;;  %v4787_v57 = vrot.slane %v905_v49, 4  ;;  %v1957_v59 = vrot.slane %v4759_v18, 5  ;;  %v4088_v60 = vcombine.low %v3913_v11, %v4759_v18  ;;  %v254_v49 = vld [vmem:[%s4536_s24 + $0x9c] sm:$0xf]  ;;  %v4836_v42 = vld [vmem:[%s4536_s24 + $0xb0] sm:$0x1]  ;;  %4188 = vmatpush3.bf16.msra.mxu0 %v4403_v34  ;;  %4355 = vmatpush3.bf16.msra.mxu1 %v4403_v34 }
  0x3d   : > { %2478 = vrot.lane.b32.xlu0 %v4072_v43, %s4488_s8  ;;  %v4024_v63 = vcombine.low %v740_v37, %v743_v54  ;;  %v1531_v51 = vor.u32 %v1530_v31, %v1527_v45  ;;  %v1534_v0 = vshll.u32 %v4759_v18, 16  ;;  %v898_v3 = vor.u32 %v4722_v40, %v4704_v12 }
  0x3e   : > { %2174 = vrot.lane.b32.xlu1 %v4008_v52, %s4488_s8  ;;  %v1959_v56 = vrot.slane %v1957_v59, 4  ;;  %v1540_v8 = vrot.slane %v1538_v38, 4  ;;  %v1186_v10 = vor.u32 %v4780_v50, %v4744_v35  ;;  %v1544_v14 = vshll.u32 %v3944_v61, 16  ;;  %v4910_v50 = vld [vmem:[%s4536_s24 + $0x28] sm:$0xf] }
  0x3f   : > { %v1532_v11 = vrot.slane %v1531_v51, 4  ;;  %v1536_v13 = vrot.slane %v1534_v0, 5  ;;  %v1960_v21 = vrot.slane %v3944_v61, 5  ;;  %v592_v20 = vshrl.u32 %v254_v49, 16  ;;  %v676_v61 = vld [vmem:[%s4536_s24 + $0x9c] sm:$0xe] }
  0x40   : > { %v595_v32 = vshll.u32 %v254_v49, 16  ;;  %v601_v36 = vshll.u32 %v4798_v1, 16  ;;  %v916_v24 = vshrl.u32 %v4806_v6, 16  ;;  %v4040_v27 = vcombine.low %v4806_v6, %v4729_v44 }
  0x41   : > { %2574 = vrot.lane.b32.xlu0 %v4088_v60, %s4486_s25  ;;  %v1541_v30 = vor.u32 %v1540_v8, %v1536_v13  ;;  %v1546_v47 = vrot.slane %v1544_v14, 5  ;;  %v1537_v37 = vsel %vm4668_vm5, %v1532_v11, %v1536_v13  ;;  %v4833_v17 = vsel %vm4572_vm2, %v1959_v56, %v1960_v21  ;;  %v4408_v8 = vld [vmem:[%s6815_s1 + $0x38] sm:$0xff]  }
  0x42   : > { %2254 = vrot.lane.b32.xlu1 %v4024_v63, %s4486_s25  ;;  %6876 = vst [vmem:[#allocation9_spill] sm:$0xff] %v4833_v17  ;;  %v594_v38 = vrot.slane %v592_v20, 4  ;;  %v597_v41 = vrot.slane %v595_v32, 5  ;;  %v603_v43 = vrot.slane %v601_v36, 5  ;;  %v605_v45 = vshrl.u32 %v4798_v1, 16  ;;  %v4406_v63 = vld [vmem:[%s6815_s1 + $0x78] sm:$0xff]  }
  0x43   : > { %v1542_v44 = vrot.slane %v1541_v30, 4  ;;  %v611_v29 = vshll.u32 %v4814_v15, 16  ;;  %v919_v52 = vshll.u32 %v4806_v6, 16  ;;  %v3908_v31 = vrot.slane %v3892_v33, 9  ;;  %v3937_v6 = vld [vmem:[%s4536_s24 + $0xb4] sm:$0xf]  ;;  %4189 = vmatprep.subr.bf16.mxu0 %v4406_v63  ;;  %4348 = vmatprep.subr.bf16.mxu1 %v4406_v63 }
  0x44   : > { %v598_v54 = vor.u32 %v597_v41, %v594_v38  ;;  %v1432_v60 = vrot.slane %v4819_v58, 5  ;;  %v607_v0 = vrot.slane %v605_v45, 4  ;;  %v1435_v56 = vrot.slane %v4836_v42, 5  ;;  %4190 = vmatpush3.bf16.msra.mxu0 %v4408_v8  ;;  %4356 = vmatpush3.bf16.msra.mxu1 %v4408_v8 }
  0x45   : > { %v1547_v51 = vsel %vm4668_vm5, %v1542_v44, %v1546_v47  ;;  %v613_v49 = vrot.slane %v611_v29, 5  ;;  %v3828_v20 = vrot.slane %v676_v61, 9  ;;  %v823_v32 = vrot.slane %v4798_v1, 5 }
  0x46   : > { %2350 = vrot.lane.b32.xlu1 %v4040_v27, %s4487_s26  ;;  %v4104_v9 = vcombine.low %v1537_v37, %v1547_v51  ;;  %v599_v11 = vrot.slane %v598_v54, 4  ;;  %v1433_v13 = vsel %vm4572_vm2, %v3908_v31, %v1432_v60  ;;  %v1434_v14 = vrot.slane %v1432_v60, 4  ;;  %v4859_v27 = vld [vmem:[%s4536_s24 + $0xb8] sm:$0xf]  ;;  %v4883_v31 = vld [vmem:[%s4536_s24 + $0xbc] sm:$0x1] }
  0x47   : > { %v608_v21 = vor.u32 %v607_v0, %v603_v43  ;;  %v826_v36 = vrot.slane %v4814_v15, 5  ;;  %6877 = vst [vmem:[#allocation10_spill] sm:$0xff] %v4859_v27  ;;  %v4861_v30 = vrot.slane %v916_v24, 4  ;;  %v1813_v33 = vshrl.u32 %v3937_v6, 16  ;;  %6878 = vst [vmem:[#allocation11_spill] sm:$0xff] %v4883_v31 }
  0x48   : > { %2654 = vrot.lane.b32.xlu0 %v4104_v9, %s4487_s26  ;;  %v1436_v47 = vsel %vm4572_vm2, %v1434_v14, %v1435_v56  ;;  %v1816_v34 = vshll.u32 %v3937_v6, 16  ;;  %v604_v1 = vsel %vm4668_vm5, %v599_v11, %v603_v43  ;;  %v825_v38 = vrot.slane %v823_v32, 4  ;;  %v232_v60 = vld [vmem:[%s4536_s24 + $0x18] sm:$0xf]  ;;  %v4899_v0 = vld [vmem:[%s4536_s24 + $0xa8] sm:$0xf] }
  0x49   : > { %v609_v37 = vrot.slane %v608_v21, 4  ;;  %v4084_v15 = vcombine.low %v1433_v13, %v1436_v47  ;;  %v4868_v41 = vrot.slane %v919_v52, 5  ;;  %v1815_v24 = vrot.slane %v1813_v33, 4  ;;  %v4907_v13 = vld [vmem:[%s4536_s24 + $0x20] sm:$0x1] }
  0x4a   : > { %v1818_v44 = vrot.slane %v1816_v34, 5  ;;  %v1826_v45 = vshrl.u32 %v4859_v27, 16  ;;  %v4874_v29 = vrot.slane %v898_v3, 4  ;;  %v824_v43 = vsel %vm4572_vm2, %v3828_v20, %v823_v32  ;;  %v4891_v3 = vld [vmem:[%s4536_s24 + $0x1c] sm:$0xf] }
  0x4b   : > { %v614_v54 = vsel %vm4668_vm5, %v609_v37, %v613_v49  ;;  %v827_v52 = vsel %vm4572_vm2, %v825_v38, %v826_v36  ;;  %v4100_v40 = vcombine.low %v3937_v6, %v4859_v27  ;;  %v4896_v51 = vrot.slane %v1186_v10, 4  ;;  %v4914_v32 = vld [vmem:[%s4536_s24 + $0x2c] sm:$0x1] }
  0x4c   : > { %v4020_v12 = vcombine.low %v604_v1, %v614_v54  ;;  %2502 = vrot.lane.b32.xlu0 %v4084_v15, %s4488_s8  ;;  %v1819_v49 = vor.u32 %v1818_v44, %v1815_v24  ;;  %v1822_v56 = vshll.u32 %v4859_v27, 16  ;;  %v1828_v8 = vrot.slane %v1826_v45, 4  ;;  %v3881_v1 = vld [vmem:[%s4536_s24 + $0x24] sm:$0xe]  ;;  %v665_v44 = vld [vmem:[%s4536_s24 + $0x18] sm:$0xe] }
  0x4d   : > { %v922_v9 = vor.u32 %v4868_v41, %v4861_v30  ;;  %v4036_v6 = vcombine.low %v824_v43, %v827_v52  ;;  %v1832_v11 = vshll.u32 %v4883_v31, 16  ;;  %v328_v35 = vshrl.u32 %v232_v60, 16  ;;  %v3941_v31 = vld [vmem:[%s4536_s24 + $0xcc] sm:$0xf] }
  0x4e   : > { %2198 = vrot.lane.b32.xlu1 %v4020_v12, %s4488_s8  ;;  %v1820_v10 = vrot.slane %v1819_v49, 4  ;;  %v1824_v14 = vrot.slane %v1822_v56, 5  ;;  %v331_v21 = vshll.u32 %v232_v60, 16  ;;  %v337_v20 = vshll.u32 %v4891_v3, 16 }
  0x4f   : > { %v1204_v36 = vshrl.u32 %v4899_v0, 16  ;;  %v1207_v47 = vshll.u32 %v4899_v0, 16  ;;  %v330_v33 = vrot.slane %v328_v35, 4  ;;  %v341_v34 = vshrl.u32 %v4891_v3, 16  ;;  %v3915_v35 = vld [vmem:[%s4536_s24 + $0x30] sm:$0xf] }
  0x50   : > { %2598 = vrot.lane.b32.xlu0 %v4100_v40, %s4486_s25  ;;  %v1829_v37 = vor.u32 %v1828_v8, %v1824_v14  ;;  %v1834_v15 = vrot.slane %v1832_v11, 5  ;;  %v333_v38 = vrot.slane %v331_v21, 5  ;;  %v339_v24 = vrot.slane %v337_v20, 5 }
  0x51   : > { %v4052_v45 = vcombine.low %v4899_v0, %v4819_v58  ;;  %v1825_v54 = vsel %vm4668_vm5, %v1820_v10, %v1824_v14  ;;  %v343_v43 = vrot.slane %v341_v34, 4  ;;  %v347_v52 = vshll.u32 %v4907_v13, 16 }
  0x52   : > { %2278 = vrot.lane.b32.xlu1 %v4036_v6, %s4486_s25  ;;  %v1830_v60 = vrot.slane %v1829_v37, 4  ;;  %v334_v12 = vor.u32 %v333_v38, %v330_v33  ;;  %v3897_v40 = vrot.slane %v3881_v1, 9  ;;  %v1355_v49 = vrot.slane %v4910_v50, 5  ;;  %v4939_v37 = vld [vmem:[%s4536_s24 + $0x34] sm:$0xf] }
  0x53   : > { %v344_v56 = vor.u32 %v343_v43, %v339_v24  ;;  %v349_v8 = vrot.slane %v347_v52, 5  ;;  %v1358_v6 = vrot.slane %v4914_v32, 5  ;;  %v3817_v11 = vrot.slane %v665_v44, 9  ;;  %6879 = vst [vmem:[#allocation12_spill] sm:$0xff] %v4939_v37  ;;  %v4942_v38 = vld [vmem:[%s4536_s24 + $0x24] sm:$0xe] }
  0x54   : > { %v1835_v58 = vsel %vm4668_vm5, %v1830_v60, %v1834_v15  ;;  %v335_v10 = vrot.slane %v334_v12, 4  ;;  %v1356_v14 = vsel %vm4572_vm2, %v3897_v40, %v1355_v49  ;;  %v1357_v21 = vrot.slane %v1355_v49, 4  ;;  %v4955_v49 = vld [vmem:[%s4536_s24 + $0x38] sm:$0x1] }
  0x55   : > { %v4116_v20 = vcombine.low %v1825_v54, %v1835_v58  ;;  %v345_v33 = vrot.slane %v344_v56, 4  ;;  %v746_v34 = vrot.slane %v4891_v3, 5  ;;  %v749_v1 = vrot.slane %v4907_v13, 5  ;;  %6880 = vst [vmem:[#allocation13_spill] sm:$0xff] %v4955_v49  ;;  %v256_v58 = vld [vmem:[%s4536_s24 + $0xa8] sm:$0xf] }
  0x56   : > { %2374 = vrot.lane.b32.xlu1 %v4052_v45, %s4487_s26  ;;  %v340_v15 = vsel %vm4668_vm5, %v335_v10, %v339_v24  ;;  %v1359_v44 = vsel %vm4572_vm2, %v1357_v21, %v1358_v6  ;;  %v1549_v43 = vshrl.u32 %v3915_v35, 16  ;;  %v1552_v45 = vshll.u32 %v3915_v35, 16  ;;  %v5005_v56 = vld [vmem:[%s4536_s24 + $0xc0] sm:$0xf] }
  0x57   : > { %2678 = vrot.lane.b32.xlu0 %v4116_v20, %s4487_s26  ;;  %v350_v3 = vsel %vm4668_vm5, %v345_v33, %v349_v8  ;;  %v4073_v13 = vcombine.low %v1356_v14, %v1359_v44  ;;  %v747_v54 = vsel %vm4572_vm2, %v3817_v11, %v746_v34  ;;  %v748_v52 = vrot.slane %v746_v34, 4  ;;  %v4971_v20 = vld [vmem:[%s4536_s24 + $0x24] sm:$0xf]  ;;  %v257_v34 = vld [vmem:[%s4536_s24 + $0xac] sm:$0xf] }
  0x58   : > { %v4009_v60 = vcombine.low %v340_v15, %v350_v3  ;;  %v1551_v24 = vrot.slane %v1549_v43, 4  ;;  %v1554_v12 = vrot.slane %v1552_v45, 5  ;;  %v1562_v40 = vshrl.u32 %v4939_v37, 16  ;;  %v274_v15 = vld [vmem:[%s4536_s24 + $0xb0] sm:$0x1] }
  0x59   : > { %v3976_v6 = vrot.slane %v4942_v38, 9  ;;  %v4962_v8 = vrot.slane %v922_v9, 4  ;;  %v750_v11 = vsel %vm4572_vm2, %v748_v52, %v749_v1  ;;  %v4089_v30 = vcombine.low %v3915_v35, %v4939_v37 }
  0x5a   : > { %2176 = vrot.lane.b32.xlu1 %v4009_v60, %s4488_s8  ;;  %v4025_v21 = vcombine.low %v747_v54, %v750_v11  ;;  %v1555_v33 = vor.u32 %v1554_v12, %v1551_v24  ;;  %v1558_v41 = vshll.u32 %v4939_v37, 16  ;;  %v1564_v9 = vrot.slane %v1562_v40, 4  ;;  %v4992_v24 = vld [vmem:[%s4536_s24 + $0xbc] sm:$0x1]  ;;  %v3893_v12 = vld [vmem:[%s4536_s24 + $0xb4] sm:$0xe] }
  0x5b   : > { %2480 = vrot.lane.b32.xlu0 %v4073_v13, %s4488_s8  ;;  %v1568_v1 = vshll.u32 %v4955_v49, 16  ;;  %v4981_v44 = vrot.slane %v1204_v36, 4  ;;  %v4985_v43 = vrot.slane %v1207_v47, 5  ;;  %v616_v3 = vshrl.u32 %v256_v58, 16  ;;  %v4988_v13 = vld [vmem:[%s4536_s24 + $0xb8] sm:$0xf] }
  0x5c   : > { %v1556_v45 = vrot.slane %v1555_v33, 4  ;;  %v940_v35 = vshrl.u32 %v4971_v20, 16  ;;  %v1560_v54 = vrot.slane %v1558_v41, 5  ;;  %v619_v52 = vshll.u32 %v256_v58, 16  ;;  %v677_v11 = vld [vmem:[%s4536_s24 + $0xa8] sm:$0xe] }
  0x5d   : > { %v625_v60 = vshll.u32 %v257_v34, 16  ;;  %v4041_v0 = vcombine.low %v4971_v20, %v4910_v50  ;;  %v618_v36 = vrot.slane %v616_v3, 4  ;;  %v629_v47 = vshrl.u32 %v257_v34, 16  ;;  %v5307_v37 = vld [vmem:[%s4536_s24 + $0x58] sm:$0xf] }
  0x5e   : > { %2256 = vrot.lane.b32.xlu1 %v4025_v21, %s4486_s25  ;;  %v635_v40 = vshll.u32 %v274_v15, 16  ;;  %v1565_v33 = vor.u32 %v1564_v9, %v1560_v54  ;;  %v1570_v14 = vrot.slane %v1568_v1, 5  ;;  %v621_v41 = vrot.slane %v619_v52, 5  ;;  %6898 = vst [vmem:[#allocation28_spill] sm:$0xff] %v5307_v37 }
  0x5f   : > { %2576 = vrot.lane.b32.xlu0 %v4089_v30, %s4486_s25  ;;  %v627_v58 = vrot.slane %v625_v60, 5  ;;  %v943_v23 = vshll.u32 %v4971_v20, 16  ;;  %v1561_v21 = vsel %vm4668_vm5, %v1556_v45, %v1560_v54  ;;  %v631_v63 = vrot.slane %v629_v47, 4  ;;  %v5010_v20 = vld [vmem:[%s4536_s24 + $0xc4] sm:$0xf] }
  0x60   : > { %v637_v7 = vrot.slane %v635_v40, 5  ;;  %v1566_v50 = vrot.slane %v1565_v33, 4  ;;  %v622_v3 = vor.u32 %v621_v41, %v618_v36  ;;  %v3909_v61 = vrot.slane %v3893_v12, 9  ;;  %6881 = vst [vmem:[#allocation14_spill] sm:$0xff] %v5010_v20 }
  0x61   : > { %v1439_v10 = vrot.slane %v4988_v13, 5  ;;  %v632_v30 = vor.u32 %v631_v63, %v627_v58  ;;  %v1442_v9 = vrot.slane %v4992_v24, 5  ;;  %v3829_v1 = vrot.slane %v677_v11, 9 }
  0x62   : > { %2352 = vrot.lane.b32.xlu1 %v4041_v0, %s4487_s26  ;;  %v830_v52 = vrot.slane %v257_v34, 5  ;;  %v1571_v45 = vsel %vm4668_vm5, %v1566_v50, %v1570_v14  ;;  %v623_v54 = vrot.slane %v622_v3, 4  ;;  %v833_v40 = vrot.slane %v274_v15, 5 }
  0x63   : > { %v1440_v60 = vsel %vm4572_vm2, %v3909_v61, %v1439_v10  ;;  %v1441_v12 = vrot.slane %v1439_v10, 4  ;;  %v4105_v36 = vcombine.low %v1561_v21, %v1571_v45  ;;  %v633_v47 = vrot.slane %v632_v30, 4  ;;  %v5029_v21 = vld [vmem:[%s4536_s24 + $0xc8] sm:$0x1]  ;;  %v3859_v30 = vld [vmem:[%s4536_s24 + $0xb4] sm:$0xf] }
  0x64   : > { %v831_v63 = vsel %vm4572_vm2, %v3829_v1, %v830_v52  ;;  %v832_v0 = vrot.slane %v830_v52, 4  ;;  %v628_v34 = vsel %vm4668_vm5, %v623_v54, %v627_v58  ;;  %v1837_v11 = vshrl.u32 %v5005_v56, 16  ;;  %6882 = vst [vmem:[#allocation15_spill] sm:$0xff] %v5029_v21  ;;  %v5037_v1 = vld [vmem:[%s4536_s24 + $0x28] sm:$0xf] }
  0x65   : > { %v1443_v14 = vsel %vm4572_vm2, %v1441_v12, %v1442_v9  ;;  %2656 = vrot.lane.b32.xlu0 %v4105_v36, %s4487_s26  ;;  %v638_v61 = vsel %vm4668_vm5, %v633_v47, %v637_v7  ;;  %v1840_v33 = vshll.u32 %v5005_v56, 16  ;;  %v1850_v41 = vshrl.u32 %v5010_v20, 16  ;;  %v234_v9 = vld [vmem:[%s4536_s24 + $0x24] sm:$0xf] }
  0x66   : > { %v4085_v10 = vcombine.low %v1440_v60, %v1443_v14  ;;  %v4021_v50 = vcombine.low %v628_v34, %v638_v61  ;;  %v834_v15 = vsel %vm4572_vm2, %v832_v0, %v833_v40  ;;  %v1839_v3 = vrot.slane %v1837_v11, 4  ;;  %v5063_v14 = vld [vmem:[%s4536_s24 + $0x34] sm:$0xf]  ;;  %v3882_v40 = vld [vmem:[%s4536_s24 + $0x30] sm:$0xe] }
  0x67   : > { %v5045_v7 = vsel %vm4572_vm2, %v3976_v6, %v1957_v59  ;;  %v1210_v52 = vor.u32 %v4985_v43, %v4981_v44  ;;  %v5049_v45 = vrot.slane %v940_v35, 4  ;;  %v1842_v54 = vrot.slane %v1840_v33, 5  ;;  %v5070_v33 = vld [vmem:[%s4536_s24 + $0x38] sm:$0x1]  ;;  %v258_v43 = vld [vmem:[%s4536_s24 + $0xb4] sm:$0xf] }
  0x68   : > { %6883 = vst [vmem:[#allocation16_spill] sm:$0xff] %v5045_v7  ;;  %v5051_v60 = vrot.slane %v943_v23, 5  ;;  %2200 = vrot.lane.b32.xlu1 %v4021_v50, %s4488_s8  ;;  %v4037_v12 = vcombine.low %v831_v63, %v834_v15  ;;  %v1846_v18 = vshll.u32 %v5010_v20, 16  ;;  %v1852_v38 = vrot.slane %v1850_v41, 4  ;;  %v5060_v23 = vld [vmem:[%s4536_s24 + $0x2c] sm:$0x1] }
  0x69   : > { %2504 = vrot.lane.b32.xlu0 %v4085_v10, %s4488_s8  ;;  %v4101_v59 = vcombine.low %v5005_v56, %v5010_v20  ;;  %v1228_v6 = vshrl.u32 %v3859_v30, 16  ;;  %v1843_v35 = vor.u32 %v1842_v54, %v1839_v3  ;;  %v1856_v36 = vshll.u32 %v5029_v21, 16  ;;  %6884 = vst [vmem:[#allocation17_spill] sm:$0xff] %v5070_v33  ;;  %v666_v41 = vld [vmem:[%s4536_s24 + $0x24] sm:$0xe] }
  0x6a   : > { %v1231_v47 = vshll.u32 %v3859_v30, 16  ;;  %v1848_v0 = vrot.slane %v1846_v18, 5  ;;  %v352_v34 = vshrl.u32 %v234_v9, 16  ;;  %v355_v63 = vshll.u32 %v234_v9, 16 }
  0x6b   : > { %v4053_v11 = vcombine.low %v3859_v30, %v4988_v13  ;;  %v1844_v61 = vrot.slane %v1843_v35, 4  ;;  %v361_v10 = vshll.u32 %v5037_v1, 16  ;;  %v365_v56 = vshrl.u32 %v5037_v1, 16 }
  0x6c   : > { %2280 = vrot.lane.b32.xlu1 %v4037_v12, %s4486_s25  ;;  %v1853_v50 = vor.u32 %v1852_v38, %v1848_v0  ;;  %v1858_v15 = vrot.slane %v1856_v36, 5  ;;  %v354_v3 = vrot.slane %v352_v34, 4  ;;  %v357_v9 = vrot.slane %v355_v63, 5  ;;  %v3917_v38 = vld [vmem:[%s4536_s24 + $0x3c] sm:$0xf] }
  0x6d   : > { %2600 = vrot.lane.b32.xlu0 %v4101_v59, %s4486_s25  ;;  %v5075_v54 = vrot.slane %v1228_v6, 4  ;;  %v363_v13 = vrot.slane %v361_v10, 5  ;;  %v367_v30 = vrot.slane %v365_v56, 4  ;;  %v371_v18 = vshll.u32 %v5060_v23, 16 }
  0x6e   : > { %v5078_v35 = vrot.slane %v1231_v47, 5  ;;  %v1849_v58 = vsel %vm4668_vm5, %v1844_v61, %v1848_v0  ;;  %v1854_v4 = vrot.slane %v1853_v50, 4  ;;  %v358_v12 = vor.u32 %v357_v9, %v354_v3 }
  0x6f   : > { %v368_v36 = vor.u32 %v367_v30, %v363_v13  ;;  %v373_v34 = vrot.slane %v371_v18, 5  ;;  %v3898_v63 = vrot.slane %v3882_v40, 9  ;;  %v1362_v59 = vrot.slane %v5063_v14, 5 }
  0x70   : > { %2376 = vrot.lane.b32.xlu1 %v4053_v11, %s4487_s26  ;;  %v1859_v6 = vsel %vm4668_vm5, %v1854_v4, %v1858_v15  ;;  %v359_v10 = vrot.slane %v358_v12, 4  ;;  %v1365_v47 = vrot.slane %v5070_v33, 5  ;;  %v3818_v56 = vrot.slane %v666_v41, 9  ;;  %v3837_v12 = vld [vmem:[%s4536_s24 + $0x30] sm:$0xf] }
  0x71   : > { %v4117_v0 = vcombine.low %v1849_v58, %v1859_v6  ;;  %v369_v61 = vrot.slane %v368_v36, 4  ;;  %v1363_v50 = vsel %vm4572_vm2, %v3898_v63, %v1362_v59  ;;  %v1364_v40 = vrot.slane %v1362_v59, 4  ;;  %v5113_v6 = vld [vmem:[%s4536_s24 + $0x44] sm:$0x1] }
  0x72   : > { %v364_v3 = vsel %vm4668_vm5, %v359_v10, %v363_v13  ;;  %v753_v11 = vrot.slane %v5037_v1, 5  ;;  %v756_v4 = vrot.slane %v5060_v23, 5  ;;  %v1573_v15 = vshrl.u32 %v3917_v38, 16  ;;  %6886 = vst [vmem:[#allocation19_spill] sm:$0xff] %v5113_v6 }
  0x73   : > { %2680 = vrot.lane.b32.xlu0 %v4117_v0, %s4487_s26  ;;  %v374_v58 = vsel %vm4668_vm5, %v369_v61, %v373_v34  ;;  %v1366_v41 = vsel %vm4572_vm2, %v1364_v40, %v1365_v47  ;;  %v1576_v9 = vshll.u32 %v3917_v38, 16  ;;  %v1586_v30 = vshrl.u32 %v5089_v55, 16  ;;  %v259_v40 = vld [vmem:[%s4536_s24 + $0xb8] sm:$0xf]  ;;  %v678_v34 = vld [vmem:[%s4536_s24 + $0xb4] sm:$0xe] }
  0x74   : > { %v4010_v18 = vcombine.low %v364_v3, %v374_v58  ;;  %v4074_v13 = vcombine.low %v1363_v50, %v1366_v41  ;;  %v754_v1 = vsel %vm4572_vm2, %v3818_v56, %v753_v11  ;;  %v755_v23 = vrot.slane %v753_v11, 4 }
  0x75   : > { %v5109_v36 = vrot.slane %v1210_v52, 4  ;;  %v1575_v63 = vrot.slane %v1573_v15, 4  ;;  %v1578_v59 = vrot.slane %v1576_v9, 5  ;;  %v4090_v56 = vcombine.low %v3917_v38, %v5089_v55  ;;  %v275_v15 = vld [vmem:[%s4536_s24 + $0xbc] sm:$0x1] }
  0x76   : > { %2178 = vrot.lane.b32.xlu1 %v4010_v18, %s4488_s8  ;;  %v757_v47 = vsel %vm4572_vm2, %v755_v23, %v756_v4  ;;  %v964_v44 = vshrl.u32 %v3837_v12, 16  ;;  %v1582_v61 = vshll.u32 %v5089_v55, 16  ;;  %v1588_v50 = vrot.slane %v1586_v30, 4  ;;  %v3894_v23 = vld [vmem:[%s4536_s24 + $0xc0] sm:$0xe] }
  0x77   : > { %2482 = vrot.lane.b32.xlu0 %v4074_v13, %s4488_s8  ;;  %v4026_v52 = vcombine.low %v754_v1, %v757_v47  ;;  %v1579_v0 = vor.u32 %v1578_v59, %v1575_v63  ;;  %v946_v3 = vor.u32 %v5051_v60, %v5049_v45  ;;  %v967_v4 = vshll.u32 %v3837_v12, 16  ;;  %v5131_v13 = vld [vmem:[%s4536_s24 + $0xc4] sm:$0xf]  ;;  %v5299_v55 = vld [vmem:[%s4536_s24 + $0x54] sm:$0xf] }
  0x78   : > { %v1592_v38 = vshll.u32 %v5113_v6, 16  ;;  %v1584_v41 = vrot.slane %v1582_v61, 5  ;;  %v640_v9 = vshrl.u32 %v258_v43, 16  ;;  %v643_v18 = vshll.u32 %v258_v43, 16  ;;  %v5140_v61 = vld [vmem:[%s4536_s24 + $0xc8] sm:$0x1] }
  0x79   : > { %v1580_v58 = vrot.slane %v1579_v0, 4  ;;  %v5134_v30 = vrot.slane %v964_v44, 4  ;;  %v4042_v45 = vcombine.low %v3837_v12, %v5063_v14  ;;  %v649_v60 = vshll.u32 %v259_v40, 16  ;;  %6887 = vst [vmem:[#allocation20_spill] sm:$0xff] %v5140_v61 }
  0x7a   : > { %2258 = vrot.lane.b32.xlu1 %v4026_v52, %s4486_s25  ;;  %v653_v1 = vshrl.u32 %v259_v40, 16  ;;  %v1589_v63 = vor.u32 %v1588_v50, %v1584_v41  ;;  %v1594_v59 = vrot.slane %v1592_v38, 5  ;;  %v642_v47 = vrot.slane %v640_v9, 4 }
  0x7b   : > { %2578 = vrot.lane.b32.xlu0 %v4090_v56, %s4486_s25  ;;  %v645_v0 = vrot.slane %v643_v18, 5  ;;  %v5142_v43 = vrot.slane %v967_v4, 5  ;;  %v651_v10 = vrot.slane %v649_v60, 5  ;;  %v659_v44 = vshll.u32 %v275_v15, 16 }
  0x7c   : > { %v655_v52 = vrot.slane %v653_v1, 4  ;;  %v1585_v14 = vsel %vm4668_vm5, %v1580_v58, %v1584_v41  ;;  %v1590_v12 = vrot.slane %v1589_v63, 4  ;;  %v3910_v56 = vrot.slane %v3894_v23, 9  ;;  %v5156_v63 = vld [vmem:[%s4536_s24 + $0xd0] sm:$0xf] }
  0x7d   : > { %v646_v62 = vor.u32 %v645_v0, %v642_v47  ;;  %v661_v38 = vrot.slane %v659_v44, 5  ;;  %v1446_v9 = vrot.slane %v5131_v13, 5  ;;  %v1449_v4 = vrot.slane %v5140_v61, 5  ;;  %6888 = vst [vmem:[#allocation21_spill] sm:$0xff] %v5156_v63 }
  0x7e   : > { %2354 = vrot.lane.b32.xlu1 %v4042_v45, %s4487_s26  ;;  %v656_v50 = vor.u32 %v655_v52, %v651_v10  ;;  %v1595_v18 = vsel %vm4668_vm5, %v1590_v12, %v1594_v59  ;;  %v3830_v1 = vrot.slane %v678_v34, 9  ;;  %v837_v11 = vrot.slane %v259_v40, 5 }
  0x7f   : > { %v647_v60 = vrot.slane %v646_v62, 4  ;;  %v4106_v58 = vcombine.low %v1585_v14, %v1595_v18  ;;  %v1447_v23 = vsel %vm4572_vm2, %v3910_v56, %v1446_v9  ;;  %v1448_v45 = vrot.slane %v1446_v9, 4  ;;  %v5171_v56 = vld [vmem:[%s4536_s24 + $0xd4] sm:$0x1] }
  0x80   : > { %v657_v41 = vrot.slane %v656_v50, 4  ;;  %v838_v0 = vsel %vm4572_vm2, %v3830_v1, %v837_v11  ;;  %v839_v59 = vrot.slane %v837_v11, 4  ;;  %v840_v62 = vrot.slane %v275_v15, 5  ;;  %6889 = vst [vmem:[#allocation22_spill] sm:$0xff] %v5171_v56 }
  0x81   : > { %v652_v47 = vsel %vm4668_vm5, %v647_v60, %v651_v10  ;;  %2658 = vrot.lane.b32.xlu0 %v4106_v58, %s4487_s26  ;;  %v1450_v40 = vsel %vm4572_vm2, %v1448_v45, %v1449_v4  ;;  %v1861_v52 = vshrl.u32 %v3941_v31, 16  ;;  %v1864_v44 = vshll.u32 %v3941_v31, 16  ;;  %v236_v4 = vld [vmem:[%s4536_s24 + $0x30] sm:$0xf] }
  0x82   : > { %v662_v34 = vsel %vm4668_vm5, %v657_v41, %v661_v38  ;;  %v4086_v12 = vcombine.low %v1447_v23, %v1450_v40  ;;  %v841_v10 = vsel %vm4572_vm2, %v839_v59, %v840_v62  ;;  %v1874_v11 = vshrl.u32 %v5156_v63, 16  ;;  %v5182_v41 = vld [vmem:[%s4536_s24 + $0xc0] sm:$0xf]  ;;  %v237_v59 = vld [vmem:[%s4536_s24 + $0x34] sm:$0xf] }
  0x83   : > { %v4022_v14 = vcombine.low %v652_v47, %v662_v34  ;;  %v5173_v15 = vrot.slane %v946_v3, 4  ;;  %v1863_v38 = vrot.slane %v1861_v52, 4  ;;  %v1866_v9 = vrot.slane %v1864_v44, 5  ;;  %v264_v40 = vld [vmem:[%s4536_s24 + $0x38] sm:$0x1] }
  0x84   : > { %v4038_v1 = vcombine.low %v838_v0, %v841_v10  ;;  %v4102_v58 = vcombine.low %v3941_v31, %v5156_v63  ;;  %v1870_v23 = vshll.u32 %v5156_v63, 16  ;;  %v1876_v45 = vrot.slane %v1874_v11, 4  ;;  %v5199_v11 = vld [vmem:[%s4536_s24 + $0x40] sm:$0xf]  ;;  %v3883_v31 = vld [vmem:[%s4536_s24 + $0x3c] sm:$0xe] }
  0x85   : > { %2202 = vrot.lane.b32.xlu1 %v4022_v14, %s4488_s8  ;;  %2506 = vrot.lane.b32.xlu0 %v4086_v12, %s4488_s8  ;;  %v1867_v3 = vor.u32 %v1866_v9, %v1863_v38  ;;  %v1880_v47 = vshll.u32 %v5171_v56, 16  ;;  %v6890_v62 = vor.u32 %v5078_v35, %v5075_v54  ;;  %v376_v52 = vshrl.u32 %v236_v4, 16  ;;  %v5202_v38 = vld [vmem:[%s4536_s24 + $0x44] sm:$0x1] }
  0x86   : > { %v1872_v12 = vrot.slane %v1870_v23, 5  ;;  %v379_v10 = vshll.u32 %v236_v4, 16  ;;  %6891 = vst [vmem:[#allocation23_spill] sm:$0xff] %v5202_v38  ;;  %v4054_v54 = vcombine.low %v5182_v41, %v5131_v13  ;;  %v385_v9 = vshll.u32 %v237_v59, 16  ;;  %v667_v4 = vld [vmem:[%s4536_s24 + $0x30] sm:$0xe] }
  0x87   : > { %v5191_v34 = vrot.slane %v6890_v62, 4  ;;  %v1868_v14 = vrot.slane %v1867_v3, 4  ;;  %v378_v35 = vrot.slane %v376_v52, 4  ;;  %v389_v62 = vshrl.u32 %v237_v59, 16 }
  0x88   : > { %v1877_v60 = vor.u32 %v1876_v45, %v1872_v12  ;;  %v1882_v3 = vrot.slane %v1880_v47, 5  ;;  %v381_v50 = vrot.slane %v379_v10, 5  ;;  %v395_v23 = vshll.u32 %v264_v40, 16 }
  0x89   : > { %2282 = vrot.lane.b32.xlu1 %v4038_v1, %s4486_s25  ;;  %2602 = vrot.lane.b32.xlu0 %v4102_v58, %s4486_s25  ;;  %v1255_v44 = vshll.u32 %v5182_v41, 16  ;;  %v1873_v1 = vsel %vm4668_vm5, %v1868_v14, %v1872_v12  ;;  %v387_v13 = vrot.slane %v385_v9, 5  ;;  %v391_v52 = vrot.slane %v389_v62, 4 }
  0x8a   : > { %v5210_v18 = vpop.permute.xlu1 %2572  ;;  %v1878_v0 = vrot.slane %v1877_v60, 4  ;;  %v382_v21 = vor.u32 %v381_v50, %v378_v35  ;;  %v397_v20 = vrot.slane %v395_v23, 5  ;;  %v3899_v58 = vrot.slane %v3883_v31, 9  ;;  %v5226_v35 = vld [vmem:[%s4536_s24 + $0x4c] sm:$0xf] }
  0x8b   : > { %v392_v45 = vor.u32 %v391_v52, %v387_v13  ;;  %v1369_v47 = vrot.slane %v5199_v11, 5  ;;  %v1372_v10 = vrot.slane %v5202_v38, 5  ;;  %v3819_v27 = vrot.slane %v667_v4, 9  ;;  %v5221_v48 = vpop.permute.xlu0 %2596  ;;  %6892 = vst [vmem:[#allocation24_spill] sm:$0xff] %v5226_v35 }
  0x8c   : > { %v1883_v14 = vsel %vm4668_vm5, %v1878_v0, %v1882_v3  ;;  %v383_v12 = vrot.slane %v382_v21, 4  ;;  %v760_v60 = vrot.slane %v237_v59, 5  ;;  %v763_v50 = vrot.slane %v264_v40, 5 }
  0x8d   : > { %2378 = vrot.lane.b32.xlu1 %v4054_v54, %s4487_s26  ;;  %v4118_v31 = vcombine.low %v1873_v1, %v1883_v14  ;;  %v393_v54 = vrot.slane %v392_v45, 4  ;;  %v1370_v9 = vsel %vm4572_vm2, %v3899_v58, %v1369_v47  ;;  %v1371_v62 = vrot.slane %v1369_v47, 4  ;;  %v5247_v47 = vld [vmem:[%s4536_s24 + $0x3c] sm:$0xf]  ;;  %v5250_v14 = vld [vmem:[%s4536_s24 + $0x50] sm:$0x1] }
  0x8e   : > { %v388_v23 = vsel %vm4668_vm5, %v383_v12, %v387_v13  ;;  %v761_v4 = vsel %vm4572_vm2, %v3819_v27, %v760_v60  ;;  %v762_v0 = vrot.slane %v760_v60, 4  ;;  %v1597_v21 = vshrl.u32 %v5219_v5, 16  ;;  %v5235_v59 = vpop.permute.xlu1 %2348  ;;  %6893 = vst [vmem:[#allocation25_spill] sm:$0xff] %v5250_v14 }
  0x8f   : > { %2682 = vrot.lane.b32.xlu0 %v4118_v31, %s4487_s26  ;;  %v398_v40 = vsel %vm4668_vm5, %v393_v54, %v397_v20  ;;  %v1373_v3 = vsel %vm4572_vm2, %v1371_v62, %v1372_v10  ;;  %v1600_v1 = vshll.u32 %v5219_v5, 16  ;;  %v1610_v13 = vshrl.u32 %v5226_v35, 16  ;;  %v238_v31 = vld [vmem:[%s4536_s24 + $0x3c] sm:$0xf]  ;;  %v5289_v62 = vld [vmem:[%s4536_s24 + $0x50] sm:$0x1] }
  0x90   : > { %v4011_v52 = vcombine.low %v388_v23, %v398_v40  ;;  %v4075_v27 = vcombine.low %v1370_v9, %v1373_v3  ;;  %v764_v58 = vsel %vm4572_vm2, %v762_v0, %v763_v50  ;;  %v1599_v45 = vrot.slane %v1597_v21, 4  ;;  %v5267_v21 = vld [vmem:[%s4536_s24 + $0x40] sm:$0xf]  ;;  %6897 = vst [vmem:[#allocation27_spill] sm:$0xff] %v5289_v62 }
  0x91   : > { %v1602_v60 = vrot.slane %v1600_v1, 5  ;;  %v6894_v9 = vor.u32 %v5142_v43, %v5134_v30  ;;  %v4027_v23 = vcombine.low %v761_v4, %v764_v58  ;;  %v1606_v0 = vshll.u32 %v5226_v35, 16  ;;  %v5274_v1 = vld [vmem:[%s4536_s24 + $0x44] sm:$0x1] }
  0x92   : > { %2180 = vrot.lane.b32.xlu1 %v4011_v52, %s4488_s8  ;;  %v4091_v40 = vcombine.low %v5219_v5, %v5226_v35  ;;  %v1612_v43 = vrot.slane %v1610_v13, 4  ;;  %v1616_v3 = vshll.u32 %v5250_v14, 16  ;;  %v6896_v52 = vshrl.u32 %v5182_v41, 16  ;;  %v3884_v41 = vld [vmem:[%s4536_s24 + $0x48] sm:$0xe] }
  0x93   : > { %v5261_v50 = vrot.slane %v6894_v9, 4  ;;  %2484 = vrot.lane.b32.xlu0 %v4075_v27, %s4488_s8  ;;  %v1603_v30 = vor.u32 %v1602_v60, %v1599_v45  ;;  %v1257_v58 = vrot.slane %v1255_v44, 5  ;;  %v1608_v9 = vrot.slane %v1606_v0, 5  ;;  %v5281_v27 = vld [vmem:[%s4536_s24 + $0x4c] sm:$0xf] }
  0x94   : > { %v5278_v4 = vrot.slane %v6896_v52, 4  ;;  %v400_v10 = vshrl.u32 %v238_v31, 16  ;;  %v4043_v5 = vcombine.low %v5247_v47, %v5199_v11  ;;  %v403_v45 = vshll.u32 %v238_v31, 16 }
  0x95   : > { %v5256_v54 = vpop.permute.xlu0 %2476  ;;  %6895 = vst [vmem:[#allocation26_spill] sm:$0xff] %v5261_v50  ;;  %v1604_v13 = vrot.slane %v1603_v30, 4  ;;  %v409_v60 = vshll.u32 %v5267_v21, 16  ;;  %v1613_v44 = vor.u32 %v1612_v43, %v1608_v9  ;;  %v1618_v0 = vrot.slane %v1616_v3, 5 }
  0x96   : > { %v5283_v12 = vpop.permute.xlu1 %2252  ;;  %2260 = vrot.lane.b32.xlu1 %v4027_v23, %s4486_s25  ;;  %v402_v52 = vrot.slane %v400_v10, 4  ;;  %v413_v20 = vshrl.u32 %v5267_v21, 16  ;;  %v405_v11 = vrot.slane %v403_v45, 5  ;;  %v419_v30 = vshll.u32 %v5274_v1, 16 }
  0x97   : > { %2580 = vrot.lane.b32.xlu0 %v4091_v40, %s4486_s25  ;;  %v411_v31 = vrot.slane %v409_v60, 5  ;;  %v1258_v23 = vor.u32 %v1257_v58, %v5278_v4  ;;  %v1609_v10 = vsel %vm4668_vm5, %v1604_v13, %v1608_v9  ;;  %v1614_v43 = vrot.slane %v1613_v44, 4 }
  0x98   : > { %v415_v3 = vrot.slane %v413_v20, 4  ;;  %v406_v6 = vor.u32 %v405_v11, %v402_v52  ;;  %v421_v63 = vrot.slane %v419_v30, 5  ;;  %v3900_v40 = vrot.slane %v3884_v41, 9 }
  0x99   : > { %v5301_v49 = vpop.permute.xlu0 %2500  ;;  %v1376_v45 = vrot.slane %v5281_v27, 5  ;;  %v1619_v60 = vsel %vm4668_vm5, %v1614_v43, %v1618_v0  ;;  %v1379_v4 = vrot.slane %v5289_v62, 5  ;;  %v3820_v58 = vrot.slane %v668_v16, 9 }
  0x9a   : > { %2356 = vrot.lane.b32.xlu1 %v4043_v5, %s4487_s26  ;;  %v416_v2 = vor.u32 %v415_v3, %v411_v31  ;;  %v5314_v7 = vpop.permute.xlu1 %2276  ;;  %v4107_v9 = vcombine.low %v1609_v10, %v1619_v60  ;;  %v407_v20 = vrot.slane %v406_v6, 4  ;;  %v767_v52 = vrot.slane %v5267_v21, 5  ;;  %v5336_v60 = vld [vmem:[%s4536_s24 + $0x5c] sm:$0x1] }
  0x9b   : > { %v1377_v13 = vsel %vm4572_vm2, %v3900_v40, %v1376_v45  ;;  %v1378_v44 = vrot.slane %v1376_v45, 4  ;;  %v770_v5 = vrot.slane %v5274_v1, 5  ;;  %v1621_v0 = vshrl.u32 %v5299_v55, 16 }
  0x9c   : > { %v417_v41 = vrot.slane %v416_v2, 4  ;;  %2660 = vrot.lane.b32.xlu0 %v4107_v9, %s4487_s26  ;;  %v412_v16 = vsel %vm4668_vm5, %v407_v20, %v411_v31  ;;  %v1624_v11 = vshll.u32 %v5299_v55, 16  ;;  %v1634_v30 = vshrl.u32 %v5307_v37, 16 }
  0x9d   : > { %v1380_v6 = vsel %vm4572_vm2, %v1378_v44, %v1379_v4  ;;  %v768_v10 = vsel %vm4572_vm2, %v3820_v58, %v767_v52  ;;  %v769_v43 = vrot.slane %v767_v52, 4  ;;  %v988_v31 = vshrl.u32 %v5247_v47, 16  ;;  %v5351_v44 = vld [vmem:[%s4536_s24 + $0x48] sm:$0xf] }
  0x9e   : > { %v422_v21 = vsel %vm4668_vm5, %v417_v41, %v421_v63  ;;  %v4076_v1 = vcombine.low %v1377_v13, %v1380_v6  ;;  %v1623_v40 = vrot.slane %v1621_v0, 4  ;;  %v1626_v45 = vrot.slane %v1624_v11, 5  ;;  %v240_v11 = vld [vmem:[%s4536_s24 + $0x48] sm:$0xf] }
  0x9f   : > { %v4012_v3 = vcombine.low %v412_v16, %v422_v21  ;;  %v5338_v4 = vrot.slane %v1258_v23, 4  ;;  %v991_v63 = vshll.u32 %v5247_v47, 16  ;;  %v771_v20 = vsel %vm4572_vm2, %v769_v43, %v770_v5  ;;  %v5364_v43 = vld [vmem:[%s4536_s24 + $0x4c] sm:$0xf]  ;;  %v5393_v5 = vld [vmem:[%s4536_s24 + $0x58] sm:$0xf] }
  0xa0   : > { %2486 = vrot.lane.b32.xlu0 %v4076_v1, %s4488_s8  ;;  %v4028_v13 = vcombine.low %v768_v10, %v771_v20  ;;  %v4092_v23 = vcombine.low %v5299_v55, %v5307_v37  ;;  %v1627_v41 = vor.u32 %v1626_v45, %v1623_v40  ;;  %v1630_v52 = vshll.u32 %v5307_v37, 16 }
  0xa1   : > { %6899 = vst [vmem:[#allocation29_spill] sm:$0xff] %v5338_v4  ;;  %2182 = vrot.lane.b32.xlu1 %v4012_v3, %s4488_s8  ;;  %v1636_v16 = vrot.slane %v1634_v30, 4  ;;  %v1640_v6 = vshll.u32 %v5336_v60, 16  ;;  %v5360_v21 = vrot.slane %v988_v31, 4  ;;  %v5366_v3 = vrot.slane %v991_v63, 5 }
  0xa2   : > { %v5328_v2 = vpop.permute.xlu0 %2172  ;;  %v1628_v1 = vrot.slane %v1627_v41, 4  ;;  %v1632_v10 = vrot.slane %v1630_v52, 5  ;;  %v4044_v40 = vcombine.low %v5351_v44, %v5281_v27  ;;  %v6900_v45 = vshll.u32 %v4577_v26, 16  ;;  %v5377_v52 = vld [vmem:[%s4536_s24 + $0x50] sm:$0x1] }
  0xa3   : > { %v6901_v20 = vshll.u32 %v4559_v19, 16  ;;  %v1642_v41 = vrot.slane %v1640_v6, 5  ;;  %v424_v63 = vshrl.u32 %v240_v11, 16  ;;  %v427_v55 = vshll.u32 %v240_v11, 16 }
  0xa4   : > { %v913_v30 = vrot.slane %v6900_v45, 5  ;;  %2582 = vrot.lane.b32.xlu0 %v4092_v23, %s4486_s25  ;;  %v1637_v31 = vor.u32 %v1636_v16, %v1632_v10  ;;  %v1633_v19 = vsel %vm4668_vm5, %v1628_v1, %v1632_v10  ;;  %v433_v23 = vshll.u32 %v5364_v43, 16  ;;  %v3885_v16 = vld [vmem:[%s4536_s24 + $0x54] sm:$0xe] }
  0xa5   : > { %v5344_v58 = vpop.permute.xlu1 %2196  ;;  %v903_v9 = vrot.slane %v6901_v20, 5  ;;  %2262 = vrot.lane.b32.xlu1 %v4028_v13, %s4486_s25  ;;  %v426_v45 = vrot.slane %v424_v63, 4  ;;  %v429_v11 = vrot.slane %v427_v55, 5  ;;  %v437_v20 = vshrl.u32 %v5364_v43, 16 }
  0xa6   : > { %v5354_v47 = vpop.permute.xlu0 %2652  ;;  %v1638_v6 = vrot.slane %v1637_v31, 4  ;;  %v435_v10 = vrot.slane %v433_v23, 5  ;;  %v443_v14 = vshll.u32 %v5377_v52, 16  ;;  %v3901_v63 = vrot.slane %v3885_v16, 9  ;;  %v669_v16 = vld [vmem:[%s4536_s24 + $0x48] sm:$0xe] }
  0xa7   : > { %v904_v27 = vsel %vm4668_vm5, %v4874_v29, %v903_v9  ;;  %v908_v13 = vor.u32 %v4787_v57, %v903_v9  ;;  %v5399_v29 = vld [vmem:[%s4536_s24 + $0x5c] sm:$0x1]  ;;  %v5404_v57 = vld [vmem:[%s6815_s1 + $0x80] sm:$0xff]   ;;  %v430_v55 = vor.u32 %v429_v11, %v426_v45  ;;  %v439_v31 = vrot.slane %v437_v20, 4 }
  0xa8   : > { %6902 = vst [vmem:[#allocation30_spill] sm:$0xff] %v5399_v29  ;;  %v1643_v9 = vsel %vm4668_vm5, %v1638_v6, %v1642_v41  ;;  %v445_v56 = vrot.slane %v443_v14, 5  ;;  %v1383_v35 = vrot.slane %v5393_v5, 5  ;;  %4305 = vmatprep.subr.bf16.mxu1 %v5404_v57  ;;  %v1386_v6 = vrot.slane %v5399_v29, 5 }
  0xa9   : > { %v5379_v0 = vpop.permute.xlu1 %2372  ;;  %v909_v1 = vrot.slane %v908_v13, 4  ;;  %2358 = vrot.lane.b32.xlu1 %v4044_v40, %s4487_s26  ;;  %v4108_v13 = vcombine.low %v1633_v19, %v1643_v9  ;;  %v431_v40 = vrot.slane %v430_v55, 4  ;;  %v440_v41 = vor.u32 %v439_v31, %v435_v10  ;;  %v4435_v19 = vld [vmem:[%s4536_s24 + $0xa0] sm:$0xf] }
  0xaa   : > { %v5381_v26 = vpop.permute.xlu0 %2676  ;;  %v1384_v14 = vsel %vm4572_vm2, %v3901_v63, %v1383_v35  ;;  %v1189_v11 = vshll.u32 %v4435_v19, 16  ;;  %v1193_v20 = vshrl.u32 %v4435_v19, 16  ;;  %v3923_v31 = vld [vmem:[%s4536_s24 + $0x60] sm:$0xf]  ;;  %v3821_v63 = vrot.slane %v669_v16, 9 }
  0xab   : > { %v914_v23 = vsel %vm4668_vm5, %v909_v1, %v913_v30  ;;  %2662 = vrot.lane.b32.xlu0 %v4108_v13, %s4487_s26  ;;  %v1385_v30 = vrot.slane %v1383_v35, 4  ;;  %v1015_v1 = vshll.u32 %v5351_v44, 16  ;;  %v436_v9 = vsel %vm4668_vm5, %v431_v40, %v435_v10 }
  0xac   : > { %v5415_v22 = vcombine.low %v904_v27, %v914_v23  ;;  %v1012_v27 = vshrl.u32 %v5351_v44, 16  ;;  %v441_v55 = vrot.slane %v440_v41, 4  ;;  %v1191_v23 = vrot.slane %v1189_v11, 5  ;;  %v5437_v44 = vld [vmem:[%s4536_s24 + $0x64] sm:$0xf] }
  0xad   : > { %v1387_v13 = vsel %vm4572_vm2, %v1385_v30, %v1386_v6  ;;  %v1195_v28 = vrot.slane %v1193_v20, 4  ;;  %v774_v19 = vrot.slane %v5364_v43, 5  ;;  %v777_v4 = vrot.slane %v5377_v52, 5  ;;  %6903 = vst [vmem:[#allocation31_spill] sm:$0xff] %v5437_v44 }
  0xae   : > { %v446_v35 = vsel %vm4668_vm5, %v441_v55, %v445_v56  ;;  %v4077_v38 = vcombine.low %v1384_v14, %v1387_v13  ;;  %v6904_v40 = vshll.u32 %v4599_v39, 16  ;;  %v1645_v6 = vshrl.u32 %v3923_v31, 16 }
  0xaf   : > { %v5412_v17 = vpop.permute.xlu0 %2478  ;;  %v4013_v61 = vcombine.low %v436_v9, %v446_v35  ;;  %v1196_v10 = vor.u32 %v1195_v28, %v1191_v23  ;;  %v1192_v56 = vsel %vm4668_vm5, %v4896_v51, %v1191_v23  ;;  %v775_v43 = vsel %vm4572_vm2, %v3821_v63, %v774_v19  ;;  %v5464_v23 = vld [vmem:[%s4536_s24 + $0x68] sm:$0x1]  ;;  %v4437_v35 = vld [vmem:[%s4536_s24] sm:$0xf] }
  0xb0   : > { %v5419_v45 = vpop.permute.xlu1 %2174  ;;  %v1201_v41 = vrot.slane %v6904_v40, 5  ;;  %2488 = vrot.lane.b32.xlu0 %v4077_v38, %s4488_s8  ;;  %v776_v52 = vrot.slane %v774_v19, 4  ;;  %v1648_v28 = vshll.u32 %v3923_v31, 16  ;;  %v1647_v14 = vrot.slane %v1645_v6, 4  ;;  %v5455_v38 = vld [vmem:[%s4536_s24 + $0x54] sm:$0xf] }
  0xb1   : > { %2184 = vrot.lane.b32.xlu1 %v4013_v61, %s4488_s8  ;;  %v1197_v39 = vrot.slane %v1196_v10, 4  ;;  %v1658_v11 = vshrl.u32 %v5437_v44, 16  ;;  %v4093_v20 = vcombine.low %v3923_v31, %v5437_v44  ;;  %v5457_v9 = vrot.slane %v1012_v27, 4  ;;  %6905 = vst [vmem:[#allocation32_spill] sm:$0xff] %v5464_v23  ;;  %v4436_v31 = vld [vmem:[%s4536_s24 + $0x4] sm:$0xf] }
  0xb2   : > { %v5459_v51 = vrot.slane %v1015_v1, 5  ;;  %v778_v55 = vsel %vm4572_vm2, %v776_v52, %v777_v4  ;;  %v1650_v13 = vrot.slane %v1648_v28, 5  ;;  %v3991_v19 = vcombine.low %v4437_v35, %v4436_v31  ;;  %v242_v6 = vld [vmem:[%s4536_s24 + $0x54] sm:$0xf]  ;;  %v5503_v31 = vld [vmem:[%s4536_s24 + $0x64] sm:$0xf] }
  0xb3   : > { %v5443_v16 = vpop.permute.xlu0 %2574  ;;  %v1202_v61 = vsel %vm4668_vm5, %v1197_v39, %v1201_v41  ;;  %v4029_v63 = vcombine.low %v775_v43, %v778_v55  ;;  %v6906_v27 = vor.u32 %v5366_v3, %v5360_v21  ;;  %v4045_v41 = vcombine.low %v5455_v38, %v5393_v5  ;;  %v5484_v3 = vld [vmem:[%s4536_s24 + $0x58] sm:$0xf]  ;;  %v3886_v39 = vld [vmem:[%s4536_s24 + $0x60] sm:$0xe] }
  0xb4   : > { %v5441_v30 = vpop.permute.xlu1 %2254  ;;  %v4067_v4 = vcombine.low %v1192_v56, %v1202_v61  ;;  %2584 = vrot.lane.b32.xlu0 %v4093_v20, %s4486_s25  ;;  %v1651_v40 = vor.u32 %v1650_v13, %v1647_v14  ;;  %v1654_v43 = vshll.u32 %v5437_v44, 16  ;;  %v1660_v52 = vrot.slane %v1658_v11, 4  ;;  %v5498_v20 = vld [vmem:[%s4536_s24 + $0x5c] sm:$0x1]  ;;  %v5516_v11 = vld [vmem:[%s4536_s24 + $0x68] sm:$0x1] }
  0xb5   : > { %v5473_v1 = vrot.slane %v6906_v27, 4  ;;  %2264 = vrot.lane.b32.xlu1 %v4029_v63, %s4486_s25  ;;  %v1664_v21 = vshll.u32 %v5464_v23, 16  ;;  %v2865_v5 = vsel %vm2732_vm6, %v5415_v22, %v5256_v54  ;;  %v2735_v55 = vsel %vm2732_vm6, %v3991_v19, %v5328_v2  ;;  %v4438_v19 = vld [vmem:[%s4536_s24 + $0x94] sm:$0xf]  ;;  %6908 = vst [vmem:[#allocation34_spill] sm:$0xff] %v5516_v11 }
  0xb6   : > { %v1652_v13 = vrot.slane %v1651_v40, 4  ;;  %v1656_v61 = vrot.slane %v1654_v43, 5  ;;  %v448_v63 = vshrl.u32 %v242_v6, 16  ;;  %v5507_v35 = vsel %vm2732_vm6, %v4067_v4, %v5301_v49  ;;  %v4439_v40 = vld [vmem:[%s4536_s24 + $0x90] sm:$0xf] }
  0xb7   : > { %6907 = vst [vmem:[#allocation33_spill] sm:$0xff] %v5473_v1  ;;  %v451_v22 = vshll.u32 %v242_v6, 16  ;;  %v457_v54 = vshll.u32 %v5484_v3, 16  ;;  %v461_v27 = vshrl.u32 %v5484_v3, 16  ;;  %v1666_v2 = vrot.slane %v1664_v21, 5 }
  0xb8   : > { %v5486_v28 = vpop.permute.xlu1 %2350  ;;  %v1661_v10 = vor.u32 %v1660_v52, %v1656_v61  ;;  %v4003_v43 = vcombine.low %v4439_v40, %v4438_v19  ;;  %v450_v14 = vrot.slane %v448_v63, 4  ;;  %v467_v62 = vshll.u32 %v5498_v20, 16 }
  0xb9   : > { %2360 = vrot.lane.b32.xlu1 %v4045_v41, %s4487_s26  ;;  %v453_v49 = vrot.slane %v451_v22, 5  ;;  %v459_v4 = vrot.slane %v457_v54, 5  ;;  %v463_v6 = vrot.slane %v461_v27, 4  ;;  %v1657_v1 = vsel %vm4668_vm5, %v1652_v13, %v1656_v61  ;;  %v670_v22 = vld [vmem:[%s4536_s24 + $0x54] sm:$0xe] }
  0xba   : > { %v5488_v56 = vpop.permute.xlu0 %2654  ;;  %v1662_v41 = vrot.slane %v1661_v10, 4  ;;  %v3902_v52 = vrot.slane %v3886_v39, 9  ;;  %v1390_v21 = vrot.slane %v5503_v31, 5  ;;  %v469_v40 = vrot.slane %v467_v62, 5 }
  0xbb   : > { %v454_v63 = vor.u32 %v453_v49, %v450_v14  ;;  %v464_v19 = vor.u32 %v463_v6, %v459_v4  ;;  %v1393_v33 = vrot.slane %v5516_v11, 5  ;;  %v2912_v62 = vsel %vm2781_vm7, %v2865_v5, %v5210_v18  ;;  %v3925_v6 = vld [vmem:[%s4536_s24 + $0x6c] sm:$0xf]  ;;  %v5551_v5 = vld [vmem:[%s4536_s24 + $0x70] sm:$0xf] }
  0xbc   : > { %v1667_v54 = vsel %vm4668_vm5, %v1662_v41, %v1666_v2  ;;  %v1391_v27 = vsel %vm4572_vm2, %v3902_v52, %v1390_v21  ;;  %v1392_v13 = vrot.slane %v1390_v21, 4  ;;  %v2783_v49 = vsel %vm2781_vm7, %v2735_v55, %v5283_v12 }
  0xbd   : > { %v4109_v10 = vcombine.low %v1657_v1, %v1667_v54  ;;  %v455_v39 = vrot.slane %v454_v63, 4  ;;  %v465_v61 = vrot.slane %v464_v19, 4  ;;  %v3822_v2 = vrot.slane %v670_v22, 9 }
  0xbe   : > { %v5518_v37 = vpop.permute.xlu0 %2502  ;;  %v1394_v14 = vsel %vm4572_vm2, %v1392_v13, %v1393_v33  ;;  %v2944_v18 = vsel %vm2814_vm8, %v2912_v62, %v5354_v47  ;;  %v2816_v55 = vsel %vm2814_vm8, %v2783_v49, %v5235_v59  ;;  %v781_v63 = vrot.slane %v5484_v3, 5  ;;  %v5579_v62 = vld [vmem:[%s4536_s24 + $0x60] sm:$0xf] }
  0xbf   : > { %2664 = vrot.lane.b32.xlu0 %v4109_v10, %s4487_s26  ;;  %v460_v1 = vsel %vm4668_vm5, %v455_v39, %v459_v4  ;;  %v470_v33 = vsel %vm4668_vm5, %v465_v61, %v469_v40  ;;  %v4078_v21 = vcombine.low %v1391_v27, %v1394_v14  ;;  %3222 = vmatprep.mubr.bf16.mxu0 %v2944_v18  ;;  %v784_v19 = vrot.slane %v5498_v20, 5 }
  0xc0   : > { %v5524_v50 = vpop.permute.xlu1 %2198  ;;  %v4014_v12 = vcombine.low %v460_v1, %v470_v33  ;;  %v1039_v4 = vshll.u32 %v5455_v38, 16  ;;  %v2771_v40 = vsel %vm2732_vm6, %v4003_v43, %v5344_v58  ;;  %3223 = vmatmul.mubr.bf16.vlgmr.msra.gmra.mrb[0].mxu0 %v2816_v55  ;;  %v1669_v22 = vshrl.u32 %v3925_v6, 16 }
  0xc1   : > { %v1672_v47 = vshll.u32 %v3925_v6, 16  ;;  %v782_v54 = vsel %vm4572_vm2, %v3822_v2, %v781_v63  ;;  %v783_v59 = vrot.slane %v781_v63, 4  ;;  %v1682_v3 = vshrl.u32 %v5551_v5, 16  ;;  %v5601_v63 = vld [vmem:[%s4536_s24 + $0x74] sm:$0x1] }
  0xc2   : > { %v5541_v52 = vpop.permute.xlu0 %2598  ;;  %2186 = vrot.lane.b32.xlu1 %v4014_v12, %s4488_s8  ;;  %v2936_v20 = vsel %vm2781_vm7, %v5507_v35, %v5221_v48  ;;  %v1671_v58 = vrot.slane %v1669_v22, 4  ;;  %v4094_v13 = vcombine.low %v3925_v6, %v5551_v5  ;;  %v2807_v61 = vsel %vm2781_vm7, %v2771_v40, %v5314_v7  ;;  %v4440_v48 = vld [vmem:[%s4536_s24 + $0x1c] sm:$0xf]  ;;  %v4427_v7 = vld [vmem:[%s6815_s1 + $0x88] sm:$0xff]   ;;  %6911 = vst [vmem:[#allocation35_spill] sm:$0xff] %v5601_v63 }
  0xc3   : > { %2490 = vrot.lane.b32.xlu0 %v4078_v21, %s4488_s8  ;;  %v1674_v43 = vrot.slane %v1672_v47, 5  ;;  %v2980_v10 = vsel %vm2814_vm8, %v2936_v20, %v5381_v26  ;;  %v785_v39 = vsel %vm4572_vm2, %v783_v59, %v784_v19  ;;  %v925_v35 = vshll.u32 %v4440_v48, 16 }
  0xc4   : > { %v5539_v41 = vpop.permute.xlu1 %2278  ;;  %3318 = vmatprep.mubr.bf16.mxu1 %v2980_v10  ;;  %v929_v14 = vshrl.u32 %v4440_v48, 16  ;;  %v6909_v2 = vshrl.u32 %v5455_v38, 16  ;;  %v5587_v26 = vrot.slane %v1039_v4, 5  ;;  %v4030_v1 = vcombine.low %v782_v54, %v785_v39  ;;  %v244_v4 = vld [vmem:[%s4536_s24 + $0x60] sm:$0xf] }
  0xc5   : > { %v2852_v33 = vsel %vm2814_vm8, %v2807_v61, %v5379_v0  ;;  %v6910_v21 = vor.u32 %v5459_v51, %v5457_v9  ;;  %v927_v12 = vrot.slane %v925_v35, 5  ;;  %v4046_v0 = vcombine.low %v5579_v62, %v5503_v31  ;;  %v245_v10 = vld [vmem:[%s4536_s24 + $0x64] sm:$0xf]  ;;  %v4441_v39 = vld [vmem:[%s4536_s24 + $0xc] sm:$0xf] }
  0xc6   : > { %v5585_v6 = vrot.slane %v6909_v2, 4  ;;  %3319 = vmatmul.mubr.bf16.vlgmr.msra.gmra.mrb[0].mxu1 %v2852_v33  ;;  %v931_v55 = vrot.slane %v929_v14, 4  ;;  %2266 = vrot.lane.b32.xlu1 %v4030_v1, %s4486_s25  ;;  %v1675_v19 = vor.u32 %v1674_v43, %v1671_v58  ;;  %v1678_v9 = vshll.u32 %v5551_v5, 16  ;;  %v4442_v61 = vld [vmem:[%s4536_s24 + $0x10] sm:$0xf] }
  0xc7   : > { %v5597_v18 = vrot.slane %v6910_v21, 4  ;;  %2586 = vrot.lane.b32.xlu0 %v4094_v13, %s4486_s25  ;;  %v1684_v51 = vrot.slane %v1682_v3, 4  ;;  %v6912_v59 = vshll.u32 %v4736_v53, 16  ;;  %4306 = vmatpush3.bf16.msra.mxu1 %v5404_v57  ;;  %v1688_v13 = vshll.u32 %v5601_v63, 16  ;;  %v5628_v57 = vld [vmem:[%s4536_s24 + $0x68] sm:$0x1] }
  0xc8   : > { %v5567_v27 = vpop.permute.xlu1 %2374  ;;  %v932_v54 = vor.u32 %v931_v55, %v927_v12  ;;  %v1676_v58 = vrot.slane %v1675_v19, 4  ;;  %v1680_v43 = vrot.slane %v1678_v9, 5  ;;  %4307 = vmatprep.subr.bf16.mxu1 %v4427_v7  ;;  %v3992_v48 = vcombine.low %v4441_v39, %v4442_v61  ;;  %v3887_v55 = vld [vmem:[%s4536_s24 + $0x6c] sm:$0xe]  ;;  %v3927_v3 = vld [vmem:[%s4536_s24 + $0x78] sm:$0xf] }
  0xc9   : > { %v5581_v49 = vpop.permute.xlu0 %2678  ;;  %v937_v20 = vrot.slane %v6912_v59, 5  ;;  %v928_v53 = vsel %vm4668_vm5, %v4962_v8, %v927_v12  ;;  %v472_v14 = vshrl.u32 %v244_v4, 16  ;;  %v1060_v2 = vshrl.u32 %v5579_v62, 16  ;;  %v5640_v59 = vld [vmem:[%s4536_s24 + $0x70] sm:$0xf] }
  0xca   : > { %v933_v35 = vrot.slane %v932_v54, 4  ;;  %2362 = vrot.lane.b32.xlu1 %v4046_v0, %s4487_s26  ;;  %v1685_v1 = vor.u32 %v1684_v51, %v1680_v43  ;;  %v1690_v33 = vrot.slane %v1688_v13, 5  ;;  %v475_v21 = vshll.u32 %v244_v4, 16  ;;  %v5643_v4 = vld [vmem:[%s4536_s24 + $0x74] sm:$0x1] }
  0xcb   : > { %v1681_v8 = vsel %vm4668_vm5, %v1676_v58, %v1680_v43  ;;  %v474_v12 = vrot.slane %v472_v14, 4  ;;  %v481_v54 = vshll.u32 %v245_v10, 16  ;;  %4308 = vmatpush3.bf16.msra.mxu1 %v4427_v7  ;;  %v485_v13 = vshrl.u32 %v245_v10, 16  ;;  %6913 = vst [vmem:[#allocation36_spill] sm:$0xff] %v5643_v4  ;;  %v671_v14 = vld [vmem:[%s4536_s24 + $0x60] sm:$0xe] }
  0xcc   : > { %v5609_v40 = vpop.permute.xlu1 %2176  ;;  %v938_v9 = vsel %vm4668_vm5, %v933_v35, %v937_v20  ;;  %v1686_v39 = vrot.slane %v1685_v1, 4  ;;  %v477_v51 = vrot.slane %v475_v21, 5  ;;  %v2738_v20 = vsel %vm2732_vm6, %v3992_v48, %v5419_v45 }
  0xcd   : > { %v5615_v31 = vpop.permute.xlu0 %2480  ;;  %v4056_v0 = vcombine.low %v928_v53, %v938_v9  ;;  %v483_v35 = vrot.slane %v481_v54, 5  ;;  %v491_v58 = vshll.u32 %v5628_v57, 16  ;;  %v3903_v43 = vrot.slane %v3887_v55, 9 }
  0xce   : > { %v1063_v22 = vshll.u32 %v5579_v62, 16  ;;  %v1691_v7 = vsel %vm4668_vm5, %v1686_v39, %v1690_v33  ;;  %v478_v53 = vor.u32 %v477_v51, %v474_v12  ;;  %v487_v1 = vrot.slane %v485_v13, 4 }
  0xcf   : > { %v5654_v21 = vrot.slane %v1060_v2, 4  ;;  %v4110_v9 = vcombine.low %v1681_v8, %v1691_v7  ;;  %v493_v47 = vrot.slane %v491_v58, 5  ;;  %v1397_v38 = vrot.slane %v5640_v59, 5 }
  0xd0   : > { %v5633_v19 = vpop.permute.xlu1 %2256  ;;  %v479_v48 = vrot.slane %v478_v53, 4  ;;  %v488_v54 = vor.u32 %v487_v1, %v483_v35  ;;  %v1400_v55 = vrot.slane %v5643_v4, 5  ;;  %v3823_v62 = vrot.slane %v671_v14, 9 }
  0xd1   : > { %v5645_v61 = vpop.permute.xlu0 %2576  ;;  %2666 = vrot.lane.b32.xlu0 %v4110_v9, %s4487_s26  ;;  %v1398_v33 = vsel %vm4572_vm2, %v3903_v43, %v1397_v38  ;;  %v1399_v2 = vrot.slane %v1397_v38, 4  ;;  %v788_v12 = vrot.slane %v245_v10, 5  ;;  %v791_v8 = vrot.slane %v5628_v57, 5  ;;  %v5676_v43 = vld [vmem:[%s4536_s24 + $0x7c] sm:$0xf] }
  0xd2   : > { %v484_v39 = vsel %vm4668_vm5, %v479_v48, %v483_v35  ;;  %v489_v51 = vrot.slane %v488_v54, 4  ;;  %v1693_v13 = vshrl.u32 %v3927_v3, 16  ;;  %v1696_v58 = vshll.u32 %v3927_v3, 16 }
  0xd3   : > { %v2868_v14 = vsel %vm2732_vm6, %v4056_v0, %v5412_v17  ;;  %v1401_v53 = vsel %vm4572_vm2, %v1399_v2, %v1400_v55  ;;  %v789_v38 = vsel %vm4572_vm2, %v3823_v62, %v788_v12  ;;  %v790_v10 = vrot.slane %v788_v12, 4 }
  0xd4   : > { %v5658_v45 = vpop.permute.xlu1 %2352  ;;  %v494_v57 = vsel %vm4668_vm5, %v489_v51, %v493_v47  ;;  %v4079_v35 = vcombine.low %v1398_v33, %v1401_v53  ;;  %v1695_v1 = vrot.slane %v1693_v13, 4  ;;  %v1698_v9 = vrot.slane %v1696_v58, 5  ;;  %v4444_v13 = vld [vmem:[%s4536_s24 + $0x9c] sm:$0xf]  ;;  %v4445_v58 = vld [vmem:[%s4536_s24 + $0xa0] sm:$0xf] }
  0xd5   : > { %v5680_v48 = vrot.slane %v1063_v22, 5  ;;  %v2914_v17 = vsel %vm2781_vm7, %v2868_v14, %v5443_v16  ;;  %v4015_v0 = vcombine.low %v484_v39, %v494_v57  ;;  %v792_v54 = vsel %vm4572_vm2, %v790_v10, %v791_v8  ;;  %v5702_v39 = vld [vmem:[%s4536_s24 + $0x80] sm:$0x1]  ;;  %v3847_v53 = vld [vmem:[%s4536_s24 + $0x6c] sm:$0xf] }
  0xd6   : > { %v2785_v62 = vsel %vm2781_vm7, %v2738_v20, %v5441_v30  ;;  %2492 = vrot.lane.b32.xlu0 %v4079_v35, %s4488_s8  ;;  %v1706_v22 = vshrl.u32 %v5676_v43, 16  ;;  %v4095_v47 = vcombine.low %v3927_v3, %v5676_v43  ;;  %v2947_v16 = vsel %vm2814_vm8, %v2914_v17, %v5488_v56  ;;  %v4443_v20 = vld [vmem:[%s4536_s24 + $0xac] sm:$0xf] }
  0xd7   : > { %v5667_v7 = vpop.permute.xlu0 %2656  ;;  %2188 = vrot.lane.b32.xlu1 %v4015_v0, %s4488_s8  ;;  %v4031_v2 = vcombine.low %v789_v38, %v792_v54  ;;  %3230 = vmatprep.mubr.bf16.mxu0 %v2947_v16  ;;  %v2819_v30 = vsel %vm2814_vm8, %v2785_v62, %v5486_v28  ;;  %v1213_v12 = vshll.u32 %v4443_v20, 16  ;;  %v1217_v8 = vshrl.u32 %v4443_v20, 16  ;;  %v246_v17 = vld [vmem:[%s4536_s24 + $0x6c] sm:$0xf] }
  0xd8   : > { %v6914_v3 = vor.u32 %v5587_v26, %v5585_v6  ;;  %v4004_v14 = vcombine.low %v4444_v13, %v4445_v58  ;;  %3231 = vmatmul.mubr.bf16.gmra.mrb[4].mxu0 %v2819_v30  ;;  %v1699_v38 = vor.u32 %v1698_v9, %v1695_v1  ;;  %v1702_v35 = vshll.u32 %v5676_v43, 16 }
  0xd9   : > { %v1215_v10 = vrot.slane %v1213_v12, 5  ;;  %v1219_v57 = vrot.slane %v1217_v8, 4  ;;  %v6916_v26 = vshll.u32 %v4836_v42, 16  ;;  %v1708_v62 = vrot.slane %v1706_v22, 4  ;;  %v247_v8 = vld [vmem:[%s4536_s24 + $0x70] sm:$0xf] }
  0xda   : > { %v5686_v55 = vpop.permute.xlu1 %2200  ;;  %v5707_v56 = vrot.slane %v6914_v3, 4  ;;  %2588 = vrot.lane.b32.xlu0 %v4095_v47, %s4486_s25  ;;  %v1700_v54 = vrot.slane %v1699_v38, 4  ;;  %v1712_v1 = vshll.u32 %v5702_v39, 16  ;;  %v1084_v30 = vshrl.u32 %v3847_v53, 16  ;;  %v269_v3 = vld [vmem:[%s4536_s24 + $0x74] sm:$0x1] }
  0xdb   : > { %v5695_v33 = vpop.permute.xlu0 %2504  ;;  %v1225_v0 = vrot.slane %v6916_v26, 5  ;;  %2268 = vrot.lane.b32.xlu1 %v4031_v2, %s4486_s25  ;;  %v1220_v16 = vor.u32 %v1219_v57, %v1215_v10  ;;  %v4047_v20 = vcombine.low %v3847_v53, %v5640_v59  ;;  %v1704_v12 = vrot.slane %v1702_v35, 5  ;;  %v5735_v26 = vld [vmem:[%s4536_s24 + $0x7c] sm:$0xf] }
  0xdc   : > { %6915 = vst [vmem:[#allocation37_spill] sm:$0xff] %v5707_v56  ;;  %v2774_v42 = vsel %vm2732_vm6, %v4004_v14, %v5524_v50  ;;  %v1216_v22 = vsel %vm4668_vm5, %v5109_v36, %v1215_v10  ;;  %v1087_v47 = vshll.u32 %v3847_v53, 16  ;;  %v496_v13 = vshrl.u32 %v246_v17, 16  ;;  %v3888_v36 = vld [vmem:[%s4536_s24 + $0x78] sm:$0xe] }
  0xdd   : > { %v1221_v58 = vrot.slane %v1220_v16, 4  ;;  %v1709_v2 = vor.u32 %v1708_v62, %v1704_v12  ;;  %v1714_v38 = vrot.slane %v1712_v1, 5  ;;  %v499_v57 = vshll.u32 %v246_v17, 16  ;;  %v5746_v1 = vld [vmem:[%s4536_s24 + $0x80] sm:$0x1] }
  0xde   : > { %v5717_v6 = vpop.permute.xlu1 %2280  ;;  %v1705_v50 = vsel %vm4668_vm5, %v1700_v54, %v1704_v12  ;;  %v498_v14 = vrot.slane %v496_v13, 4  ;;  %v505_v35 = vshll.u32 %v247_v8, 16  ;;  %v509_v51 = vshrl.u32 %v247_v8, 16  ;;  %6917 = vst [vmem:[#allocation38_spill] sm:$0xff] %v5746_v1  ;;  %v672_v12 = vld [vmem:[%s4536_s24 + $0x6c] sm:$0xe] }
  0xdf   : > { %v5723_v9 = vpop.permute.xlu0 %2600  ;;  %v1226_v53 = vsel %vm4668_vm5, %v1221_v58, %v1225_v0  ;;  %2364 = vrot.lane.b32.xlu1 %v4047_v20, %s4487_s26  ;;  %v1710_v10 = vrot.slane %v1709_v2, 4  ;;  %v501_v62 = vrot.slane %v499_v57, 5  ;;  %v515_v17 = vshll.u32 %v269_v3, 16 }
  0xe0   : > { %v4068_v16 = vcombine.low %v1216_v22, %v1226_v53  ;;  %v5748_v28 = vrot.slane %v1084_v30, 4  ;;  %v507_v23 = vrot.slane %v505_v35, 5  ;;  %v511_v54 = vrot.slane %v509_v51, 4  ;;  %v3929_v30 = vld [vmem:[%s4536_s24 + $0x84] sm:$0xf] }
  0xe1   : > { %v5753_v56 = vrot.slane %v1087_v47, 5  ;;  %v1715_v0 = vsel %vm4668_vm5, %v1710_v10, %v1714_v38  ;;  %v502_v20 = vor.u32 %v501_v62, %v498_v14  ;;  %v3904_v58 = vrot.slane %v3888_v36, 9 }
  0xe2   : > { %v5737_v59 = vpop.permute.xlu1 %2376  ;;  %v4111_v2 = vcombine.low %v1705_v50, %v1715_v0  ;;  %v512_v57 = vor.u32 %v511_v54, %v507_v23  ;;  %v517_v29 = vrot.slane %v515_v17, 5  ;;  %v1404_v22 = vrot.slane %v5735_v26, 5  ;;  %v5772_v17 = vld [vmem:[%s4536_s24 + $0x88] sm:$0xf] }
  0xe3   : > { %v2904_v51 = vsel %vm2732_vm6, %v4068_v16, %v5518_v37  ;;  %v503_v35 = vrot.slane %v502_v20, 4  ;;  %v1407_v53 = vrot.slane %v5746_v1, 5  ;;  %v3824_v47 = vrot.slane %v672_v12, 9 }
  0xe4   : > { %2668 = vrot.lane.b32.xlu0 %v4111_v2, %s4487_s26  ;;  %v513_v38 = vrot.slane %v512_v57, 4  ;;  %v1405_v50 = vsel %vm4572_vm2, %v3904_v58, %v1404_v22  ;;  %v1406_v14 = vrot.slane %v1404_v22, 4  ;;  %v795_v36 = vrot.slane %v247_v8, 5 }
  0xe5   : > { %v5751_v13 = vpop.permute.xlu0 %2680  ;;  %v508_v62 = vsel %vm4668_vm5, %v503_v35, %v507_v23  ;;  %v798_v37 = vrot.slane %v269_v3, 5  ;;  %v1717_v16 = vshrl.u32 %v3929_v30, 16  ;;  %v1720_v54 = vshll.u32 %v3929_v30, 16 }
  0xe6   : > { %v518_v12 = vsel %vm4668_vm5, %v513_v38, %v517_v29  ;;  %v1408_v0 = vsel %vm4572_vm2, %v1406_v14, %v1407_v53  ;;  %v796_v20 = vsel %vm4572_vm2, %v3824_v47, %v795_v36  ;;  %v797_v8 = vrot.slane %v795_v36, 4  ;;  %v3849_v38 = vld [vmem:[%s4536_s24 + $0x78] sm:$0xf] }
  0xe7   : > { %v2809_v58 = vsel %vm2781_vm7, %v2774_v42, %v5539_v41  ;;  %v2938_v23 = vsel %vm2781_vm7, %v2904_v51, %v5541_v52  ;;  %v4016_v3 = vcombine.low %v508_v62, %v518_v12  ;;  %v4080_v2 = vcombine.low %v1405_v50, %v1408_v0  ;;  %v4446_v51 = vld [vmem:[%s4536_s24 + $0x28] sm:$0xf]  ;;  %v4447_v12 = vld [vmem:[%s4536_s24 + $0x18] sm:$0xf]  ;;  %v4448_v0 = vld [vmem:[%s4536_s24 + $0x1c] sm:$0xf] }
  0xe8   : > { %v5762_v44 = vpop.permute.xlu1 %2178  ;;  %v799_v29 = vsel %vm4572_vm2, %v797_v8, %v798_v37  ;;  %v1719_v22 = vrot.slane %v1717_v16, 4  ;;  %v1722_v35 = vrot.slane %v1720_v54, 5  ;;  %v1730_v53 = vshrl.u32 %v5772_v17, 16  ;;  %v5803_v16 = vld [vmem:[%s4536_s24 + $0x8c] sm:$0x1] }
  0xe9   : > { %v5767_v10 = vpop.permute.xlu0 %2482  ;;  %2190 = vrot.lane.b32.xlu1 %v4016_v3, %s4488_s8  ;;  %2494 = vrot.lane.b32.xlu0 %v4080_v2, %s4488_s8  ;;  %v4032_v41 = vcombine.low %v796_v20, %v799_v29  ;;  %v4096_v52 = vcombine.low %v3929_v30, %v5772_v17  ;;  %v2983_v42 = vsel %vm2814_vm8, %v2938_v23, %v5581_v49  ;;  %v949_v47 = vshll.u32 %v4446_v51, 16  ;;  %v248_v2 = vld [vmem:[%s4536_s24 + $0x78] sm:$0xf] }
  0xea   : > { %3326 = vmatprep.mubr.bf16.mxu1 %v2983_v42  ;;  %v2855_v62 = vsel %vm2814_vm8, %v2809_v58, %v5567_v27  ;;  %v953_v37 = vshrl.u32 %v4446_v51, 16  ;;  %v6918_v49 = vor.u32 %v5680_v48, %v5654_v21  ;;  %v3993_v20 = vcombine.low %v4447_v12, %v4448_v0 }
  0xeb   : > { %3327 = vmatmul.mubr.bf16.gmra.mrb[4].mxu1 %v2855_v62  ;;  %v951_v8 = vrot.slane %v949_v47, 5  ;;  %v1723_v58 = vor.u32 %v1722_v35, %v1719_v22  ;;  %v1726_v3 = vshll.u32 %v5772_v17, 16  ;;  %v6920_v48 = vshll.u32 %v4914_v32, 16 }
  0xec   : > { %v5784_v57 = vpop.permute.xlu1 %2258  ;;  %v5808_v30 = vrot.slane %v6918_v49, 4  ;;  %v955_v27 = vrot.slane %v953_v37, 4  ;;  %v4048_v42 = vcombine.low %v3849_v38, %v5735_v26  ;;  %v1732_v51 = vrot.slane %v1730_v53, 4  ;;  %v249_v49 = vld [vmem:[%s4536_s24 + $0x7c] sm:$0xf] }
  0xed   : > { %v5796_v50 = vpop.permute.xlu0 %2578  ;;  %2270 = vrot.lane.b32.xlu1 %v4032_v41, %s4486_s25  ;;  %2590 = vrot.lane.b32.xlu0 %v4096_v52, %s4486_s25  ;;  %v961_v29 = vrot.slane %v6920_v48, 5  ;;  %v1736_v47 = vshll.u32 %v5803_v16, 16  ;;  %v1108_v35 = vshrl.u32 %v3849_v38, 16  ;;  %v1724_v62 = vrot.slane %v1723_v58, 4  ;;  %v270_v52 = vld [vmem:[%s4536_s24 + $0x80] sm:$0x1] }
  0xee   : > { %6919 = vst [vmem:[#allocation39_spill] sm:$0xff] %v5808_v30  ;;  %v956_v22 = vor.u32 %v955_v27, %v951_v8  ;;  %v1728_v37 = vrot.slane %v1726_v3, 5  ;;  %v2741_v12 = vsel %vm2732_vm6, %v3993_v20, %v5609_v40  ;;  %v952_v32 = vsel %vm4668_vm5, %v5173_v15, %v951_v8  ;;  %v5835_v3 = vld [vmem:[%s4536_s24 + $0x88] sm:$0xf]  ;;  %v3889_v8 = vld [vmem:[%s4536_s24 + $0x84] sm:$0xe] }
  0xef   : > { %v1111_v41 = vshll.u32 %v3849_v38, 16  ;;  %v520_v26 = vshrl.u32 %v248_v2, 16  ;;  %v1738_v48 = vrot.slane %v1736_v47, 5  ;;  %v523_v58 = vshll.u32 %v248_v2, 16  ;;  %6921 = vst [vmem:[#allocation40_spill] sm:$0xff] %v5835_v3 }
  0xf0   : > { %v5817_v21 = vpop.permute.xlu1 %2354  ;;  %v957_v0 = vrot.slane %v956_v22, 4  ;;  %v1733_v27 = vor.u32 %v1732_v51, %v1728_v37  ;;  %v1729_v40 = vsel %vm4668_vm5, %v1724_v62, %v1728_v37  ;;  %v529_v15 = vshll.u32 %v249_v49, 16  ;;  %v5844_v47 = vld [vmem:[%s4536_s24 + $0x8c] sm:$0x1]  ;;  %v673_v37 = vld [vmem:[%s4536_s24 + $0x78] sm:$0xe] }
  0xf1   : > { %2366 = vrot.lane.b32.xlu1 %v4048_v42, %s4487_s26  ;;  %v522_v20 = vrot.slane %v520_v26, 4  ;;  %v533_v38 = vshrl.u32 %v249_v49, 16  ;;  %v525_v22 = vrot.slane %v523_v58, 5  ;;  %v539_v51 = vshll.u32 %v270_v52, 16  ;;  %6922 = vst [vmem:[#allocation41_spill] sm:$0xff] %v5844_v47 }
  0xf2   : > { %v962_v14 = vsel %vm4668_vm5, %v957_v0, %v961_v29  ;;  %v1734_v54 = vrot.slane %v1733_v27, 4  ;;  %v5848_v36 = vrot.slane %v1108_v35, 4  ;;  %v531_v23 = vrot.slane %v529_v15, 5  ;;  %v3931_v35 = vld [vmem:[%s4536_s24 + $0x90] sm:$0xf] }
  0xf3   : > { %v5832_v53 = vpop.permute.xlu0 %2658  ;;  %v4057_v42 = vcombine.low %v952_v32, %v962_v14  ;;  %v535_v62 = vrot.slane %v533_v38, 4  ;;  %v5853_v1 = vrot.slane %v1111_v41, 5  ;;  %v526_v0 = vor.u32 %v525_v22, %v522_v20 }
  0xf4   : > { %6923 = vst [vmem:[#allocation42_spill] sm:$0xff] %v5848_v36  ;;  %v1739_v29 = vsel %vm4668_vm5, %v1734_v54, %v1738_v48  ;;  %v3905_v27 = vrot.slane %v3889_v8, 9  ;;  %v541_v11 = vrot.slane %v539_v51, 5  ;;  %v1411_v14 = vrot.slane %v5835_v3, 5  ;;  %v5870_v51 = vld [vmem:[%s4536_s24 + $0x94] sm:$0xf] }
  0xf5   : > { %v4112_v58 = vcombine.low %v1729_v40, %v1739_v29  ;;  %v536_v30 = vor.u32 %v535_v62, %v531_v23  ;;  %v2871_v32 = vsel %vm2732_vm6, %v4057_v42, %v5615_v31  ;;  %v527_v15 = vrot.slane %v526_v0, 4 }
  0xf6   : > { %v1414_v38 = vrot.slane %v5844_v47, 5  ;;  %v3825_v41 = vrot.slane %v673_v37, 9  ;;  %v1412_v48 = vsel %vm4572_vm2, %v3905_v27, %v1411_v14  ;;  %v1413_v40 = vrot.slane %v1411_v14, 4 }
  0xf7   : > { %v5846_v2 = vpop.permute.xlu1 %2202  ;;  %v5851_v26 = vpop.permute.xlu0 %2506  ;;  %2670 = vrot.lane.b32.xlu0 %v4112_v58, %s4487_s26  ;;  %v537_v54 = vrot.slane %v536_v30, 4  ;;  %v802_v20 = vrot.slane %v249_v49, 5  ;;  %v532_v8 = vsel %vm4668_vm5, %v527_v15, %v531_v23  ;;  %v805_v22 = vrot.slane %v270_v52, 5 }
  0xf8   : > { %v1741_v31 = vshrl.u32 %v3931_v35, 16  ;;  %v1744_v42 = vshll.u32 %v3931_v35, 16  ;;  %v1415_v30 = vsel %vm4572_vm2, %v1413_v40, %v1414_v38  ;;  %v2787_v23 = vsel %vm2781_vm7, %v2741_v12, %v5633_v19 }
  0xf9   : > { %v542_v37 = vsel %vm4668_vm5, %v537_v54, %v541_v11  ;;  %v803_v29 = vsel %vm4572_vm2, %v3825_v41, %v802_v20  ;;  %v804_v49 = vrot.slane %v802_v20, 4  ;;  %v2916_v52 = vsel %vm2781_vm7, %v2871_v32, %v5645_v61  ;;  %v4449_v32 = vld [vmem:[%s4536_s24 + $0xb8] sm:$0xf]  ;;  %v5896_v54 = vld [vmem:[%s4536_s24 + $0x84] sm:$0xf] }
  0xfa   : > { %v4017_v0 = vcombine.low %v532_v8, %v542_v37  ;;  %v4081_v27 = vcombine.low %v1412_v48, %v1415_v30  ;;  %v1743_v58 = vrot.slane %v1741_v31, 4  ;;  %v1746_v14 = vrot.slane %v1744_v42, 5  ;;  %v5953_v31 = vld [vmem:[%s4536_s24 + $0x94] sm:$0xf] }
  0xfb   : > { %v5862_v63 = vpop.permute.xlu1 %2282  ;;  %v5872_v62 = vpop.permute.xlu0 %2602  ;;  %v806_v11 = vsel %vm4572_vm2, %v804_v49, %v805_v22  ;;  %v1754_v15 = vshrl.u32 %v5870_v51, 16  ;;  %v4097_v12 = vcombine.low %v3931_v35, %v5870_v51  ;;  %v2950_v61 = vsel %vm2814_vm8, %v2916_v52, %v5667_v7  ;;  %v5903_v22 = vld [vmem:[%s4536_s24 + $0x98] sm:$0x1] }
  0xfc   : > { %2192 = vrot.lane.b32.xlu1 %v4017_v0, %s4488_s8  ;;  %2496 = vrot.lane.b32.xlu0 %v4081_v27, %s4488_s8  ;;  %v4033_v19 = vcombine.low %v803_v29, %v806_v11  ;;  %v1237_v41 = vshll.u32 %v4449_v32, 16  ;;  %v2822_v20 = vsel %vm2814_vm8, %v2787_v23, %v5658_v45  ;;  %v1241_v8 = vshrl.u32 %v4449_v32, 16  ;;  %v3890_v29 = vld [vmem:[%s4536_s24 + $0x90] sm:$0xe] }
  0xfd   : > { %3238 = vmatprep.mubr.bf16.mxu0 %v2950_v61  ;;  %v6924_v35 = vor.u32 %v5753_v56, %v5748_v28  ;;  %v1747_v49 = vor.u32 %v1746_v14, %v1743_v58  ;;  %v1750_v23 = vshll.u32 %v5870_v51, 16  ;;  %v5917_v56 = vld [vmem:[%s4536_s24 + $0x84] sm:$0xf]  ;;  %v4049_v52 = vcombine.low %v5896_v54, %v5835_v3 }
  0xfe   : > { %3239 = vmatmul.mubr.bf16.gmra.mrb[8].mxu0 %v2822_v20  ;;  %v1239_v37 = vrot.slane %v1237_v41, 5  ;;  %v1243_v45 = vrot.slane %v1241_v8, 4  ;;  %6926 = vst [vmem:[#allocation44_spill] sm:$0xff] %v5917_v56  ;;  %v1756_v0 = vrot.slane %v1754_v15, 4  ;;  %v1760_v27 = vshll.u32 %v5903_v22, 16 }
  0xff   : > { %v5887_v38 = vpop.permute.xlu1 %2378  ;;  %v5908_v7 = vrot.slane %v6924_v35, 4  ;;  %v6927_v58 = vshll.u32 %v4992_v24, 16  ;;  %v1748_v61 = vrot.slane %v1747_v49, 4  ;;  %v1752_v32 = vrot.slane %v1750_v23, 5  ;;  %v5929_v41 = vld [vmem:[%s4536_s24 + $0x88] sm:$0xf] }
 0x100   : > { %2272 = vrot.lane.b32.xlu1 %v4033_v19, %s4486_s25  ;;  %2592 = vrot.lane.b32.xlu0 %v4097_v12, %s4486_s25  ;;  %v1244_v11 = vor.u32 %v1243_v45, %v1239_v37  ;;  %v4450_v19 = vld [vmem:[%s4536_s24 + $0xa8] sm:$0xf]  ;;  %v4451_v8 = vld [vmem:[%s4536_s24 + $0xac] sm:$0xf]  ;;  %v1240_v15 = vsel %vm4668_vm5, %v5191_v34, %v1239_v37  ;;  %v544_v24 = vshrl.u32 %v5917_v56, 16  ;;  %v1762_v48 = vrot.slane %v1760_v27, 5 }
 0x101   : > { %6925 = vst [vmem:[#allocation43_spill] sm:$0xff] %v5908_v7  ;;  %v5912_v30 = vpop.permute.xlu0 %2682  ;;  %v1249_v14 = vrot.slane %v6927_v58, 5  ;;  %v4005_v12 = vcombine.low %v4450_v19, %v4451_v8  ;;  %v271_v45 = vld [vmem:[%s4536_s24 + $0x8c] sm:$0x1]  ;;  %v1757_v58 = vor.u32 %v1756_v0, %v1752_v32  ;;  %v547_v28 = vshll.u32 %v5917_v56, 16 }
 0x102   : > { %v1245_v23 = vrot.slane %v1244_v11, 4  ;;  %v1753_v19 = vsel %vm4668_vm5, %v1748_v61, %v1752_v32  ;;  %v546_v34 = vrot.slane %v544_v24, 4  ;;  %v553_v37 = vshll.u32 %v5929_v41, 16  ;;  %v5960_v35 = vld [vmem:[%s4536_s24 + $0x98] sm:$0x1] }
 0x103   : > { %v557_v8 = vshrl.u32 %v5929_v41, 16  ;;  %v1758_v0 = vrot.slane %v1757_v58, 4  ;;  %v549_v27 = vrot.slane %v547_v28, 5  ;;  %v563_v42 = vshll.u32 %v271_v45, 16  ;;  %v674_v56 = vld [vmem:[%s4536_s24 + $0x84] sm:$0xe] }
 0x104   : > { %v5931_v20 = vpop.permute.xlu1 %2180  ;;  %2368 = vrot.lane.b32.xlu1 %v4049_v52, %s4487_s26  ;;  %v1250_v11 = vsel %vm4668_vm5, %v1245_v23, %v1249_v14  ;;  %v2777_v61 = vsel %vm2732_vm6, %v4005_v12, %v5686_v55  ;;  %v555_v24 = vrot.slane %v553_v37, 5  ;;  %v1135_v14 = vshll.u32 %v5896_v54, 16  ;;  %v3933_v12 = vld [vmem:[%s4536_s24 + $0x9c] sm:$0xf] }
 0x105   : > { %v5941_v49 = vpop.permute.xlu0 %2484  ;;  %v4069_v32 = vcombine.low %v1240_v15, %v1250_v11  ;;  %v559_v40 = vrot.slane %v557_v8, 4  ;;  %v1763_v28 = vsel %vm4668_vm5, %v1758_v0, %v1762_v48  ;;  %v550_v23 = vor.u32 %v549_v27, %v546_v34 }
 0x106   : > { %v3906_v58 = vrot.slane %v3890_v29, 9  ;;  %v4113_v7 = vcombine.low %v1753_v19, %v1763_v28  ;;  %v565_v47 = vrot.slane %v563_v42, 5  ;;  %v1418_v55 = vrot.slane %v5953_v31, 5 }
 0x107   : > { %v560_v4 = vor.u32 %v559_v40, %v555_v24  ;;  %v2907_v15 = vsel %vm2732_vm6, %v4069_v32, %v5695_v33  ;;  %v551_v37 = vrot.slane %v550_v23, 4  ;;  %v1421_v8 = vrot.slane %v5960_v35, 5  ;;  %v5982_v33 = vld [vmem:[%s4536_s24 + $0xa0] sm:$0xf] }
 0x108   : > { %v5955_v52 = vpop.permute.xlu1 %2260  ;;  %v3826_v11 = vrot.slane %v674_v56, 9  ;;  %2672 = vrot.lane.b32.xlu0 %v4113_v7, %s4487_s26  ;;  %v1419_v48 = vsel %vm4572_vm2, %v3906_v58, %v1418_v55  ;;  %v1420_v29 = vrot.slane %v1418_v55, 4  ;;  %v809_v40 = vrot.slane %v5929_v41, 5 }
 0x109   : > { %v5963_v3 = vpop.permute.xlu0 %2580  ;;  %v561_v36 = vrot.slane %v560_v4, 4  ;;  %v556_v19 = vsel %vm4668_vm5, %v551_v37, %v555_v24  ;;  %v812_v34 = vrot.slane %v271_v45, 5  ;;  %v1765_v0 = vshrl.u32 %v3933_v12, 16 }
 0x10a   : > { %v1768_v27 = vshll.u32 %v3933_v12, 16  ;;  %v1422_v4 = vsel %vm4572_vm2, %v1420_v29, %v1421_v8  ;;  %v810_v56 = vsel %vm4572_vm2, %v3826_v11, %v809_v40  ;;  %v811_v32 = vrot.slane %v809_v40, 4  ;;  %v4454_v29 = vld [vmem:[%s4536_s24 + $0x28] sm:$0xf]  ;;  %v4460_v11 = vld [vmem:[%s4536_s24 + $0x40] sm:$0xf] }
 0x10b   : > { %v566_v7 = vsel %vm4668_vm5, %v561_v36, %v565_v47  ;;  %v2811_v45 = vsel %vm2781_vm7, %v2777_v61, %v5717_v6  ;;  %v2940_v24 = vsel %vm2781_vm7, %v2907_v15, %v5723_v9  ;;  %v4082_v36 = vcombine.low %v1419_v48, %v1422_v4  ;;  %v4452_v15 = vld [vmem:[%s4536_s24 + $0x34] sm:$0xf]  ;;  %v4453_v48 = vld [vmem:[%s4536_s24 + $0x24] sm:$0xf] }
 0x10c   : > { %v5977_v42 = vpop.permute.xlu1 %2356  ;;  %v4018_v23 = vcombine.low %v556_v19, %v566_v7  ;;  %v813_v47 = vsel %vm4572_vm2, %v811_v32, %v812_v34  ;;  %v1767_v58 = vrot.slane %v1765_v0, 4  ;;  %v1770_v55 = vrot.slane %v1768_v27, 5  ;;  %v6011_v0 = vld [vmem:[%s4536_s24 + $0x90] sm:$0xf]  ;;  %v6014_v27 = vld [vmem:[%s4536_s24 + $0xa4] sm:$0x1] }
 0x10d   : > { %v1778_v37 = vshrl.u32 %v5982_v33, 16  ;;  %2498 = vrot.lane.b32.xlu0 %v4082_v36, %s4488_s8  ;;  %v4034_v6 = vcombine.low %v810_v56, %v813_v47  ;;  %v4098_v9 = vcombine.low %v3933_v12, %v5982_v33  ;;  %v2986_v61 = vsel %vm2814_vm8, %v2940_v24, %v5751_v13 }
 0x10e   : > { %v5990_v28 = vpop.permute.xlu0 %2660  ;;  %2194 = vrot.lane.b32.xlu1 %v4018_v23, %s4488_s8  ;;  %v973_v8 = vshll.u32 %v4452_v15, 16  ;;  %3334 = vmatprep.mubr.bf16.mxu1 %v2986_v61  ;;  %v3994_v40 = vcombine.low %v4453_v48, %v4454_v29  ;;  %v2858_v19 = vsel %vm2814_vm8, %v2811_v45, %v5737_v59  ;;  %v977_v34 = vshrl.u32 %v4452_v15, 16 }
 0x10f   : > { %v6928_v13 = vshrl.u32 %v5896_v54, 16  ;;  %v6022_v4 = vrot.slane %v1135_v14, 5  ;;  %3335 = vmatmul.mubr.bf16.gmra.mrb[8].mxu1 %v2858_v19  ;;  %v1156_v32 = vshrl.u32 %v6011_v0, 16  ;;  %v1771_v45 = vor.u32 %v1770_v55, %v1767_v58  ;;  %v6929_v54 = vld [vmem:[#allocation17_spill] sm:$0xff] }
 0x110   : > { %v975_v56 = vrot.slane %v973_v8, 5  ;;  %v979_v59 = vrot.slane %v977_v34, 4  ;;  %v1774_v23 = vshll.u32 %v5982_v33, 16  ;;  %v6930_v14 = vshll.u32 %v6929_v54, 16  ;;  %v4455_v34 = vld [vmem:[%s4536_s24 + $0xb4] sm:$0xf] }
 0x111   : > { %v6020_v7 = vrot.slane %v6928_v13, 4  ;;  %2594 = vrot.lane.b32.xlu0 %v4098_v9, %s4486_s25  ;;  %v4050_v61 = vcombine.low %v6011_v0, %v5953_v31  ;;  %v1780_v15 = vrot.slane %v1778_v37, 4  ;;  %v1784_v8 = vshll.u32 %v6014_v27, 16  ;;  %v4456_v13 = vld [vmem:[%s4536_s24 + $0xb8] sm:$0xf] }
 0x112   : > { %v6027_v36 = vpop.permute.xlu0 %2486  ;;  %2274 = vrot.lane.b32.xlu1 %v4034_v6, %s4486_s25  ;;  %v985_v47 = vrot.slane %v6930_v14, 5  ;;  %v2744_v58 = vsel %vm2732_vm6, %v3994_v40, %v5762_v44  ;;  %v980_v55 = vor.u32 %v979_v59, %v975_v56  ;;  %v1772_v48 = vrot.slane %v1771_v45, 4  ;;  %v6931_v14 = vld [vmem:[#allocation26_spill] sm:$0xff] }
 0x113   : > { %v6016_v12 = vpop.permute.xlu1 %2182  ;;  %v1776_v29 = vrot.slane %v1774_v23, 5  ;;  %v6040_v9 = vrot.slane %v1156_v32, 4  ;;  %v4006_v54 = vcombine.low %v4455_v34, %v4456_v13  ;;  %v976_v44 = vsel %vm4668_vm5, %v6931_v14, %v975_v56  ;;  %v4457_v34 = vld [vmem:[%s4536_s24 + $0xc4] sm:$0xf]  ;;  %v4459_v14 = vld [vmem:[%s4536_s24 + $0x34] sm:$0xf] }
 0x114   : > { %v981_v40 = vrot.slane %v980_v55, 4  ;;  %v1786_v45 = vrot.slane %v1784_v8, 5  ;;  %v2789_v23 = vsel %vm2781_vm7, %v2744_v58, %v5784_v57  ;;  %v1261_v13 = vshll.u32 %v4457_v34, 16  ;;  %v4458_v58 = vld [vmem:[%s4536_s24 + $0x30] sm:$0xf] }
 0x115   : > { %v1781_v59 = vor.u32 %v1780_v15, %v1776_v29  ;;  %v1777_v32 = vsel %vm4668_vm5, %v1772_v48, %v1776_v29  ;;  %v1265_v6 = vshrl.u32 %v4457_v34, 16  ;;  %v2780_v15 = vsel %vm2732_vm6, %v4006_v54, %v5846_v2 }
 0x116   : > { %2370 = vrot.lane.b32.xlu1 %v4050_v61, %s4487_s26  ;;  %v986_v56 = vsel %vm4668_vm5, %v981_v40, %v985_v47  ;;  %v2825_v61 = vsel %vm2814_vm8, %v2789_v23, %v5817_v21  ;;  %v6062_v8 = vpop.permute.xlu0 %2582  ;;  %v1263_v29 = vrot.slane %v1261_v13, 5  ;;  %v3995_v24 = vcombine.low %v4458_v58, %v4459_v14  ;;  %v6932_v47 = vld [vmem:[#allocation20_spill] sm:$0xff] }
 0x117   : > { %v6045_v37 = vpop.permute.xlu1 %2262  ;;  %v1782_v55 = vrot.slane %v1781_v59, 4  ;;  %v4058_v48 = vcombine.low %v976_v44, %v986_v56  ;;  %v1267_v57 = vrot.slane %v1265_v6, 4  ;;  %v6933_v40 = vshll.u32 %v6932_v47, 16  ;;  %v3959_v44 = vld [vmem:[%s4536_s24 + $0x18] sm:$0xe] }
 0x118   : > { %v997_v2 = vshll.u32 %v4460_v11, 16  ;;  %v1001_v54 = vshrl.u32 %v4460_v11, 16  ;;  %v2813_v6 = vsel %vm2781_vm7, %v2780_v15, %v5862_v63  ;;  %v6934_v11 = vld [vmem:[#allocation29_spill] sm:$0xff]  ;;  %v6935_v15 = vld [vmem:[#allocation23_spill] sm:$0xff]  ;;  %v3975_v14 = vrot.slane %v3959_v44, 9 }
 0x119   : > { %v1787_v34 = vsel %vm4668_vm5, %v1782_v55, %v1786_v45  ;;  %v1273_v59 = vrot.slane %v6933_v40, 5  ;;  %v2874_v21 = vsel %vm2732_vm6, %v4058_v48, %v5767_v10  ;;  %v1268_v19 = vor.u32 %v1267_v57, %v1263_v29  ;;  %v6939_v40 = vld [vmem:[#allocation5_spill] sm:$0xff] }
 0x11a   : > { %v4114_v23 = vcombine.low %v1777_v32, %v1787_v34  ;;  %v2918_v45 = vsel %vm2781_vm7, %v2874_v21, %v5796_v50  ;;  %v2861_v56 = vsel %vm2814_vm8, %v2813_v6, %v5887_v38  ;;  %v999_v55 = vrot.slane %v997_v2, 5  ;;  %v6937_v34 = vld [vmem:[#allocation7_spill] sm:$0xff] }
 0x11b   : > { %v6076_v13 = vpop.permute.xlu1 %2358  ;;  %v1003_v58 = vrot.slane %v1001_v54, 4  ;;  %v2953_v10 = vsel %vm2814_vm8, %v2918_v45, %v5832_v53  ;;  %v1264_v63 = vsel %vm4668_vm5, %v6934_v11, %v1263_v29  ;;  %v1269_v32 = vrot.slane %v1268_v19, 4  ;;  %v6941_v29 = vld [vmem:[#allocation9_spill] sm:$0xff]  ;;  %v6942_v54 = vld [vmem:[#allocation16_spill] sm:$0xff]  ;;  %v4462_v6 = vld [vmem:[%s4536_s24 + $0x40] sm:$0xf] }
 0x11c   : > { %2674 = vrot.lane.b32.xlu0 %v4114_v23, %s4487_s26  ;;  %v2747_v50 = vsel %vm2732_vm6, %v3995_v24, %v5931_v20  ;;  %3246 = vmatprep.mubr.bf16.mxu0 %v2953_v10  ;;  %v6936_v48 = vshll.u32 %v6935_v15, 16  ;;  %v6938_v47 = vrot.slane %v6937_v34, 5  ;;  %v6940_v20 = vld [vmem:[#allocation33_spill] sm:$0xff]  ;;  %v4120_v21 = vcombine.low %v6942_v54, %v6941_v29  ;;  %v4461_v23 = vld [vmem:[%s4536_s24 + $0x3c] sm:$0xf]  ;;  %v6943_v11 = vld [vmem:[#allocation3_spill] sm:$0xff] }
 0x11d   : > { %v1004_v38 = vor.u32 %v1003_v58, %v999_v55  ;;  %v6097_v2 = vpop.permute.xlu0 %2662  ;;  %3247 = vmatmul.mubr.bf16.gmra.mrb[12].mxu0 %v2825_v61  ;;  %v1274_v19 = vsel %vm4668_vm5, %v1269_v32, %v1273_v59  ;;  %v1000_v24 = vsel %vm4668_vm5, %v6940_v20, %v999_v55  ;;  %v3996_v44 = vcombine.low %v4461_v23, %v4462_v6  ;;  %v3961_v45 = vld [vmem:[%s4536_s24 + $0x30] sm:$0xe]  ;;  %v4463_v59 = vld [vmem:[%s4536_s24 + $0x4c] sm:$0xf]  ;;  %v3962_v20 = vld [vmem:[%s4536_s24 + $0x3c] sm:$0xe] }
 0x11e   : > { %v1009_v57 = vrot.slane %v6936_v48, 5  ;;  %v1954_v53 = vsel %vm4572_vm2, %v6939_v40, %v6938_v47  ;;  %v4070_v58 = vcombine.low %v1264_v63, %v1274_v19  ;;  %v6944_v15 = vrot.slane %v6943_v11, 5 }
 0x11f   : > { %v1005_v10 = vrot.slane %v1004_v38, 4  ;;  %v1021_v32 = vshll.u32 %v4463_v59, 16  ;;  %v2791_v55 = vsel %vm2781_vm7, %v2747_v50, %v5955_v52  ;;  %v2750_v34 = vsel %vm2732_vm6, %v3996_v44, %v6016_v12  ;;  %v3963_v44 = vld [vmem:[%s4536_s24 + $0x48] sm:$0xe] }
 0x120   : > { %v1951_v61 = vsel %vm4572_vm2, %v3975_v14, %v6944_v15  ;;  %v1025_v47 = vshrl.u32 %v4463_v59, 16  ;;  %v2910_v63 = vsel %vm2732_vm6, %v4070_v58, %v5851_v26  ;;  %v3977_v19 = vrot.slane %v3961_v45, 9 }
 0x121   : > { %v4119_v48 = vcombine.low %v1951_v61, %v1954_v53  ;;  %v1010_v38 = vsel %vm4668_vm5, %v1005_v10, %v1009_v57  ;;  %v1023_v14 = vrot.slane %v1021_v32, 5  ;;  %v2942_v23 = vsel %vm2781_vm7, %v2910_v63, %v5872_v62  ;;  %v6945_v53 = vld [vmem:[#allocation12_spill] sm:$0xff]  ;;  %v6947_v57 = vld [vmem:[#allocation27_spill] sm:$0xff] }
 0x122   : > { %v4059_v52 = vcombine.low %v1000_v24, %v1010_v38  ;;  %v1027_v50 = vrot.slane %v1025_v47, 4  ;;  %v6946_v6 = vrot.slane %v6945_v53, 5  ;;  %v2989_v11 = vsel %vm2814_vm8, %v2942_v23, %v5912_v30  ;;  %v6141_v24 = vpop.permute.xlu0 %2488  ;;  %v6950_v30 = vld [vmem:[#allocation13_spill] sm:$0xff]  ;;  %v6952_v38 = vld [vmem:[#allocation18_spill] sm:$0xff] }
 0x123   : > { %v6118_v40 = vpop.permute.xlu1 %2184  ;;  %v1024_v26 = vsel %vm4668_vm5, %v5597_v18, %v1023_v14  ;;  %v6948_v45 = vshll.u32 %v6947_v57, 16  ;;  %3342 = vmatprep.mubr.bf16.mxu1 %v2989_v11  ;;  %v6951_v59 = vrot.slane %v6950_v30, 5  ;;  %v3978_v32 = vrot.slane %v3962_v20, 9 }
 0x124   : > { %v1966_v12 = vrot.slane %v6946_v6, 4  ;;  %v6949_v10 = vmov %v6946_v6  ;;  %v2877_v15 = vsel %vm2732_vm6, %v4059_v52, %v5941_v49  ;;  %v1028_v61 = vor.u32 %v1027_v50, %v1023_v14  ;;  %3343 = vmatmul.mubr.bf16.gmra.mrb[12].mxu1 %v2861_v56  ;;  %v3964_v6 = vld [vmem:[%s4536_s24 + $0x54] sm:$0xe] }
 0x125   : > { %v1033_v58 = vrot.slane %v6948_v45, 5  ;;  %v1965_v62 = vsel %vm4572_vm2, %v3977_v19, %v6949_v10  ;;  %v2920_v47 = vsel %vm2781_vm7, %v2877_v15, %v5963_v3  ;;  %v6953_v19 = vrot.slane %v6952_v38, 5  ;;  %4309 = vmatprep.mubr.msk.bf16.mxu1 %vm2732_vm6, %v4119_v48  ;;  %v6955_v3 = vld [vmem:[#allocation24_spill] sm:$0xff]  ;;  %v6958_v48 = vld [vmem:[#allocation19_spill] sm:$0xff] }
 0x126   : > { %v1968_v18 = vsel %vm4572_vm2, %v1966_v12, %v6951_v59  ;;  %v3979_v53 = vrot.slane %v3963_v44, 9  ;;  %v2956_v49 = vsel %vm2814_vm8, %v2920_v47, %v5990_v28  ;;  %v1029_v14 = vrot.slane %v1028_v61, 4  ;;  %v3965_v59 = vld [vmem:[%s4536_s24 + $0x60] sm:$0xe] }
 0x127   : > { %v4121_v63 = vcombine.low %v1965_v62, %v1968_v18  ;;  %v1973_v23 = vrot.slane %v6953_v19, 4  ;;  %v6954_v52 = vmov %v6953_v19  ;;  %v6956_v20 = vrot.slane %v6955_v3, 5  ;;  %v2265_v12 = vpop.permute.xlu1 %2264  ;;  %3254 = vmatprep.mubr.bf16.mxu0 %v2956_v49  ;;  %v4465_v49 = vld [vmem:[%s4536_s24 + $0x4c] sm:$0xf] }
 0x128   : > { %v6161_v56 = vsel %vm4572_vm2, %v3978_v32, %v6954_v52  ;;  %v6957_v44 = vshll.u32 %v6011_v0, 16  ;;  %v2828_v28 = vsel %vm2814_vm8, %v2791_v55, %v5977_v42  ;;  %v6959_v57 = vrot.slane %v6958_v48, 5  ;;  %v6961_v55 = vld [vmem:[#allocation25_spill] sm:$0xff] }
 0x129   : > { %v1980_v50 = vrot.slane %v6956_v20, 4  ;;  %v6960_v10 = vmov %v6956_v20  ;;  %3255 = vmatmul.mubr.bf16.gmra.mrb[16].mxu0 %v2828_v28  ;;  %v1034_v0 = vsel %vm4668_vm5, %v1029_v14, %v1033_v58  ;;  %v6962_v15 = vrot.slane %v6961_v55, 5  ;;  %v6963_v58 = vld [vmem:[#allocation28_spill] sm:$0xff] }
 0x12a   : > { %v6167_v11 = vrot.slane %v6957_v44, 5  ;;  %v6175_v45 = vsel %vm4572_vm2, %v1973_v23, %v6959_v57  ;;  %v6181_v62 = vsel %vm4572_vm2, %v3979_v53, %v6960_v10  ;;  %v3980_v30 = vrot.slane %v3964_v6, 9  ;;  %v6200_v23 = vpop.permute.xlu0 %2584  ;;  %v4464_v53 = vld [vmem:[%s4536_s24 + $0x48] sm:$0xf] }
 0x12b   : > { %v4122_v42 = vcombine.low %v6161_v56, %v6175_v45  ;;  %v6191_v61 = vsel %vm4572_vm2, %v1980_v50, %v6962_v15  ;;  %v4060_v18 = vcombine.low %v1024_v26, %v1034_v0  ;;  %v2793_v32 = vsel %vm2781_vm7, %v2750_v34, %v6045_v37  ;;  %v4466_v26 = vld [vmem:[%s4536_s24 + $0x58] sm:$0xf]  ;;  %v3966_v34 = vld [vmem:[%s4536_s24 + $0x6c] sm:$0xe]  ;;  %v6987_v56 = vld [vmem:[#allocation39_spill] sm:$0xff] }
 0x12c   : > { %v4123_v47 = vcombine.low %v6181_v62, %v6191_v61  ;;  %v6964_v38 = vrot.slane %v6963_v58, 5  ;;  %v3997_v14 = vcombine.low %v4464_v53, %v4465_v49  ;;  %v1045_v3 = vshll.u32 %v4466_v26, 16  ;;  %4310 = vmatmul.mubr.msk.bf16.vlgmr.msra.gmra.mrb[16].mxu1 %vm2732_vm6, %v4120_v21  ;;  %v6970_v21 = vld [vmem:[#allocation30_spill] sm:$0xff]  ;;  %v6973_v53 = vld [vmem:[#allocation37_spill] sm:$0xff] }
 0x12d   : > { %v1049_v37 = vshrl.u32 %v4466_v26, 16  ;;  %v2880_v20 = vsel %vm2732_vm6, %v4060_v18, %v6027_v36  ;;  %v2831_v50 = vsel %vm2814_vm8, %v2793_v32, %v6076_v13  ;;  %v6966_v44 = vrot.slane %v5336_v60, 5  ;;  %v6226_v36 = vpop.permute.xlu1 %2360  ;;  %v6967_v13 = vld [vmem:[#allocation31_spill] sm:$0xff]  ;;  %4313 = vmatprep.mubr.msk.bf16.mxu1 %vm2732_vm6, %v4121_v63 }
 0x12e   : > { %v1987_v19 = vrot.slane %v6964_v38, 4  ;;  %v6965_v52 = vmov %v6964_v38  ;;  %v3981_v48 = vrot.slane %v3965_v59, 9  ;;  %v2922_v57 = vsel %vm2781_vm7, %v2880_v20, %v6062_v8  ;;  %v3968_v20 = vld [vmem:[%s4536_s24 + $0x84] sm:$0xe] }
 0x12f   : > { %v6208_v6 = vsel %vm4572_vm2, %v3980_v30, %v6965_v52  ;;  %v1047_v0 = vrot.slane %v1045_v3, 5  ;;  %v1051_v55 = vrot.slane %v1049_v37, 4  ;;  %v2959_v60 = vsel %vm2814_vm8, %v2922_v57, %v6097_v2  ;;  %v6974_v52 = vld [vmem:[#allocation32_spill] sm:$0xff]  ;;  %v4467_v37 = vld [vmem:[%s4536_s24 + $0x64] sm:$0xf] }
 0x130   : > { %v6220_v28 = vsel %vm4572_vm2, %v1987_v19, %v6966_v44  ;;  %v6968_v15 = vrot.slane %v6967_v13, 5  ;;  %v3982_v18 = vrot.slane %v3966_v34, 9  ;;  %3262 = vmatprep.mubr.bf16.mxu0 %v2959_v60  ;;  %v2753_v29 = vsel %vm2732_vm6, %v3997_v14, %v6118_v40  ;;  %v3967_v19 = vld [vmem:[%s4536_s24 + $0x78] sm:$0xe]  ;;  %v6977_v57 = vld [vmem:[#allocation35_spill] sm:$0xff] }
 0x131   : > { %v4124_v10 = vcombine.low %v6208_v6, %v6220_v28  ;;  %v1052_v54 = vor.u32 %v1051_v55, %v1047_v0  ;;  %v6971_v2 = vshll.u32 %v6970_v21, 16  ;;  %v6972_v58 = vrot.slane %v5551_v5, 5  ;;  %v2665_v3 = vpop.permute.xlu0 %2664  ;;  %3263 = vmatmul.mubr.bf16.gmra.mrb[20].mxu0 %v2831_v50  ;;  %v4471_v6 = vld [vmem:[%s4536_s24 + $0x7c] sm:$0xf] }
 0x132   : > { %v6238_v8 = vsel %vm4572_vm2, %v3981_v48, %v6968_v15  ;;  %v6969_v30 = vmov %v6968_v15  ;;  %v1048_v49 = vsel %vm4668_vm5, %v6973_v53, %v1047_v0  ;;  %v6975_v26 = vrot.slane %v6974_v52, 5  ;;  %v4468_v53 = vld [vmem:[%s4536_s24 + $0x54] sm:$0xf]  ;;  %v4469_v52 = vld [vmem:[%s4536_s24 + $0x58] sm:$0xf] }
 0x133   : > { %v1994_v59 = vrot.slane %v6969_v30, 4  ;;  %v1057_v32 = vrot.slane %v6971_v2, 5  ;;  %v2001_v38 = vrot.slane %v6972_v58, 4  ;;  %v6976_v40 = vmov %v6972_v58  ;;  %v3969_v58 = vld [vmem:[%s4536_s24 + $0x90] sm:$0xe] }
 0x134   : > { %v6263_v14 = vsel %vm4572_vm2, %v3982_v18, %v6976_v40  ;;  %v1069_v34 = vshll.u32 %v4467_v37, 16  ;;  %v1053_v44 = vrot.slane %v1052_v54, 4  ;;  %v6978_v0 = vrot.slane %v6977_v57, 5  ;;  %4314 = vmatmul.mubr.msk.bf16.gmra.mrb[20].mxu1 %vm2732_vm6, %v4122_v42 }
 0x135   : > { %v6257_v63 = vsel %vm4572_vm2, %v1994_v59, %v6975_v26  ;;  %v1073_v55 = vshrl.u32 %v4467_v37, 16  ;;  %v2795_v60 = vsel %vm2781_vm7, %v2753_v29, %v2265_v12  ;;  %v3983_v50 = vrot.slane %v3967_v19, 9  ;;  %v2187_v59 = vpop.permute.xlu1 %2186  ;;  %v6980_v12 = vld [vmem:[#allocation34_spill] sm:$0xff]  ;;  %4317 = vmatprep.mubr.msk.bf16.mxu1 %vm2732_vm6, %v4123_v47 }
 0x136   : > { %v4125_v48 = vcombine.low %v6238_v8, %v6257_v63  ;;  %v6273_v5 = vsel %vm4572_vm2, %v2001_v38, %v6978_v0  ;;  %v1071_v15 = vrot.slane %v1069_v34, 5  ;;  %v1058_v30 = vsel %vm4668_vm5, %v1053_v44, %v1057_v32  ;;  %v2491_v34 = vpop.permute.xlu0 %2490 }
 0x137   : > { %v4126_v13 = vcombine.low %v6263_v14, %v6273_v5  ;;  %v1075_v18 = vrot.slane %v1073_v55, 4  ;;  %v6979_v54 = vrot.slane %v5676_v43, 5  ;;  %v3984_v2 = vrot.slane %v3968_v20, 9 }
 0x138   : > { %v4061_v38 = vcombine.low %v1048_v49, %v1058_v30  ;;  %v3998_v26 = vcombine.low %v4468_v53, %v4469_v52  ;;  %v6981_v29 = vshll.u32 %v6980_v12, 16  ;;  %v6983_v44 = vrot.slane %v5702_v39, 5  ;;  %v4470_v12 = vld [vmem:[%s4536_s24 + $0x70] sm:$0xf] }
 0x139   : > { %v2008_v21 = vrot.slane %v6979_v54, 4  ;;  %v6982_v37 = vmov %v6979_v54  ;;  %v1076_v32 = vor.u32 %v1075_v18, %v1071_v15  ;;  %v6984_v49 = vrot.slane %v5772_v17, 5  ;;  %v2267_v62 = vpop.permute.xlu1 %2266 }
 0x13a   : > { %v1081_v40 = vrot.slane %v6981_v29, 5  ;;  %v6291_v19 = vsel %vm4572_vm2, %v3983_v50, %v6982_v37  ;;  %v2883_v39 = vsel %vm2732_vm6, %v4061_v38, %v6141_v24  ;;  %v3985_v50 = vrot.slane %v3969_v58, 9  ;;  %v6991_v58 = vld [vmem:[#allocation38_spill] sm:$0xff] }
 0x13b   : > { %v6297_v20 = vsel %vm4572_vm2, %v2008_v21, %v6983_v44  ;;  %v6303_v57 = vsel %vm4572_vm2, %v3984_v2, %v6984_v49  ;;  %v6985_v43 = vmov %v6984_v49  ;;  %v6986_v30 = vrot.slane %v5870_v51, 5  ;;  %v3971_v2 = vld [vmem:[%s4536_s24 + $0xa8] sm:$0xe] }
 0x13c   : > { %v2015_v0 = vrot.slane %v6985_v43, 4  ;;  %v4127_v55 = vcombine.low %v6291_v19, %v6297_v20  ;;  %v2924_v17 = vsel %vm2781_vm7, %v2883_v39, %v6200_v23  ;;  %v1072_v45 = vsel %vm4668_vm5, %v6987_v56, %v1071_v15  ;;  %v2587_v43 = vpop.permute.xlu0 %2586  ;;  %4318 = vmatmul.mubr.msk.bf16.gmra.mrb[24].mxu1 %vm2732_vm6, %v4124_v10 }
 0x13d   : > { %v2022_v18 = vrot.slane %v6986_v30, 4  ;;  %v1077_v24 = vrot.slane %v1076_v32, 4  ;;  %v6988_v42 = vrot.slane %v5803_v16, 5  ;;  %v2962_v21 = vsel %vm2814_vm8, %v2924_v17, %v2665_v3  ;;  %v6992_v32 = vld [vmem:[#allocation42_spill] sm:$0xff]  ;;  %v2363_v17 = vpop.permute.xlu1 %2362  ;;  %4321 = vmatprep.mubr.msk.bf16.mxu1 %vm2732_vm6, %v4125_v48  ;;  %v7007_v48 = vld [vmem:[#allocation11_spill] sm:$0xff] }
 0x13e   : > { %v6989_v47 = vmov %v6986_v30  ;;  %v6990_v15 = vrot.slane %v5903_v22, 5  ;;  %v1127_v38 = vshll.u32 %v6991_v58, 16  ;;  %3270 = vmatprep.mubr.bf16.mxu0 %v2962_v21  ;;  %v2834_v3 = vsel %vm2814_vm8, %v2795_v60, %v6226_v36  ;;  %v6994_v36 = vld [vmem:[#allocation41_spill] sm:$0xff]  ;;  %v6999_v21 = vld [vmem:[#allocation36_spill] sm:$0xff] }
 0x13f   : > { %v6330_v54 = vsel %vm4572_vm2, %v2015_v0, %v6988_v42  ;;  %v6339_v23 = vsel %vm4572_vm2, %v3985_v50, %v6989_v47  ;;  %v1082_v51 = vsel %vm4668_vm5, %v1077_v24, %v1081_v40  ;;  %v2756_v22 = vsel %vm2732_vm6, %v3998_v26, %v2187_v59  ;;  %3271 = vmatmul.mubr.bf16.gmra.mrb[24].mxu0 %v2834_v3  ;;  %v6995_v0 = vld [vmem:[#allocation8_spill] sm:$0xff]  ;;  %v6997_v50 = vld [vmem:[#allocation6_spill] sm:$0xff]  ;;  %v3972_v26 = vld [vmem:[%s4536_s24 + $0xb4] sm:$0xe] }
 0x140   : > { %v4128_v61 = vcombine.low %v6303_v57, %v6330_v54  ;;  %v6345_v16 = vsel %vm4572_vm2, %v2022_v18, %v6990_v15  ;;  %v4062_v52 = vcombine.low %v1072_v45, %v1082_v51  ;;  %v1093_v29 = vshll.u32 %v4470_v12, 16  ;;  %v7003_v51 = vld [vmem:[#allocation10_spill] sm:$0xff] }
 0x141   : > { %v4129_v53 = vcombine.low %v6339_v23, %v6345_v16  ;;  %v1097_v37 = vshrl.u32 %v4470_v12, 16  ;;  %v6993_v44 = vor.u32 %v5853_v1, %v6992_v32  ;;  %v1151_v60 = vshll.u32 %v6994_v36, 16  ;;  %v3974_v12 = vld [vmem:[%s4536_s24 + $0xcc] sm:$0xe] }
 0x142   : > { %v3987_v40 = vrot.slane %v3971_v2, 9  ;;  %v6996_v39 = vrot.slane %v6995_v0, 5  ;;  %v6998_v30 = vor.u32 %v6022_v4, %v6020_v7  ;;  %v1162_v1 = vor.u32 %v6167_v11, %v6040_v9  ;;  %v7001_v2 = vld [vmem:[#allocation4_spill] sm:$0xff]  ;;  %v3973_v4 = vld [vmem:[%s4536_s24 + $0xc0] sm:$0xe] }
 0x143   : > { %v6360_v49 = vrot.slane %v6993_v44, 4  ;;  %v1095_v56 = vrot.slane %v1093_v29, 5  ;;  %v1099_v45 = vrot.slane %v1097_v37, 4  ;;  %v2886_v24 = vsel %vm2732_vm6, %v4062_v52, %v2491_v34  ;;  %v7005_v29 = vld [vmem:[#allocation43_spill] sm:$0xff] }
 0x144   : > { %v6368_v59 = vsel %vm4572_vm2, %v6997_v50, %v6996_v39  ;;  %v6374_v18 = vrot.slane %v6998_v30, 4  ;;  %v2797_v42 = vsel %vm2781_vm7, %v2756_v22, %v2267_v62  ;;  %v7000_v47 = vshll.u32 %v6999_v21, 16  ;;  %v7009_v50 = vld [vmem:[#allocation14_spill] sm:$0xff]  ;;  %v2667_v21 = vpop.permute.xlu0 %2666  ;;  %4322 = vmatmul.mubr.msk.bf16.gmra.mrb[28].mxu1 %vm2732_vm6, %v4126_v13 }
 0x145   : > { %v7002_v58 = vrot.slane %v7001_v2, 5  ;;  %v2926_v9 = vsel %vm2781_vm7, %v2886_v24, %v2587_v43  ;;  %v1100_v11 = vor.u32 %v1099_v45, %v1095_v56  ;;  %v3988_v62 = vrot.slane %v3972_v26, 9  ;;  %4325 = vmatprep.mubr.msk.bf16.mxu1 %vm2732_vm6, %v4127_v55 }
 0x146   : > { %v1105_v15 = vrot.slane %v7000_v47, 5  ;;  %v2837_v3 = vsel %vm2814_vm8, %v2797_v42, %v2363_v17  ;;  %v7004_v22 = vrot.slane %v7003_v51, 5  ;;  %v1117_v28 = vshll.u32 %v4471_v6, 16 }
 0x147   : > { %v6386_v7 = vsel %vm4572_vm2, %v3987_v40, %v7002_v58  ;;  %v1121_v10 = vshrl.u32 %v4471_v6, 16  ;;  %v1096_v37 = vsel %vm4668_vm5, %v7005_v29, %v1095_v56  ;;  %v1101_v32 = vrot.slane %v1100_v11, 4 }
 0x148   : > { %v4131_v34 = vcombine.low %v6386_v7, %v6368_v59  ;;  %v2043_v52 = vrot.slane %v7004_v22, 4  ;;  %v7006_v44 = vmov %v7004_v22  ;;  %v3989_v63 = vrot.slane %v3973_v4, 9  ;;  %v7012_v4 = vld [vmem:[#allocation15_spill] sm:$0xff]  ;;  %v7014_v22 = vld [vmem:[#allocation21_spill] sm:$0xff]  ;;  %v2493_v55 = vpop.permute.xlu0 %2492  ;;  %v4474_v7 = vld [vmem:[%s4536_s24 + $0x6c] sm:$0xf] }
 0x149   : > { %v6412_v8 = vsel %vm4572_vm2, %v3988_v62, %v7006_v44  ;;  %v7008_v43 = vrot.slane %v7007_v48, 5  ;;  %v1119_v0 = vrot.slane %v1117_v28, 5  ;;  %v1123_v39 = vrot.slane %v1121_v10, 4 }
 0x14a   : > { %v7010_v26 = vrot.slane %v7009_v50, 5  ;;  %v1106_v17 = vsel %vm4668_vm5, %v1101_v32, %v1105_v15  ;;  %v3990_v42 = vrot.slane %v3974_v12, 9  ;;  %v1129_v58 = vrot.slane %v1127_v38, 5 }
 0x14b   : > { %v6418_v40 = vsel %vm4572_vm2, %v2043_v52, %v7008_v43  ;;  %v4063_v47 = vcombine.low %v1096_v37, %v1106_v17  ;;  %v1124_v2 = vor.u32 %v1123_v39, %v1119_v0  ;;  %v7013_v11 = vrot.slane %v7012_v4, 5 }
 0x14c   : > { %v2050_v30 = vrot.slane %v7010_v26, 4  ;;  %v4132_v56 = vcombine.low %v6412_v8, %v6418_v40  ;;  %v7011_v45 = vmov %v7010_v26  ;;  %v2965_v15 = vsel %vm2814_vm8, %v2926_v9, %v2667_v21  ;;  %v7017_v9 = vld [vmem:[#allocation40_spill] sm:$0xff]  ;;  %v2189_v26 = vpop.permute.xlu1 %2188  ;;  %4326 = vmatmul.mubr.msk.bf16.gmra.mrb[32].mxu1 %vm2732_vm6, %v4128_v61  ;;  %v2589_v57 = vpop.permute.xlu0 %2588 }
 0x14d   : > { %v6430_v24 = vsel %vm4572_vm2, %v3989_v63, %v7011_v45  ;;  %v7015_v52 = vrot.slane %v7014_v22, 5  ;;  %3278 = vmatprep.mubr.bf16.mxu0 %v2965_v15  ;;  %v1120_v10 = vsel %vm4668_vm5, %v6360_v49, %v1119_v0  ;;  %v1125_v12 = vrot.slane %v1124_v2, 4  ;;  %v7018_v63 = vld [vmem:[#allocation22_spill] sm:$0xff]  ;;  %4329 = vmatprep.mubr.msk.bf16.mxu1 %vm2732_vm6, %v4129_v53  ;;  %v4473_v22 = vld [vmem:[%s4536_s24 + $0x64] sm:$0xf] }
 0x14e   : > { %v6436_v62 = vsel %vm4572_vm2, %v2050_v30, %v7013_v11  ;;  %v1141_v29 = vshll.u32 %v7017_v9, 16  ;;  %v1145_v37 = vshrl.u32 %v7017_v9, 16  ;;  %v2027_v32 = vrot.slane %v5982_v33, 5  ;;  %3279 = vmatmul.mubr.bf16.gmra.mrb[28].mxu0 %v2837_v3  ;;  %v3970_v3 = vld [vmem:[%s4536_s24 + $0x9c] sm:$0xe] }
 0x14f   : > { %v4133_v51 = vcombine.low %v6430_v24, %v6436_v62  ;;  %v6445_v6 = vsel %vm4572_vm2, %v3990_v42, %v7015_v52  ;;  %v7016_v28 = vmov %v7015_v52  ;;  %v1163_v44 = vrot.slane %v1162_v1, 4  ;;  %v4472_v15 = vld [vmem:[%s4536_s24 + $0x60] sm:$0xf] }
 0x150   : > { %v2057_v38 = vrot.slane %v7016_v28, 4  ;;  %v7019_v48 = vrot.slane %v7018_v63, 5  ;;  %v1165_v43 = vshll.u32 %v5953_v31, 16  ;;  %v1130_v33 = vsel %vm4668_vm5, %v1125_v12, %v1129_v58  ;;  %v2269_v11 = vpop.permute.xlu1 %2268 }
 0x151   : > { %v1143_v5 = vrot.slane %v1141_v29, 5  ;;  %v1147_v13 = vrot.slane %v1145_v37, 4  ;;  %v1175_v1 = vshll.u32 %v5960_v35, 16  ;;  %v4064_v0 = vcombine.low %v1120_v10, %v1130_v33 }
 0x152   : > { %v2059_v49 = vsel %vm4572_vm2, %v2057_v38, %v7019_v48  ;;  %v1167_v39 = vrot.slane %v1165_v43, 5  ;;  %v1169_v50 = vshrl.u32 %v5953_v31, 16  ;;  %v1153_v19 = vrot.slane %v1151_v60, 5  ;;  %v4477_v43 = vld [vmem:[%s4536_s24 + $0x7c] sm:$0xf] }
 0x153   : > { %v4134_v14 = vcombine.low %v6445_v6, %v2059_v49  ;;  %v1148_v30 = vor.u32 %v1147_v13, %v1143_v5  ;;  %v2030_v20 = vrot.slane %v6014_v27, 5  ;;  %v3986_v35 = vrot.slane %v3970_v3, 9  ;;  %v4476_v49 = vld [vmem:[%s4536_s24 + $0x78] sm:$0xf] }
 0x154   : > { %v1168_v17 = vsel %vm4668_vm5, %v1163_v44, %v1167_v39  ;;  %v1171_v45 = vrot.slane %v1169_v50, 4  ;;  %v2029_v42 = vrot.slane %v2027_v32, 4  ;;  %v1144_v31 = vsel %vm4668_vm5, %v6374_v18, %v1143_v5  ;;  %v2365_v53 = vpop.permute.xlu1 %2364 }
 0x155   : > { %v1149_v21 = vrot.slane %v1148_v30, 4  ;;  %v1177_v58 = vrot.slane %v1175_v1, 5  ;;  %v2028_v18 = vsel %vm4572_vm2, %v3986_v35, %v2027_v32  ;;  %v3999_v52 = vcombine.low %v4472_v15, %v4473_v22 }
 0x156   : > { %v1172_v2 = vor.u32 %v1171_v45, %v1167_v39  ;;  %v2031_v4 = vsel %vm4572_vm2, %v2029_v42, %v2030_v20  ;;  %v2889_v16 = vsel %vm2732_vm6, %v4063_v47, %v2493_v55  ;;  %v2669_v28 = vpop.permute.xlu0 %2668  ;;  %v4001_v33 = vcombine.low %v4476_v49, %v4477_v43  ;;  %v7020_v55 = vld [vmem:[#allocation44_spill] sm:$0xff] }
 0x157   : > { %v1154_v36 = vsel %vm4668_vm5, %v1149_v21, %v1153_v19  ;;  %v4130_v6 = vcombine.low %v2028_v18, %v2031_v4  ;;  %v2759_v23 = vsel %vm2732_vm6, %v3999_v52, %v2189_v26  ;;  %v2928_v25 = vsel %vm2781_vm7, %v2889_v16, %v2589_v57 }
 0x158   : > { %v4065_v27 = vcombine.low %v1144_v31, %v1154_v36  ;;  %v1173_v60 = vrot.slane %v1172_v2, 4  ;;  %v2799_v38 = vsel %vm2781_vm7, %v2759_v23, %v2269_v11  ;;  %v2968_v46 = vsel %vm2814_vm8, %v2928_v25, %v2669_v28 }
 0x159   : > { %4330 = vmatmul.mubr.msk.bf16.gmra.mrb[36].mxu1 %vm2732_vm6, %v4130_v6  ;;  %3286 = vmatprep.mubr.bf16.mxu0 %v2968_v46  ;;  %v2840_v47 = vsel %vm2814_vm8, %v2799_v38, %v2365_v53 }
 0x15a   : > { %v1178_v54 = vsel %vm4668_vm5, %v1173_v60, %v1177_v58  ;;  %4333 = vmatprep.mubr.msk.bf16.mxu1 %vm2732_vm6, %v4131_v34  ;;  %3287 = vmatmul.mubr.bf16.gmra.mrb[32].mxu0 %v2840_v47  ;;  %v4475_v34 = vld [vmem:[%s4536_s24 + $0x70] sm:$0xf] }
 0x15b   : > { %v4066_v61 = vcombine.low %v1168_v17, %v1178_v54  ;;  %v2191_v10 = vpop.permute.xlu1 %2190  ;;  %v2495_v12 = vpop.permute.xlu0 %2494  ;;  %v4000_v9 = vcombine.low %v4474_v7, %v4475_v34  ;;  %v4002_v17 = vcombine.low %v7020_v55, %v5929_v41 }
 0x15c   : > { %v2892_v8 = vsel %vm2732_vm6, %v4064_v0, %v2495_v12 }
 0x15d   : > { %v2762_v37 = vsel %vm2732_vm6, %v4000_v9, %v2191_v10 }
 0x15f   : > { %v2271_v59 = vpop.permute.xlu1 %2270  ;;  %v2591_v29 = vpop.permute.xlu0 %2590 }
 0x160   : > { %v2801_v24 = vsel %vm2781_vm7, %v2762_v37, %v2271_v59 }
 0x161   : > { %4334 = vmatmul.mubr.msk.bf16.gmra.mrb[40].mxu1 %vm2732_vm6, %v4132_v56  ;;  %v2930_v56 = vsel %vm2781_vm7, %v2892_v8, %v2591_v29 }
 0x162   : > { %4337 = vmatprep.mubr.msk.bf16.mxu1 %vm2732_vm6, %v4133_v51 }
 0x163   : > { %v2367_v40 = vpop.permute.xlu1 %2366 }
 0x164   : > { %v2843_v51 = vsel %vm2814_vm8, %v2801_v24, %v2367_v40 }
 0x169   : > { %4338 = vmatmul.mubr.msk.bf16.gmra.mrb[44].mxu1 %vm2732_vm6, %v4134_v14  ;;  %v2671_v32 = vpop.permute.xlu0 %2670 }
 0x16a   : > { %v2971_v62 = vsel %vm2814_vm8, %v2930_v56, %v2671_v32 }
 0x16b   : > { %3294 = vmatprep.mubr.bf16.mxu0 %v2971_v62 }
 0x16c   : > { %3295 = vmatmul.mubr.bf16.gmra.mrb[36].mxu0 %v2843_v51 }
 0x16e   : > { %v2193_v44 = vpop.permute.xlu1 %2192  ;;  %v2497_v63 = vpop.permute.xlu0 %2496 }
 0x16f   : > { %v2765_v5 = vsel %vm2732_vm6, %v4001_v33, %v2193_v44  ;;  %v2895_v13 = vsel %vm2732_vm6, %v4065_v27, %v2497_v63 }
 0x172   : > { %v2273_v48 = vpop.permute.xlu1 %2272  ;;  %v2593_v14 = vpop.permute.xlu0 %2592 }
 0x173   : > { %v2932_v3 = vsel %vm2781_vm7, %v2895_v13, %v2593_v14  ;;  %v2803_v39 = vsel %vm2781_vm7, %v2765_v5, %v2273_v48 }
 0x176   : > { %v2369_v1 = vpop.permute.xlu1 %2368 }
 0x177   : > { %v2846_v26 = vsel %vm2814_vm8, %v2803_v39, %v2369_v1 }
 0x17a   : > { %v2673_v0 = vpop.permute.xlu0 %2672 }
 0x17b   : > { %v2974_v50 = vsel %vm2814_vm8, %v2932_v3, %v2673_v0 }
 0x17c   : > { %3302 = vmatprep.mubr.bf16.mxu0 %v2974_v50 }
 0x17d   : > { %3303 = vmatmul.mubr.bf16.gmra.mrb[40].mxu0 %v2846_v26 }
 0x17f   : > { %v2499_v19 = vpop.permute.xlu0 %2498 }
 0x180   : > { %v2195_v30 = vpop.permute.xlu1 %2194  ;;  %v2898_v42 = vsel %vm2732_vm6, %v4066_v61, %v2499_v19 }
 0x181   : > { %v2768_v35 = vsel %vm2732_vm6, %v4002_v17, %v2195_v30  ;;  %v6565_v30 = vld [vmem:[%s6816_s2] ss:$0 sm:$0xff] }
 0x183   : > { %v2595_v45 = vpop.permute.xlu0 %2594 }
 0x184   : > { %v2275_v20 = vpop.permute.xlu1 %2274  ;;  %v2934_v21 = vsel %vm2781_vm7, %v2898_v42, %v2595_v45 }
 0x185   : > { %v2805_v58 = vsel %vm2781_vm7, %v2768_v35, %v2275_v20 }
 0x188   : > { %v2371_v31 = vpop.permute.xlu1 %2370 }
 0x189   : > { %v2849_v27 = vsel %vm2814_vm8, %v2805_v58, %v2371_v31 }
 0x18e   : > { %v2675_v2 = vpop.permute.xlu0 %2674 }
 0x18f   : > { %v2977_v36 = vsel %vm2814_vm8, %v2934_v21, %v2675_v2 }
 0x190   : > { %3310 = vmatprep.mubr.bf16.mxu0 %v2977_v36  ;;  %v6577_v36 = vld [vmem:[%s6817_s3] ss:$0 sm:$0xff] }
 0x191   : > { %3311 = vmatmul.mubr.bf16.gmra.mrb[44].mxu0 %v2849_v27 }
 0x193   : > { %v4191_v60 = vpop.f32.mrb[0].mxu0 }
 0x194   : > { %v4192_v18 = vpop.f32.mrb[1].mxu0 }
 0x195   : > { %v4193_v41 = vadd.f32 %v4192_v18, %v4191_v60  ;;  %v4194_v4 = vpop.f32.mrb[2].mxu0 }
 0x196   : > { %v4195_v11 = vpop.f32.mrb[3].mxu0 }
 0x197   : > { %v4196_v15 = vadd.f32 %v4195_v11, %v4194_v4  ;;  %v3225_v42 = vadd.f32 %v4193_v41, %v6565_v30 }
 0x199   : > { %v4263_v22 = vpop.f32.mrb[0].mxu1  ;;  %v3228_v60 = vadd.f32 %v4196_v15, %v6565_v30 }
 0x19a   : > { %v4264_v52 = vpop.f32.mrb[1].mxu1 }
 0x19b   : > { %v6544_v57 = vadd.f32 %v4264_v52, %v4263_v22  ;;  %v4266_v54 = vpop.f32.mrb[2].mxu1 }
 0x19c   : > { %v4267_v61 = vpop.f32.mrb[3].mxu1 }
 0x19d   : > { %v6546_v6 = vadd.f32 %v4267_v61, %v4266_v54 }
 0x1ab   : > { %v4197_v23 = vpop.f32.mrb[4].mxu0 }
 0x1ac   : > { %v4198_v16 = vpop.f32.mrb[5].mxu0 }
 0x1ad   : > { %v4199_v53 = vadd.f32 %v4198_v16, %v4197_v23  ;;  %v4200_v25 = vpop.f32.mrb[6].mxu0 }
 0x1ae   : > { %v4201_v28 = vpop.f32.mrb[7].mxu0 }
 0x1af   : > { %v4202_v38 = vadd.f32 %v4201_v28, %v4200_v25  ;;  %v3233_v17 = vadd.f32 %v4199_v53, %v6565_v30 }
 0x1b1   : > { %v3236_v2 = vadd.f32 %v4202_v38, %v6565_v30 }
 0x1be   : > { %v4269_v46 = vpop.f32.mrb[4].mxu1 }
 0x1bf   : > { %v4270_v47 = vpop.f32.mrb[5].mxu1 }
 0x1c0   : > { %v6548_v10 = vadd.f32 %v4270_v47, %v4269_v46  ;;  %v4272_v12 = vpop.f32.mrb[6].mxu1 }
 0x1c1   : > { %v4273_v59 = vpop.f32.mrb[7].mxu1 }
 0x1c2   : > { %v6550_v7 = vadd.f32 %v4273_v59, %v4272_v12 }
 0x1d1   : > { %v4203_v34 = vpop.f32.mrb[8].mxu0 }
 0x1d2   : > { %v4204_v9 = vpop.f32.mrb[9].mxu0 }
 0x1d3   : > { %v4205_v29 = vadd.f32 %v4204_v9, %v4203_v34  ;;  %v4206_v37 = vpop.f32.mrb[10].mxu0 }
 0x1d4   : > { %v4207_v8 = vpop.f32.mrb[11].mxu0 }
 0x1d5   : > { %v6552_v40 = vadd.f32 %v4207_v8, %v4206_v37  ;;  %v3241_v59 = vadd.f32 %v4205_v29, %v6565_v30 }
 0x1e2   : > { %v4275_v56 = vpop.f32.mrb[8].mxu1 }
 0x1e3   : > { %v4276_v32 = vpop.f32.mrb[9].mxu1 }
 0x1e4   : > { %v6554_v24 = vadd.f32 %v4276_v32, %v4275_v56  ;;  %v4278_v62 = vpop.f32.mrb[10].mxu1 }
 0x1e5   : > { %v4279_v51 = vpop.f32.mrb[11].mxu1 }
 0x1e6   : > { %v6556_v44 = vadd.f32 %v4279_v51, %v4278_v62  ;;  %v3244_v51 = vadd.f32 %v6552_v40, %v6565_v30 }
 0x1f0   : > { %v4209_v63 = vpop.f32.mrb[12].mxu0 }
 0x1f1   : > { %v4210_v48 = vpop.f32.mrb[13].mxu0 }
 0x1f2   : > { %v4211_v49 = vadd.f32 %v4210_v48, %v4209_v63  ;;  %v4212_v43 = vpop.f32.mrb[14].mxu0 }
 0x1f3   : > { %v4213_v33 = vpop.f32.mrb[15].mxu0 }
 0x1f4   : > { %v4214_v14 = vadd.f32 %v4213_v33, %v4212_v43  ;;  %v3249_v15 = vadd.f32 %v4211_v49, %v6565_v30 }
 0x1f6   : > { %v3252_v8 = vadd.f32 %v4214_v14, %v6565_v30 }
 0x1f7   : > { %v4281_v5 = vpop.f32.mrb[12].mxu1 }
 0x1f8   : > { %v4282_v13 = vpop.f32.mrb[13].mxu1 }
 0x1f9   : > { %v6558_v1 = vadd.f32 %v4282_v13, %v4281_v5  ;;  %v4284_v3 = vpop.f32.mrb[14].mxu1 }
 0x1fa   : > { %v4285_v0 = vpop.f32.mrb[15].mxu1 }
 0x1fb   : > { %v6560_v50 = vadd.f32 %v4285_v0, %v4284_v3 }
 0x1fc   : > { %v4215_v39 = vpop.f32.mrb[16].mxu0 }
 0x1fd   : > { %v4216_v26 = vpop.f32.mrb[17].mxu0 }
 0x1fe   : > { %v6567_v19 = vadd.f32 %v4216_v26, %v4215_v39  ;;  %v4218_v20 = vpop.f32.mrb[18].mxu0 }
 0x1ff   : > { %v4219_v55 = vpop.f32.mrb[19].mxu0  ;;  %v4311_v35 = vpop.f32.mrb[16].mxu1 }
 0x200   : > { %v6570_v45 = vadd.f32 %v4219_v55, %v4218_v20  ;;  %v3394_v31 = vadd.f32 %v4311_v35, %v3233_v17  ;;  %v3385_v21 = vpop.f32.mrb[17].mxu1 }
 0x201   : > { %v3386_v58 = vadd.f32 %v3385_v21, %v3225_v42  ;;  %v4312_v27 = vpop.f32.mrb[18].mxu1 }
 0x202   : > { %v3514_v18 = vmax.f32 %v3394_v31, 0.0  ;;  %v3397_v4 = vadd.f32 %v4312_v27, %v3236_v2  ;;  %v3388_v11 = vpop.f32.mrb[19].mxu1 }
 0x203   : > { %v3512_v52 = vmax.f32 %v3386_v58, 0.0  ;;  %v3389_v54 = vadd.f32 %v3388_v11, %v3228_v60  ;;  %v3257_v58 = vadd.f32 %v6567_v19, %v6565_v30 }
 0x204   : > { %v4221_v22 = vpop.f32.mrb[20].mxu0  ;;  %v3553_v61 = vmul.f32 %v6577_v36, %v3514_v18  ;;  %v3515_v53 = vmax.f32 %v3397_v4, 0.0 }
 0x205   : > { %v4222_v41 = vpop.f32.mrb[21].mxu0  ;;  %v3513_v25 = vmax.f32 %v3389_v54, 0.0  ;;  %v3551_v38 = vmul.f32 %v6577_v36, %v3512_v52  ;;  %v3260_v52 = vadd.f32 %v6570_v45, %v6565_v30 }
 0x206   : > { %v4223_v23 = vadd.f32 %v4222_v41, %v4221_v22  ;;  %v4224_v16 = vpop.f32.mrb[22].mxu0  ;;  %v3590_v46 = vsel %vm3583_vm9, %v3553_v61, 0.0  ;;  %v3554_v56 = vmul.f32 %v6577_v36, %v3515_v53 }
 0x207   : > { %v4225_v28 = vpop.f32.mrb[23].mxu0  ;;  %3591 = vadd.xlane.f32.xlu0 %v3590_v46  ;;  %v4315_v12 = vpop.f32.mrb[20].mxu1  ;;  %v3552_v34 = vmul.f32 %v6577_v36, %v3513_v25  ;;  %v3584_v29 = vsel %vm3583_vm9, %v3551_v38, 0.0 }
 0x208   : > { %v4226_v47 = vadd.f32 %v4225_v28, %v4224_v16  ;;  %v3410_v9 = vadd.f32 %v4315_v12, %v3249_v15  ;;  %v3401_v37 = vpop.f32.mrb[21].mxu1  ;;  %v3265_v0 = vadd.f32 %v4223_v23, %v6565_v30  ;;  %v3593_v40 = vsel %vm3583_vm9, %v3554_v56, 0.0 }
 0x209   : > { %v3402_v32 = vadd.f32 %v3401_v37, %v3241_v59  ;;  %v4316_v62 = vpop.f32.mrb[22].mxu1  ;;  %v3587_v63 = vsel %vm3583_vm9, %v3552_v34, 0.0 }
 0x20a   : > { %v3518_v48 = vmax.f32 %v3410_v9, 0.0  ;;  %v3413_v49 = vadd.f32 %v4316_v62, %v3252_v8  ;;  %v3404_v43 = vpop.f32.mrb[23].mxu1  ;;  %3588 = vadd.xlane.f32.xlu1 %v3587_v63  ;;  %v3268_v31 = vadd.f32 %v4226_v47, %v6565_v30 }
 0x20b   : > { %v3516_v33 = vmax.f32 %v3402_v32, 0.0  ;;  %v3405_v5 = vadd.f32 %v3404_v43, %v3244_v51  ;;  %3585 = vadd.xlane.f32.xlu0 %v3584_v29 }
 0x20c   : > { %v3557_v14 = vmul.f32 %v6577_v36, %v3518_v48  ;;  %v3519_v3 = vmax.f32 %v3413_v49, 0.0 }
 0x20d   : > { %v3517_v26 = vmax.f32 %v3405_v5, 0.0  ;;  %v3555_v17 = vmul.f32 %v6577_v36, %v3516_v33 }
 0x20e   : > { %v3558_v35 = vmul.f32 %v6577_v36, %v3519_v3  ;;  %v3602_v42 = vsel %vm3583_vm9, %v3557_v14, 0.0 }
 0x20f   : > { %v4319_v2 = vpop.f32.mrb[24].mxu1  ;;  %3603 = vadd.xlane.f32.xlu1 %v3602_v42  ;;  %3594 = vadd.xlane.f32.xlu0 %v3593_v40  ;;  %v3556_v4 = vmul.f32 %v6577_v36, %v3517_v26  ;;  %v3596_v23 = vsel %vm3583_vm9, %v3555_v17, 0.0 }
 0x210   : > { %v3426_v60 = vadd.f32 %v4319_v2, %v3265_v0  ;;  %v3417_v18 = vpop.f32.mrb[25].mxu1  ;;  %v3605_v16 = vsel %vm3583_vm9, %v3558_v35, 0.0 }
 0x211   : > { %v3418_v11 = vadd.f32 %v3417_v18, %v3257_v58  ;;  %v4320_v22 = vpop.f32.mrb[26].mxu1  ;;  %v3599_v38 = vsel %vm3583_vm9, %v3556_v4, 0.0 }
 0x212   : > { %v4227_v13 = vpop.f32.mrb[24].mxu0  ;;  %v3522_v54 = vmax.f32 %v3426_v60, 0.0  ;;  %v3429_v41 = vadd.f32 %v4320_v22, %v3268_v31  ;;  %v3420_v61 = vpop.f32.mrb[27].mxu1 }
 0x213   : > { %v4228_v39 = vpop.f32.mrb[25].mxu0  ;;  %v3520_v53 = vmax.f32 %v3418_v11, 0.0  ;;  %v3421_v25 = vadd.f32 %v3420_v61, %v3260_v52  ;;  %3597 = vadd.xlane.f32.xlu1 %v3596_v23  ;;  %3606 = vadd.xlane.f32.xlu0 %v3605_v16 }
 0x214   : > { %v4229_v20 = vadd.f32 %v4228_v39, %v4227_v13  ;;  %v4230_v55 = vpop.f32.mrb[26].mxu0  ;;  %v3523_v19 = vmax.f32 %v3429_v41, 0.0  ;;  %v3561_v28 = vmul.f32 %v6577_v36, %v3522_v54 }
 0x215   : > { %v4231_v21 = vpop.f32.mrb[27].mxu0  ;;  %v3559_v45 = vmul.f32 %v6577_v36, %v3520_v53  ;;  %v3521_v15 = vmax.f32 %v3421_v25, 0.0 }
 0x216   : > { %v4232_v27 = vadd.f32 %v4231_v21, %v4230_v55  ;;  %v3273_v46 = vadd.f32 %v4229_v20, %v6565_v30  ;;  %v3614_v47 = vsel %vm3583_vm9, %v3561_v28, 0.0  ;;  %v3562_v12 = vmul.f32 %v6577_v36, %v3523_v19 }
 0x217   : > { %3600 = vadd.xlane.f32.xlu0 %v3599_v38  ;;  %3615 = vadd.xlane.f32.xlu1 %v3614_v47  ;;  %v4323_v59 = vpop.f32.mrb[28].mxu1  ;;  %v3560_v48 = vmul.f32 %v6577_v36, %v3521_v15  ;;  %v3608_v49 = vsel %vm3583_vm9, %v3559_v45, 0.0  ;;  %v3329_v19 = vadd.f32 %v6548_v10, %v6565_v30  ;;  %v3321_v45 = vadd.f32 %v6544_v57, %v6565_v30 }
 0x218   : > { %v3276_v34 = vadd.f32 %v4232_v27, %v6565_v30  ;;  %v3617_v37 = vsel %vm3583_vm9, %v3562_v12, 0.0  ;;  %v3433_v8 = vpop.f32.mrb[29].mxu1  ;;  %v3332_v12 = vadd.f32 %v6550_v7, %v6565_v30  ;;  %v3324_v10 = vadd.f32 %v6546_v6, %v6565_v30 }
 0x219   : > { %v3434_v32 = vadd.f32 %v3433_v8, %v3273_v46  ;;  %v4324_v62 = vpop.f32.mrb[30].mxu1  ;;  %v3611_v40 = vsel %vm3583_vm9, %v3560_v48, 0.0  ;;  %v3345_v48 = vadd.f32 %v6558_v1, %v6565_v30  ;;  %v3340_v1 = vadd.f32 %v6556_v44, %v6565_v30 }
 0x21a   : > { %v3436_v43 = vpop.f32.mrb[31].mxu1 }
 0x21b   : > { %3618 = vadd.xlane.f32.xlu0 %v3617_v37  ;;  %v3524_v33 = vmax.f32 %v3434_v32, 0.0  ;;  %3609 = vadd.xlane.f32.xlu1 %v3608_v49  ;;  %v3437_v5 = vadd.f32 %v3436_v43, %v3276_v34 }
 0x21d   : > { %v3563_v3 = vmul.f32 %v6577_v36, %v3524_v33  ;;  %v3525_v0 = vmax.f32 %v3437_v5, 0.0  ;;  %v3348_v5 = vadd.f32 %v6560_v50, %v6565_v30 }
 0x21f   : > { %v3564_v20 = vmul.f32 %v6577_v36, %v3525_v0  ;;  %3612 = vadd.xlane.f32.xlu0 %v3611_v40  ;;  %v6621_v55 = vpop.f32.mrb[32].mxu1  ;;  %v3620_v17 = vsel %vm3583_vm9, %v3563_v3, 0.0 }
 0x220   : > { %v3449_v31 = vpop.f32.mrb[33].mxu1  ;;  %3621 = vadd.xlane.f32.xlu1 %v3620_v17 }
 0x221   : > { %v4233_v9 = vpop.f32.mrb[28].mxu0  ;;  %v6624_v21 = vpop.f32.mrb[34].mxu1  ;;  %v3623_v2 = vsel %vm3583_vm9, %v3564_v20, 0.0 }
 0x222   : > { %v4234_v56 = vpop.f32.mrb[29].mxu0  ;;  %v3452_v60 = vpop.f32.mrb[35].mxu1 }
 0x223   : > { %v4235_v51 = vadd.f32 %v4234_v56, %v4233_v9  ;;  %v4236_v63 = vpop.f32.mrb[30].mxu0  ;;  %3624 = vadd.xlane.f32.xlu0 %v3623_v2 }
 0x224   : > { %v4237_v29 = vpop.f32.mrb[31].mxu0 }
 0x225   : > { %v3281_v13 = vadd.f32 %v4235_v51, %v6565_v30  ;;  %v4238_v14 = vadd.f32 %v4237_v29, %v4236_v63  ;;  %v3337_v29 = vadd.f32 %v6554_v24, %v6565_v30 }
 0x227   : > { %v3442_v39 = vadd.f32 %v4323_v59, %v3281_v13  ;;  %v3284_v26 = vadd.f32 %v4238_v14, %v6565_v30 }
 0x229   : > { %v3526_v35 = vmax.f32 %v3442_v39, 0.0  ;;  %v3445_v42 = vadd.f32 %v4324_v62, %v3284_v26 }
 0x22b   : > { %v3527_v58 = vmax.f32 %v3445_v42, 0.0  ;;  %v3565_v27 = vmul.f32 %v6577_v36, %v3526_v35 }
 0x22c   : > { %v6631_v22 = vpop.f32.mrb[36].mxu1 }
 0x22d   : > { %v3626_v18 = vsel %vm3583_vm9, %v3565_v27, 0.0  ;;  %v3566_v4 = vmul.f32 %v6577_v36, %v3527_v58  ;;  %v6633_v52 = vpop.f32.mrb[37].mxu1  ;;  %v4239_v61 = vpop.f32.mrb[32].mxu0 }
 0x22e   : > { %3627 = vadd.xlane.f32.xlu1 %v3626_v18  ;;  %v6635_v54 = vpop.f32.mrb[38].mxu1  ;;  %v4240_v23 = vpop.f32.mrb[33].mxu0 }
 0x22f   : > { %v3629_v11 = vsel %vm3583_vm9, %v3566_v4, 0.0  ;;  %v6637_v41 = vpop.f32.mrb[39].mxu1  ;;  %v4241_v16 = vadd.f32 %v4240_v23, %v4239_v61  ;;  %v4242_v53 = vpop.f32.mrb[34].mxu0 }
 0x230   : > { %3630 = vadd.xlane.f32.xlu0 %v3629_v11  ;;  %v4243_v25 = vpop.f32.mrb[35].mxu0 }
 0x231   : > { %v3289_v28 = vadd.f32 %v4241_v16, %v6565_v30  ;;  %v4244_v38 = vadd.f32 %v4243_v25, %v4242_v53 }
 0x233   : > { %v3450_v59 = vadd.f32 %v3449_v31, %v3289_v28  ;;  %v3292_v34 = vadd.f32 %v4244_v38, %v6565_v30 }
 0x234   : > { %v4335_v46 = vpop.f32.mrb[40].mxu1 }
 0x235   : > { %v3490_v15 = vadd.f32 %v4335_v46, %v3329_v19  ;;  %v3481_v47 = vpop.f32.mrb[41].mxu1  ;;  %v3528_v32 = vmax.f32 %v3450_v59, 0.0  ;;  %v3453_v62 = vadd.f32 %v3452_v60, %v3292_v34 }
 0x236   : > { %v3482_v9 = vadd.f32 %v3481_v47, %v3321_v45  ;;  %v4336_v37 = vpop.f32.mrb[42].mxu1 }
 0x237   : > { %v3493_v8 = vadd.f32 %v4336_v37, %v3332_v12  ;;  %v3484_v56 = vpop.f32.mrb[43].mxu1  ;;  %v3529_v63 = vmax.f32 %v3453_v62, 0.0  ;;  %v3567_v57 = vmul.f32 %v6577_v36, %v3528_v32  ;;  %v3538_v58 = vmax.f32 %v3490_v15, 0.0 }
 0x238   : > { %v3485_v51 = vadd.f32 %v3484_v56, %v3324_v10  ;;  %v3536_v61 = vmax.f32 %v3482_v9, 0.0 }
 0x239   : > { %v3632_v7 = vsel %vm3583_vm9, %v3567_v57, 0.0  ;;  %v3568_v49 = vmul.f32 %v6577_v36, %v3529_v63  ;;  %v3539_v60 = vmax.f32 %v3493_v8, 0.0  ;;  %v3577_v11 = vmul.f32 %v6577_v36, %v3538_v58 }
 0x23a   : > { %3633 = vadd.xlane.f32.xlu1 %v3632_v7  ;;  %v3537_v53 = vmax.f32 %v3485_v51, 0.0 }
 0x23b   : > { %v3635_v13 = vsel %vm3583_vm9, %v3568_v49, 0.0  ;;  %v3662_v19 = vsel %vm3583_vm9, %v3577_v11, 0.0 }
 0x23c   : > { %v4339_v43 = vpop.f32.mrb[44].mxu1  ;;  %3636 = vadd.xlane.f32.xlu0 %v3635_v13  ;;  %v3576_v28 = vmul.f32 %v6577_v36, %v3537_v53 }
 0x23d   : > { %v6656_v6 = vadd.f32 %v4339_v43, %v3345_v48  ;;  %v3497_v33 = vpop.f32.mrb[45].mxu1 }
 0x23e   : > { %v3498_v14 = vadd.f32 %v3497_v33, %v3337_v29  ;;  %v4340_v3 = vpop.f32.mrb[46].mxu1  ;;  %v3659_v34 = vsel %vm3583_vm9, %v3576_v28, 0.0 }
 0x23f   : > { %v6663_v0 = vadd.f32 %v4340_v3, %v3348_v5  ;;  %v3500_v39 = vpop.f32.mrb[47].mxu1  ;;  %v4245_v24 = vpop.f32.mrb[36].mxu0 }
 0x240   : > { %v3501_v26 = vadd.f32 %v3500_v39, %v3340_v1  ;;  %v4246_v40 = vpop.f32.mrb[37].mxu0  ;;  %v3540_v56 = vmax.f32 %v3498_v14, 0.0 }
 0x241   : > { %v4247_v20 = vadd.f32 %v4246_v40, %v4245_v24  ;;  %v4248_v17 = vpop.f32.mrb[38].mxu0  ;;  %v3542_v40 = vmax.f32 %v6656_v6, 0.0 }
 0x242   : > { %v4249_v35 = vpop.f32.mrb[39].mxu0  ;;  %v3541_v51 = vmax.f32 %v3501_v26, 0.0  ;;  %v3579_v48 = vmul.f32 %v6577_v36, %v3540_v56 }
 0x243   : > { %v3297_v42 = vadd.f32 %v4247_v20, %v6565_v30  ;;  %v4250_v50 = vadd.f32 %v4249_v35, %v4248_v17  ;;  %v3543_v35 = vmax.f32 %v6663_v0, 0.0  ;;  %v6708_v0 = vld [vmem:[#allocation2] ss:$0 sm:$0xff] }
 0x244   : > { %v3580_v43 = vmul.f32 %v6577_v36, %v3541_v51  ;;  %v3668_v29 = vsel %vm3583_vm9, %v3579_v48, 0.0 }
 0x245   : > { %v3458_v31 = vadd.f32 %v6621_v55, %v3297_v42  ;;  %v3300_v2 = vadd.f32 %v4250_v50, %v6565_v30  ;;  %v3578_v55 = vmul.f32 %v6577_v36, %v3539_v60 }
 0x247   : > { %v3530_v27 = vmax.f32 %v3458_v31, 0.0  ;;  %v3461_v44 = vadd.f32 %v6624_v21, %v3300_v2  ;;  %v3575_v21 = vmul.f32 %v6577_v36, %v3536_v61  ;;  %v3665_v38 = vsel %vm3583_vm9, %v3578_v55, 0.0 }
 0x248   : > { %v3581_v31 = vmul.f32 %v6577_v36, %v3542_v40 }
 0x249   : > { %v3531_v18 = vmax.f32 %v3461_v44, 0.0  ;;  %v3569_v4 = vmul.f32 %v6577_v36, %v3530_v27  ;;  %v3656_v15 = vsel %vm3583_vm9, %v3575_v21, 0.0 }
 0x24a   : > { %v3674_v6 = vsel %vm3583_vm9, %v3581_v31, 0.0 }
 0x24b   : > { %v3638_v23 = vsel %vm3583_vm9, %v3569_v4, 0.0  ;;  %v3570_v16 = vmul.f32 %v6577_v36, %v3531_v18 }
 0x24c   : > { %3639 = vadd.xlane.f32.xlu1 %v3638_v23 }
 0x24d   : > { %v3641_v25 = vsel %vm3583_vm9, %v3570_v16, 0.0 }
 0x24e   : > { %3642 = vadd.xlane.f32.xlu0 %v3641_v25 }
 0x250   : > { %3663 = vadd.xlane.f32.xlu1 %v3662_v19  ;;  %v4251_v46 = vpop.f32.mrb[40].mxu0 }
 0x251   : > { %v4252_v45 = vpop.f32.mrb[41].mxu0 }
 0x252   : > { %3666 = vadd.xlane.f32.xlu0 %v3665_v38  ;;  %v4253_v47 = vadd.f32 %v4252_v45, %v4251_v46  ;;  %v4254_v12 = vpop.f32.mrb[42].mxu0 }
 0x253   : > { %v4255_v59 = vpop.f32.mrb[43].mxu0 }
 0x254   : > { %3657 = vadd.xlane.f32.xlu1 %v3656_v15  ;;  %v3305_v9 = vadd.f32 %v4253_v47, %v6565_v30  ;;  %v4256_v37 = vadd.f32 %v4255_v59, %v4254_v12 }
 0x256   : > { %3660 = vadd.xlane.f32.xlu0 %v3659_v34  ;;  %v3466_v10 = vadd.f32 %v6633_v52, %v3305_v9  ;;  %v3308_v8 = vadd.f32 %v4256_v37, %v6565_v30 }
 0x258   : > { %v3532_v32 = vmax.f32 %v3466_v10, 0.0  ;;  %v3469_v62 = vadd.f32 %v6637_v41, %v3308_v8  ;;  %v3671_v41 = vsel %vm3583_vm9, %v3580_v43, 0.0 }
 0x25a   : > { %v3533_v63 = vmax.f32 %v3469_v62, 0.0  ;;  %v3571_v57 = vmul.f32 %v6577_v36, %v3532_v32 }
 0x25c   : > { %v3644_v7 = vsel %vm3583_vm9, %v3571_v57, 0.0  ;;  %v3572_v49 = vmul.f32 %v6577_v36, %v3533_v63 }
 0x25d   : > { %3645 = vadd.xlane.f32.xlu1 %v3644_v7 }
 0x25e   : > { %v3647_v52 = vsel %vm3583_vm9, %v3572_v49, 0.0 }
 0x25f   : > { %3648 = vadd.xlane.f32.xlu0 %v3647_v52 }
 0x261   : > { %3669 = vadd.xlane.f32.xlu1 %v3668_v29 }
 0x263   : > { %3672 = vadd.xlane.f32.xlu0 %v3671_v41 }
 0x264   : > { %v4257_v33 = vpop.f32.mrb[44].mxu0 }
 0x265   : > { %v4258_v5 = vpop.f32.mrb[45].mxu0 }
 0x266   : > { %v4259_v13 = vadd.f32 %v4258_v5, %v4257_v33  ;;  %v4260_v14 = vpop.f32.mrb[46].mxu0 }
 0x267   : > { %v4261_v3 = vpop.f32.mrb[47].mxu0 }
 0x268   : > { %v3313_v1 = vadd.f32 %v4259_v13, %v6565_v30  ;;  %v4262_v39 = vadd.f32 %v4261_v3, %v4260_v14 }
 0x26a   : > { %v3474_v26 = vadd.f32 %v6631_v22, %v3313_v1  ;;  %v3316_v24 = vadd.f32 %v4262_v39, %v6565_v30  ;;  %v3582_v30 = vmul.f32 %v6577_v36, %v3543_v35 }
 0x26c   : > { %v3534_v20 = vmax.f32 %v3474_v26, 0.0  ;;  %v3477_v17 = vadd.f32 %v6635_v54, %v3316_v24  ;;  %v3677_v54 = vsel %vm3583_vm9, %v3582_v30, 0.0 }
 0x26e   : > { %v3535_v42 = vmax.f32 %v3477_v17, 0.0  ;;  %v3573_v50 = vmul.f32 %v6577_v36, %v3534_v20 }
 0x270   : > { %v3650_v2 = vsel %vm3583_vm9, %v3573_v50, 0.0  ;;  %v3574_v58 = vmul.f32 %v6577_v36, %v3535_v42 }
 0x271   : > { %3651 = vadd.xlane.f32.xlu1 %v3650_v2 }
 0x272   : > { %v3653_v22 = vsel %vm3583_vm9, %v3574_v58, 0.0 }
 0x273   : > { %3654 = vadd.xlane.f32.xlu0 %v3653_v22 }
 0x275   : > { %3675 = vadd.xlane.f32.xlu1 %v3674_v6 }
 0x277   : > { %3678 = vadd.xlane.f32.xlu0 %v3677_v54 }
 0x294   : > { %v3592_v36 = vpop.xlane.xlu0 %3591 }
 0x295   : > { %v3689_v27 = vadd.f32 %v6708_v0, %v3592_v36 }
 0x297   : > { %3722 = vst.msk [vmem:[%s6713_s23 + $0x10] sm:$0xff] %vm3719_vm10, %v3689_v27  ;;  %v3589_v44 = vpop.xlane.xlu1 %3588 }
 0x298   : > { %v3688_v60 = vadd.f32 %v6708_v0, %v3589_v44  ;;  %v3586_v18 = vpop.xlane.xlu0 %3585 }
 0x299   : > { %v3687_v4 = vadd.f32 %v6708_v0, %v3586_v18 }
 0x29a   : > { %3721 = vst.msk [vmem:[%s6713_s23 + $0x8] sm:$0xff] %vm3719_vm10, %v3688_v60 }
 0x29b   : > { %3720 = vst.msk [vmem:[%s6713_s23] sm:$0xff] %vm3719_vm10, %v3687_v4 }
 0x29c   : > { %v3604_v11 = vpop.xlane.xlu1 %3603  ;;  %v3595_v61 = vpop.xlane.xlu0 %3594 }
 0x29d   : > { %v3693_v23 = vadd.f32 %v6708_v0, %v3604_v11  ;;  %v3690_v16 = vadd.f32 %v6708_v0, %v3595_v61 }
 0x29f   : > { %3726 = vst.msk [vmem:[%s6713_s23 + $0x30] sm:$0xff] %vm3719_vm10, %v3693_v23  ;;  %3723 = vst.msk [vmem:[%s6713_s23 + $0x18] sm:$0xff] %vm3719_vm10, %v3690_v16 }
 0x2a0   : > { %v3598_v55 = vpop.xlane.xlu1 %3597  ;;  %v3607_v53 = vpop.xlane.xlu0 %3606 }
 0x2a1   : > { %v3691_v25 = vadd.f32 %v6708_v0, %v3598_v55  ;;  %v3694_v21 = vadd.f32 %v6708_v0, %v3607_v53 }
 0x2a3   : > { %3724 = vst.msk [vmem:[%s6713_s23 + $0x20] sm:$0xff] %vm3719_vm10, %v3691_v25  ;;  %3727 = vst.msk [vmem:[%s6713_s23 + $0x38] sm:$0xff] %vm3719_vm10, %v3694_v21 }
 0x2a4   : > { %v3601_v19 = vpop.xlane.xlu0 %3600  ;;  %v3616_v28 = vpop.xlane.xlu1 %3615 }
 0x2a5   : > { %v3692_v38 = vadd.f32 %v6708_v0, %v3601_v19  ;;  %v3697_v46 = vadd.f32 %v6708_v0, %v3616_v28 }
 0x2a7   : > { %3725 = vst.msk [vmem:[%s6713_s23 + $0x28] sm:$0xff] %vm3719_vm10, %v3692_v38  ;;  %3730 = vst.msk [vmem:[%s6713_s23 + $0x50] sm:$0xff] %vm3719_vm10, %v3697_v46 }
 0x2a8   : > { %v3619_v45 = vpop.xlane.xlu0 %3618  ;;  %v3610_v15 = vpop.xlane.xlu1 %3609 }
 0x2a9   : > { %v3698_v47 = vadd.f32 %v6708_v0, %v3619_v45  ;;  %v3695_v12 = vadd.f32 %v6708_v0, %v3610_v15 }
 0x2ab   : > { %3731 = vst.msk [vmem:[%s6713_s23 + $0x58] sm:$0xff] %vm3719_vm10, %v3698_v47  ;;  %3728 = vst.msk [vmem:[%s6713_s23 + $0x40] sm:$0xff] %vm3719_vm10, %v3695_v12 }
 0x2ac   : > { %v3613_v59 = vpop.xlane.xlu0 %3612 }
 0x2ad   : > { %v3696_v34 = vadd.f32 %v6708_v0, %v3613_v59  ;;  %v3622_v9 = vpop.xlane.xlu1 %3621 }
 0x2ae   : > { %v3699_v37 = vadd.f32 %v6708_v0, %v3622_v9 }
 0x2af   : > { %3729 = vst.msk [vmem:[%s6713_s23 + $0x48] sm:$0xff] %vm3719_vm10, %v3696_v34 }
 0x2b0   : > { %3732 = vst.msk [vmem:[%s6713_s23 + $0x60] sm:$0xff] %vm3719_vm10, %v3699_v37  ;;  %v3625_v10 = vpop.xlane.xlu0 %3624 }
 0x2b1   : > { %v3700_v8 = vadd.f32 %v6708_v0, %v3625_v10 }
 0x2b3   : > { %3733 = vst.msk [vmem:[%s6713_s23 + $0x68] sm:$0xff] %vm3719_vm10, %v3700_v8 }
 0x2bb   : > { %v3628_v56 = vpop.xlane.xlu1 %3627 }
 0x2bc   : > { %v3701_v32 = vadd.f32 %v6708_v0, %v3628_v56 }
 0x2bd   : > { %v3631_v62 = vpop.xlane.xlu0 %3630 }
 0x2be   : > { %3734 = vst.msk [vmem:[%s6713_s23 + $0x70] sm:$0xff] %vm3719_vm10, %v3701_v32  ;;  %v3702_v51 = vadd.f32 %v6708_v0, %v3631_v62 }
 0x2c0   : > { %3735 = vst.msk [vmem:[%s6713_s23 + $0x78] sm:$0xff] %vm3719_vm10, %v3702_v51 }
 0x2c7   : > { %v3634_v63 = vpop.xlane.xlu1 %3633 }
 0x2c8   : > { %v3703_v57 = vadd.f32 %v6708_v0, %v3634_v63 }
 0x2c9   : > { %v3637_v48 = vpop.xlane.xlu0 %3636 }
 0x2ca   : > { %3736 = vst.msk [vmem:[%s6713_s23 + $0x80] sm:$0xff] %vm3719_vm10, %v3703_v57  ;;  %v3704_v7 = vadd.f32 %v6708_v0, %v3637_v48 }
 0x2cc   : > { %3737 = vst.msk [vmem:[%s6713_s23 + $0x88] sm:$0xff] %vm3719_vm10, %v3704_v7 }
 0x2d9   : > { %v3640_v49 = vpop.xlane.xlu1 %3639 }
 0x2da   : > { %v3705_v43 = vadd.f32 %v6708_v0, %v3640_v49 }
 0x2db   : > { %v3643_v52 = vpop.xlane.xlu0 %3642 }
 0x2dc   : > { %3738 = vst.msk [vmem:[%s6713_s23 + $0x90] sm:$0xff] %vm3719_vm10, %v3705_v43  ;;  %v3706_v29 = vadd.f32 %v6708_v0, %v3643_v52 }
 0x2dd   : > { %v3664_v41 = vpop.xlane.xlu1 %3663 }
 0x2de   : > { %3739 = vst.msk [vmem:[%s6713_s23 + $0x98] sm:$0xff] %vm3719_vm10, %v3706_v29  ;;  %v3713_v33 = vadd.f32 %v6708_v0, %v3664_v41 }
 0x2df   : > { %v3667_v5 = vpop.xlane.xlu0 %3666 }
 0x2e0   : > { %3746 = vst.msk [vmem:[%s6713_s23 + $0xd0] sm:$0xff] %vm3719_vm10, %v3713_v33  ;;  %v3714_v13 = vadd.f32 %v6708_v0, %v3667_v5 }
 0x2e1   : > { %v3658_v14 = vpop.xlane.xlu1 %3657 }
 0x2e2   : > { %3747 = vst.msk [vmem:[%s6713_s23 + $0xd8] sm:$0xff] %vm3719_vm10, %v3714_v13  ;;  %v3711_v3 = vadd.f32 %v6708_v0, %v3658_v14 }
 0x2e3   : > { %v3661_v1 = vpop.xlane.xlu0 %3660 }
 0x2e4   : > { %3744 = vst.msk [vmem:[%s6713_s23 + $0xc0] sm:$0xff] %vm3719_vm10, %v3711_v3  ;;  %v3712_v39 = vadd.f32 %v6708_v0, %v3661_v1 }
 0x2e6   : > { %3745 = vst.msk [vmem:[%s6713_s23 + $0xc8] sm:$0xff] %vm3719_vm10, %v3712_v39 }
 0x2ea   : > { %v3646_v26 = vpop.xlane.xlu1 %3645 }
 0x2eb   : > { %v3707_v24 = vadd.f32 %v6708_v0, %v3646_v26 }
 0x2ec   : > { %v3649_v40 = vpop.xlane.xlu0 %3648 }
 0x2ed   : > { %3740 = vst.msk [vmem:[%s6713_s23 + $0xa0] sm:$0xff] %vm3719_vm10, %v3707_v24  ;;  %v3708_v20 = vadd.f32 %v6708_v0, %v3649_v40 }
 0x2ee   : > { %v3670_v17 = vpop.xlane.xlu1 %3669 }
 0x2ef   : > { %3741 = vst.msk [vmem:[%s6713_s23 + $0xa8] sm:$0xff] %vm3719_vm10, %v3708_v20  ;;  %v3715_v35 = vadd.f32 %v6708_v0, %v3670_v17 }
 0x2f0   : > { %v3673_v42 = vpop.xlane.xlu0 %3672 }
 0x2f1   : > { %3748 = vst.msk [vmem:[%s6713_s23 + $0xe0] sm:$0xff] %vm3719_vm10, %v3715_v35  ;;  %v3716_v50 = vadd.f32 %v6708_v0, %v3673_v42 }
 0x2f3   : > { %3749 = vst.msk [vmem:[%s6713_s23 + $0xe8] sm:$0xff] %vm3719_vm10, %v3716_v50 }
 0x2fe   : > { %v3652_v31 = vpop.xlane.xlu1 %3651 }
 0x2ff   : > { %v3709_v2 = vadd.f32 %v6708_v0, %v3652_v31 }
 0x300   : > { %v3655_v58 = vpop.xlane.xlu0 %3654 }
 0x301   : > { %3742 = vst.msk [vmem:[%s6713_s23 + $0xb0] sm:$0xff] %vm3719_vm10, %v3709_v2  ;;  %v3710_v30 = vadd.f32 %v6708_v0, %v3655_v58 }
 0x302   : > { %v3676_v22 = vpop.xlane.xlu1 %3675 }
 0x303   : > { %3743 = vst.msk [vmem:[%s6713_s23 + $0xb8] sm:$0xff] %vm3719_vm10, %v3710_v30  ;;  %v3717_v6 = vadd.f32 %v6708_v0, %v3676_v22 }
 0x304   : > { %v3679_v54 = vpop.xlane.xlu0 %3678 }
 0x305   : > { %3750 = vst.msk [vmem:[%s6713_s23 + $0xf0] sm:$0xff] %vm3719_vm10, %v3717_v6  ;;  %v3718_v36 = vadd.f32 %v6708_v0, %v3679_v54 }
 0x307   : > { %3751 = vst.msk [vmem:[%s6713_s23 + $0xf8] sm:$0xff] %vm3719_vm10, %v3718_v36 }
 0x308 PF: > { %s17_s20 = sadd.s32 1, %s4484_s20  }
 0x309   : > { %p14_p4 = scmp.ge.s32.totalorder %s17_s20, 4  }
 0x30b   :  { %16 = sbr.rel (!%p14_p4) target bundleno = 3 (0x3), region = 72 }

</bundles_post_ra>
